<compile_context>
chip_gen: v5e
topology: v5e:2x2
jax: 0.10.0
libtpu: 0.0.40
codegen_flags: <defaults>
</compile_context>

<pallas_src>
import jax
import jax.numpy as jnp
from jax.experimental import pallas as pl
from jax.experimental.pallas import tpu as pltpu

LANE = 128  # TPU lane width; each projection half gets one lane tile (requires n_heads <= 128)


def gated_image_attention_kernel(x_ref, wag_ref, bag_ref, wo_ref, bo_ref, out_ref):
    # x_ref:   (Bt*S, Fp)     f32   batch*seq rows, features zero-padded to Fp
    # wag_ref: (Fp, 2*LANE)   bf16  attention weights in lanes [0,H), gating in [LANE, LANE+H)
    # bag_ref: (1, 2*LANE)    f32
    # wo_ref:  (Fp, H*Fp)     bf16  wo_ref[f, h*Fp + o] = wo3[h, f, o]  (zero-padded f, o)
    # bo_ref:  (1, Fp)        f32
    # out_ref: (Bt, Fp)
    rows, Fp = x_ref.shape
    Bt = out_ref.shape[0]
    S = rows // Bt
    H = wo_ref.shape[1] // Fp

    x2 = x_ref[...]                                   # (Bt*S, Fp) f32
    x2b = x2.astype(jnp.bfloat16)                     # in-kernel cast: VPU filler under the MXU

    # --- fused attention/gating projection: one lane-dense MXU matmul, f32 accumulation ---
    y = jnp.dot(x2b, wag_ref[...], preferred_element_type=jnp.float32) + bag_ref[...]
    y3 = y.reshape(Bt, S, 2 * LANE)                   # leading-dim split only (S == f32 sublane tile)
    logits = y3[:, :, :LANE]                          # attention half (vreg-boundary slice)
    gate_lin = y3[:, :, LANE:]                        # gating half    (vreg-boundary slice)

    # --- softmax over the sequence axis (torch dim=1); padded lanes are never read downstream ---
    m = jnp.max(logits, axis=1, keepdims=True)        # (Bt, 1, LANE) sublane reduce (XLU)
    e = jnp.exp(logits - m)
    denom = jnp.sum(e, axis=1, keepdims=True)
    attn = e * pl.reciprocal(denom, approx=True)      # EUP reciprocal (approx=False for strict parity)

    # --- sigmoid gating; dropout = identity (eval mode) ---
    gate = jax.nn.sigmoid(gate_lin)
    w = attn * gate                                   # (Bt, S, LANE) f32; only lanes [0, H) are used

    # --- weighted-sum-over-sequence fused with linear_out ---
    #   z[b,s,h*Fp+o] = sum_f x[b,s,f] * wo3[h,f,o]          (one lane-dense MXU matmul, big M)
    #   out[b,o]      = sum_{s,h} w[b,s,h] * z[b,s,h*Fp+o] + bo[o]   (small VPU/XLU reduction)
    z = jnp.dot(x2b, wo_ref[...], preferred_element_type=jnp.float32)   # (Bt*S, H*Fp) f32
    acc = jnp.zeros((Bt, Fp), jnp.float32)
    for h in range(H):                                # small static loop; slices on 128-lane boundaries
        z_h = z[:, h * Fp:(h + 1) * Fp].reshape(Bt, S, Fp)
        w_h = w[:, :, h:h + 1]                        # (Bt, S, 1)
        acc = acc + jnp.sum(w_h * z_h, axis=1)        # sublane reduce over S
    out_ref[...] = (acc + bo_ref[...]).astype(out_ref.dtype)


def _round_up(x, m):
    return (x + m - 1) // m * m


def _vmem_capacity_bytes():
    try:
        return int(pltpu.get_tpu_info().vmem_capacity_bytes)
    except Exception:
        return 64 << 20          # v7x per-TensorCore VMEM: safe lower bound on every generation


def _min_grid_steps():
    # v7x has 2 TensorCores per chip -> keep >= 2 "parallel" grid steps so both get work.
    # Single-TC parts (v5e / v6e): extra grid steps are pure ~0.35 us/step overhead.
    try:
        kind = jax.devices()[0].device_kind.lower()
    except Exception:
        return 1
    return 2 if "v7" in kind else 1


def _working_set_bytes(bt, S, Fp, H):
    f32, bf16 = 4, 2
    rows = bt * S
    blocks = 2 * (rows * Fp * f32 + bt * Fp * f32)                 # double-buffered x / out blocks
    weights = (Fp * 2 * LANE * bf16 + 2 * LANE * f32               # fused projection W + b
               + Fp * H * Fp * bf16 + Fp * f32)                    # fused output W + b (single-buffered)
    temps = (rows * Fp * bf16                                      # in-kernel bf16 copy of x
             + rows * 2 * LANE * f32                               # projection output y
             + 3 * rows * LANE * f32                               # attn / gate / w
             + rows * H * Fp * f32                                 # z
             + bt * Fp * f32)                                      # accumulator
    return blocks + weights + temps


def _pick_batch_tile(B, S, Fp, H, vmem_budget, min_steps):
    """Largest bt that divides B, keeps the (bt, Fp) output block sublane-aligned,
    keeps >= min_steps grid steps (v7x), and fits the per-generation VMEM budget."""
    divisors = [d for d in range(1, B + 1) if B % d == 0]
    for bt in sorted(divisors, reverse=True):
        if bt != B and bt % 8 != 0:
            continue                     # (8,128) rule on the (bt, Fp) output block
        if B // bt < min_steps:
            continue
        if _working_set_bytes(bt, S, Fp, H) <= vmem_budget:
            return bt
    for bt in sorted(divisors):          # fallback: smallest legal tile, ignore steps/budget
        if bt == B or bt % 8 == 0:
            return bt
    return B


def gated_image_attention(x, wa, ba, wg, bg, wo3, bo):
    """Forward pass of GatedImageAttention (eval mode, n_heads > 1 branch).

    x: (B, S, F) f32; wa/wg: (F, H); ba/bg: (1, H); wo3: (H, F, F); bo: (1, F).
    wo3[h, f, o] multiplies gated[b, f, h]; this parametrization reproduces torch's
    (f, h)-major Flatten followed by linear_out exactly (same linear map).  Returns (B, F).
    """
    B, S, F = x.shape
    H = wa.shape[1]
    assert H <= LANE, "each projection half is padded to a single 128-lane tile"
    Fp = _round_up(F, LANE)

    # ---- host-side parameter prep (layout plumbing only; weights are tiny) ----
    wag = jnp.zeros((Fp, 2 * LANE), jnp.float32)
    wag = wag.at[:F, :H].set(wa).at[:F, LANE:LANE + H].set(wg).astype(jnp.bfloat16)
    bag = jnp.zeros((1, 2 * LANE), jnp.float32)
    bag = bag.at[:, :H].set(ba).at[:, LANE:LANE + H].set(bg)

    # fused output weight: wo_p[f, h*Fp + o] = wo3[h, f, o]  (zero pad f, o up to Fp)
    wo_p = jnp.zeros((Fp, H, Fp), jnp.float32)
    wo_p = wo_p.at[:F, :, :F].set(jnp.transpose(wo3, (1, 0, 2)))
    wo_p = wo_p.reshape(Fp, H * Fp).astype(jnp.bfloat16)
    bo_p = jnp.zeros((1, Fp), jnp.float32).at[:, :F].set(bo)

    # x stays f32 (bf16 cast happens in-kernel); pad features to Fp, flatten (B, S) -> rows
    x_f32 = x.astype(jnp.float32)
    if Fp != F:
        x_f32 = jnp.pad(x_f32, ((0, 0), (0, 0), (0, Fp - F)))
    x2 = x_f32.reshape(B * S, Fp)

    vmem_budget = int(0.75 * _vmem_capacity_bytes())    # leave headroom for Mosaic scratch / spill
    bt = _pick_batch_tile(B, S, Fp, H, vmem_budget, _min_grid_steps())
    grid = (B // bt,)
    vmem_limit = int(min(max(_working_set_bytes(bt, S, Fp, H) + (4 << 20), 16 << 20), vmem_budget))

    cost = pl.CostEstimate(
        flops=2 * B * S * Fp * (2 * LANE)        # fused attention/gating projection
        + 2 * B * S * Fp * (H * Fp)              # x @ wo_p (weighted sum fused with linear_out)
        + 2 * B * S * H * Fp,                    # gating multiply + sequence reduction
        transcendentals=2 * B * S * LANE,        # exp + sigmoid
        bytes_accessed=(B * S * Fp * 4 + Fp * 2 * LANE * 2 + 2 * LANE * 4
                        + Fp * H * Fp * 2 + Fp * 4 + B * Fp * 4),
    )

    def build(single_buffer_weights):
        wkw = {"pipeline_mode": pl.Buffered(1)} if single_buffer_weights else {}
        # TODO(synk): at production sizes where wo_p (Fp x H*Fp bf16) exceeds ~1/4 of v7x VMEM,
        # add an "arbitrary" grid axis tiling H*Fp with an f32 accumulator scratch instead of
        # keeping the whole fused output weight resident.
        return pl.pallas_call(
            gated_image_attention_kernel,
            out_shape=jax.ShapeDtypeStruct((B, Fp), x.dtype),
            grid=grid,
            in_specs=[
                pl.BlockSpec((bt * S, Fp), lambda i: (i, 0)),             # x rows tile (f32)
                pl.BlockSpec((Fp, 2 * LANE), lambda i: (0, 0), **wkw),    # fused attn/gate weight
                pl.BlockSpec((1, 2 * LANE), lambda i: (0, 0), **wkw),     # fused attn/gate bias
                pl.BlockSpec((Fp, H * Fp), lambda i: (0, 0), **wkw),      # fused linear_out weight
                pl.BlockSpec((1, Fp), lambda i: (0, 0), **wkw),           # linear_out bias
            ],
            out_specs=pl.BlockSpec((bt, Fp), lambda i: (i, 0)),           # lane-dense (bt, Fp) slab
            compiler_params=pltpu.CompilerParams(
                dimension_semantics=("parallel",),
                vmem_limit_bytes=vmem_limit,
            ),
            cost_estimate=cost,
        )

    try:
        out_p = build(True)(x2, wag, bag, wo_p, bo_p)
    except Exception:
        # pipeline_mode=pl.Buffered(1) support varies across jax versions; retry default-buffered.
        out_p = build(False)(x2, wag, bag, wo_p, bo_p)

    return out_p[:, :F]


def reference_forward(x, wa, ba, wg, bg, wo3, bo):
    """Pure-JAX (f32) transcription of the PyTorch forward (eval mode, n_heads > 1)."""
    attn = jax.nn.softmax(x @ wa + ba, axis=1)                  # softmax over the sequence dim
    gate = jax.nn.sigmoid(x @ wg + bg)
    w = attn * gate                                             # (B, S, H)
    gated = (w[:, :, None, :] * x[..., None]).sum(axis=1)       # (B, F, H)  (torch Flatten order)
    return jnp.einsum('bfh,hfo->bo', gated, wo3) + bo


if __name__ == "__main__":
    B, S, F, H = 16, 8, 32, 4          # batch, seq_len, n_image_features, n_heads
    key = jax.random.PRNGKey(0)
    k = jax.random.split(key, 7)

    x   = jax.random.normal(k[0], (B, S, F), jnp.float32)
    wa  = jax.random.normal(k[1], (F, H), jnp.float32) * 0.1
    ba  = jax.random.normal(k[2], (1, H), jnp.float32) * 0.1
    wg  = jax.random.normal(k[3], (F, H), jnp.float32) * 0.1
    bg  = jax.random.normal(k[4], (1, H), jnp.float32) * 0.1
    wo3 = jax.random.normal(k[5], (H, F, F), jnp.float32) * 0.1
    bo  = jax.random.normal(k[6], (1, F), jnp.float32) * 0.1

    out = gated_image_attention(x, wa, ba, wg, bg, wo3, bo)
    out = jax.block_until_ready(out)

    ref = reference_forward(x, wa, ba, wg, bg, wo3, bo)
    assert out.shape == (B, F), f"bad output shape {out.shape}"
    # bf16 MXU dots (f32 accumulation) + approx softmax reciprocal => loose-ish tolerance.
    if not jnp.allclose(out, ref, atol=3e-2, rtol=3e-2):
        max_err = float(jnp.max(jnp.abs(out - ref)))
        raise AssertionError(f"Pallas kernel does not match reference (max abs err {max_err})")
    print("KERNEL_OK")
</pallas_src>

<mosaic_0001>
module attributes {stable_mosaic.version = 11 : i64} {
  func.func @gated_image_attention_kernel(%arg0: i32, %arg1: memref<128x128xf32, #tpu.memory_space<vmem>>, %arg2: memref<128x256xbf16, #tpu.memory_space<vmem>>, %arg3: memref<1x256xf32, #tpu.memory_space<vmem>>, %arg4: memref<128x512xbf16, #tpu.memory_space<vmem>>, %arg5: memref<1x128xf32, #tpu.memory_space<vmem>>, %arg6: memref<16x128xf32, #tpu.memory_space<vmem>>) attributes {dimension_semantics = [#tpu.dimension_semantics<parallel>], iteration_bounds = array<i64: 1>, scalar_prefetch = 0 : i64, scratch_operands = 0 : i64, tpu.core_type = #tpu.core_type<tc>, window_params = [{transform_indices = @transform_0, window_bounds = array<i64: 128, 128>}, {pipeline_mode = #tpu.pipeline_mode<synchronous>, transform_indices = @transform_1, window_bounds = array<i64: 128, 256>}, {pipeline_mode = #tpu.pipeline_mode<synchronous>, transform_indices = @transform_2, window_bounds = array<i64: 1, 256>}, {pipeline_mode = #tpu.pipeline_mode<synchronous>, transform_indices = @transform_3, window_bounds = array<i64: 128, 512>}, {pipeline_mode = #tpu.pipeline_mode<synchronous>, transform_indices = @transform_4, window_bounds = array<i64: 1, 128>}, {transform_indices = @transform_5, window_bounds = array<i64: 16, 128>}]} {
    %c0 = arith.constant 0 : index
    %c0_0 = arith.constant 0 : index
    %0 = vector.load %arg1[%c0, %c0_0] : memref<128x128xf32, #tpu.memory_space<vmem>>, vector<128x128xf32>
    %1 = arith.truncf %0 : vector<128x128xf32> to vector<128x128xbf16>
    %c0_1 = arith.constant 0 : index
    %c0_2 = arith.constant 0 : index
    %2 = vector.load %arg2[%c0_1, %c0_2] : memref<128x256xbf16, #tpu.memory_space<vmem>>, vector<128x256xbf16>
    %cst = arith.constant dense<0.000000e+00> : vector<128x256xf32>
    %3 = tpu.matmul %1, %2, %cst {dimension_numbers = #tpu.dot_dimension_numbers<[1], [0], [0], [1], [0, 0, 1, 1], [], []>} : vector<128x128xbf16>, vector<128x256xbf16>, vector<128x256xf32> -> vector<128x256xf32>
    %c0_3 = arith.constant 0 : index
    %c0_4 = arith.constant 0 : index
    %4 = vector.load %arg3[%c0_3, %c0_4] : memref<1x256xf32, #tpu.memory_space<vmem>>, vector<1x256xf32>
    %5 = vector.broadcast %4 : vector<1x256xf32> to vector<128x256xf32>
    %6 = arith.addf %3, %5 : vector<128x256xf32>
    %7 = vector.shape_cast %6 : vector<128x256xf32> to vector<16x8x256xf32>
    %8 = vector.extract_strided_slice %7 {offsets = [0, 0, 0], sizes = [16, 8, 128], strides = [1, 1, 1]} : vector<16x8x256xf32> to vector<16x8x128xf32>
    %9 = vector.extract_strided_slice %7 {offsets = [0, 0, 128], sizes = [16, 8, 128], strides = [1, 1, 1]} : vector<16x8x256xf32> to vector<16x8x128xf32>
    %cst_5 = arith.constant dense<0xFF800000> : vector<16x128xf32>
    %10 = vector.multi_reduction <maximumf>, %8, %cst_5 [1] : vector<16x8x128xf32> to vector<16x128xf32>
    %11 = vector.shape_cast %10 : vector<16x128xf32> to vector<16x1x128xf32>
    %12 = vector.broadcast %11 : vector<16x1x128xf32> to vector<16x8x128xf32>
    %13 = arith.subf %8, %12 : vector<16x8x128xf32>
    %14 = math.exp %13 : vector<16x8x128xf32>
    %cst_6 = arith.constant dense<0.000000e+00> : vector<16x128xf32>
    %15 = vector.multi_reduction <add>, %14, %cst_6 [1] : vector<16x8x128xf32> to vector<16x128xf32>
    %16 = vector.shape_cast %15 : vector<16x128xf32> to vector<16x1x128xf32>
    %17 = tpu.reciprocal %16 {approx = true} : vector<16x1x128xf32> -> vector<16x1x128xf32>
    %18 = vector.broadcast %17 : vector<16x1x128xf32> to vector<16x8x128xf32>
    %19 = arith.mulf %14, %18 : vector<16x8x128xf32>
    %20 = arith.negf %9 : vector<16x8x128xf32>
    %21 = math.exp %20 : vector<16x8x128xf32>
    %cst_7 = arith.constant 1.000000e+00 : f32
    %22 = vector.broadcast %cst_7 : f32 to vector<16x8x128xf32>
    %23 = arith.addf %22, %21 : vector<16x8x128xf32>
    %24 = arith.divf %22, %23 : vector<16x8x128xf32>
    %25 = arith.mulf %19, %24 : vector<16x8x128xf32>
    %c0_8 = arith.constant 0 : index
    %c0_9 = arith.constant 0 : index
    %26 = vector.load %arg4[%c0_8, %c0_9] : memref<128x512xbf16, #tpu.memory_space<vmem>>, vector<128x512xbf16>
    %cst_10 = arith.constant dense<0.000000e+00> : vector<128x512xf32>
    %27 = tpu.matmul %1, %26, %cst_10 {dimension_numbers = #tpu.dot_dimension_numbers<[1], [0], [0], [1], [0, 0, 1, 1], [], []>} : vector<128x128xbf16>, vector<128x512xbf16>, vector<128x512xf32> -> vector<128x512xf32>
    %cst_11 = arith.constant 0.000000e+00 : f32
    %28 = vector.broadcast %cst_11 : f32 to vector<16x128xf32>
    %29 = vector.extract_strided_slice %27 {offsets = [0, 0], sizes = [128, 128], strides = [1, 1]} : vector<128x512xf32> to vector<128x128xf32>
    %30 = vector.shape_cast %29 : vector<128x128xf32> to vector<16x8x128xf32>
    %31 = vector.extract_strided_slice %25 {offsets = [0, 0, 0], sizes = [16, 8, 1], strides = [1, 1, 1]} : vector<16x8x128xf32> to vector<16x8x1xf32>
    %32 = vector.broadcast %31 : vector<16x8x1xf32> to vector<16x8x128xf32>
    %33 = arith.mulf %32, %30 : vector<16x8x128xf32>
    %cst_12 = arith.constant dense<0.000000e+00> : vector<16x128xf32>
    %34 = vector.multi_reduction <add>, %33, %cst_12 [1] : vector<16x8x128xf32> to vector<16x128xf32>
    %35 = arith.addf %28, %34 : vector<16x128xf32>
    %36 = vector.extract_strided_slice %27 {offsets = [0, 128], sizes = [128, 128], strides = [1, 1]} : vector<128x512xf32> to vector<128x128xf32>
    %37 = vector.shape_cast %36 : vector<128x128xf32> to vector<16x8x128xf32>
    %38 = vector.extract_strided_slice %25 {offsets = [0, 0, 1], sizes = [16, 8, 1], strides = [1, 1, 1]} : vector<16x8x128xf32> to vector<16x8x1xf32>
    %39 = vector.broadcast %38 : vector<16x8x1xf32> to vector<16x8x128xf32>
    %40 = arith.mulf %39, %37 : vector<16x8x128xf32>
    %cst_13 = arith.constant dense<0.000000e+00> : vector<16x128xf32>
    %41 = vector.multi_reduction <add>, %40, %cst_13 [1] : vector<16x8x128xf32> to vector<16x128xf32>
    %42 = arith.addf %35, %41 : vector<16x128xf32>
    %43 = vector.extract_strided_slice %27 {offsets = [0, 256], sizes = [128, 128], strides = [1, 1]} : vector<128x512xf32> to vector<128x128xf32>
    %44 = vector.shape_cast %43 : vector<128x128xf32> to vector<16x8x128xf32>
    %45 = vector.extract_strided_slice %25 {offsets = [0, 0, 2], sizes = [16, 8, 1], strides = [1, 1, 1]} : vector<16x8x128xf32> to vector<16x8x1xf32>
    %46 = vector.broadcast %45 : vector<16x8x1xf32> to vector<16x8x128xf32>
    %47 = arith.mulf %46, %44 : vector<16x8x128xf32>
    %cst_14 = arith.constant dense<0.000000e+00> : vector<16x128xf32>
    %48 = vector.multi_reduction <add>, %47, %cst_14 [1] : vector<16x8x128xf32> to vector<16x128xf32>
    %49 = arith.addf %42, %48 : vector<16x128xf32>
    %50 = vector.extract_strided_slice %27 {offsets = [0, 384], sizes = [128, 128], strides = [1, 1]} : vector<128x512xf32> to vector<128x128xf32>
    %51 = vector.shape_cast %50 : vector<128x128xf32> to vector<16x8x128xf32>
    %52 = vector.extract_strided_slice %25 {offsets = [0, 0, 3], sizes = [16, 8, 1], strides = [1, 1, 1]} : vector<16x8x128xf32> to vector<16x8x1xf32>
    %53 = vector.broadcast %52 : vector<16x8x1xf32> to vector<16x8x128xf32>
    %54 = arith.mulf %53, %51 : vector<16x8x128xf32>
    %cst_15 = arith.constant dense<0.000000e+00> : vector<16x128xf32>
    %55 = vector.multi_reduction <add>, %54, %cst_15 [1] : vector<16x8x128xf32> to vector<16x128xf32>
    %56 = arith.addf %49, %55 : vector<16x128xf32>
    %c0_16 = arith.constant 0 : index
    %c0_17 = arith.constant 0 : index
    %57 = vector.load %arg5[%c0_16, %c0_17] : memref<1x128xf32, #tpu.memory_space<vmem>>, vector<1x128xf32>
    %58 = vector.broadcast %57 : vector<1x128xf32> to vector<16x128xf32>
    %59 = arith.addf %56, %58 : vector<16x128xf32>
    %c0_18 = arith.constant 0 : index
    %c0_19 = arith.constant 0 : index
    %60 = vector.load %arg6[%c0_18, %c0_19] : memref<16x128xf32, #tpu.memory_space<vmem>>, vector<16x128xf32>
    tpu.vector_store %arg6[%c0_18, %c0_19], %59 {strides = array<i32>} : memref<16x128xf32, #tpu.memory_space<vmem>>, vector<16x128xf32>,
    return
  }
  func.func @transform_0(%arg0: i32) -> (i32, i32) {
    %c0_i32 = arith.constant 0 : i32
    %c0_i32_0 = arith.constant 0 : i32
    return %arg0, %c0_i32 : i32, i32
  }
  func.func @transform_1(%arg0: i32) -> (i32, i32) {
    %c0_i32 = arith.constant 0 : i32
    %c0_i32_0 = arith.constant 0 : i32
    %c0_i32_1 = arith.constant 0 : i32
    return %c0_i32, %c0_i32_0 : i32, i32
  }
  func.func @transform_2(%arg0: i32) -> (i32, i32) {
    %c0_i32 = arith.constant 0 : i32
    %c0_i32_0 = arith.constant 0 : i32
    %c0_i32_1 = arith.constant 0 : i32
    return %c0_i32, %c0_i32_0 : i32, i32
  }
  func.func @transform_3(%arg0: i32) -> (i32, i32) {
    %c0_i32 = arith.constant 0 : i32
    %c0_i32_0 = arith.constant 0 : i32
    %c0_i32_1 = arith.constant 0 : i32
    return %c0_i32, %c0_i32_0 : i32, i32
  }
  func.func @transform_4(%arg0: i32) -> (i32, i32) {
    %c0_i32 = arith.constant 0 : i32
    %c0_i32_0 = arith.constant 0 : i32
    %c0_i32_1 = arith.constant 0 : i32
    return %c0_i32, %c0_i32_0 : i32, i32
  }
  func.func @transform_5(%arg0: i32) -> (i32, i32) {
    %c0_i32 = arith.constant 0 : i32
    %c0_i32_0 = arith.constant 0 : i32
    return %arg0, %c0_i32 : i32, i32
  }
}

module attributes {stable_mosaic.version = 11 : i64} {
  func.func @gated_image_attention_kernel(%arg0: i32, %arg1: memref<128x128xf32, #tpu.memory_space<vmem>>, %arg2: memref<128x256xbf16, #tpu.memory_space<vmem>>, %arg3: memref<1x256xf32, #tpu.memory_space<vmem>>, %arg4: memref<128x512xbf16, #tpu.memory_space<vmem>>, %arg5: memref<1x128xf32, #tpu.memory_space<vmem>>, %arg6: memref<16x128xf32, #tpu.memory_space<vmem>>) attributes {dimension_semantics = [#tpu.dimension_semantics<parallel>], iteration_bounds = array<i64: 1>, scalar_prefetch = 0 : i64, scratch_operands = 0 : i64, tpu.core_type = #tpu.core_type<tc>, window_params = [{transform_indices = @transform_0, window_bounds = array<i64: 128, 128>}, {pipeline_mode = #tpu.pipeline_mode<synchronous>, transform_indices = @transform_1, window_bounds = array<i64: 128, 256>}, {pipeline_mode = #tpu.pipeline_mode<synchronous>, transform_indices = @transform_2, window_bounds = array<i64: 1, 256>}, {pipeline_mode = #tpu.pipeline_mode<synchronous>, transform_indices = @transform_3, window_bounds = array<i64: 128, 512>}, {pipeline_mode = #tpu.pipeline_mode<synchronous>, transform_indices = @transform_4, window_bounds = array<i64: 1, 128>}, {transform_indices = @transform_5, window_bounds = array<i64: 16, 128>}]} {
    %c0 = arith.constant 0 : index
    %c0_0 = arith.constant 0 : index
    %0 = vector.load %arg1[%c0, %c0_0] : memref<128x128xf32, #tpu.memory_space<vmem>>, vector<128x128xf32>
    %1 = arith.truncf %0 : vector<128x128xf32> to vector<128x128xbf16>
    %c0_1 = arith.constant 0 : index
    %c0_2 = arith.constant 0 : index
    %2 = vector.load %arg2[%c0_1, %c0_2] : memref<128x256xbf16, #tpu.memory_space<vmem>>, vector<128x256xbf16>
    %cst = arith.constant dense<0.000000e+00> : vector<128x256xf32>
    %3 = tpu.matmul %1, %2, %cst {dimension_numbers = #tpu.dot_dimension_numbers<[1], [0], [0], [1], [0, 0, 1, 1], [], []>} : vector<128x128xbf16>, vector<128x256xbf16>, vector<128x256xf32> -> vector<128x256xf32>
    %c0_3 = arith.constant 0 : index
    %c0_4 = arith.constant 0 : index
    %4 = vector.load %arg3[%c0_3, %c0_4] : memref<1x256xf32, #tpu.memory_space<vmem>>, vector<1x256xf32>
    %5 = vector.broadcast %4 : vector<1x256xf32> to vector<128x256xf32>
    %6 = arith.addf %3, %5 : vector<128x256xf32>
    %7 = vector.shape_cast %6 : vector<128x256xf32> to vector<16x8x256xf32>
    %8 = vector.extract_strided_slice %7 {offsets = [0, 0, 0], sizes = [16, 8, 128], strides = [1, 1, 1]} : vector<16x8x256xf32> to vector<16x8x128xf32>
    %9 = vector.extract_strided_slice %7 {offsets = [0, 0, 128], sizes = [16, 8, 128], strides = [1, 1, 1]} : vector<16x8x256xf32> to vector<16x8x128xf32>
    %cst_5 = arith.constant dense<0xFF800000> : vector<16x128xf32>
    %10 = vector.multi_reduction <maximumf>, %8, %cst_5 [1] : vector<16x8x128xf32> to vector<16x128xf32>
    %11 = vector.shape_cast %10 : vector<16x128xf32> to vector<16x1x128xf32>
    %12 = vector.broadcast %11 : vector<16x1x128xf32> to vector<16x8x128xf32>
    %13 = arith.subf %8, %12 : vector<16x8x128xf32>
    %14 = math.exp %13 : vector<16x8x128xf32>
    %cst_6 = arith.constant dense<0.000000e+00> : vector<16x128xf32>
    %15 = vector.multi_reduction <add>, %14, %cst_6 [1] : vector<16x8x128xf32> to vector<16x128xf32>
    %16 = vector.shape_cast %15 : vector<16x128xf32> to vector<16x1x128xf32>
    %17 = tpu.reciprocal %16 {approx = true} : vector<16x1x128xf32> -> vector<16x1x128xf32>
    %18 = vector.broadcast %17 : vector<16x1x128xf32> to vector<16x8x128xf32>
    %19 = arith.mulf %14, %18 : vector<16x8x128xf32>
    %20 = arith.negf %9 : vector<16x8x128xf32>
    %21 = math.exp %20 : vector<16x8x128xf32>
    %cst_7 = arith.constant 1.000000e+00 : f32
    %22 = vector.broadcast %cst_7 : f32 to vector<16x8x128xf32>
    %23 = arith.addf %22, %21 : vector<16x8x128xf32>
    %24 = arith.divf %22, %23 : vector<16x8x128xf32>
    %25 = arith.mulf %19, %24 : vector<16x8x128xf32>
    %c0_8 = arith.constant 0 : index
    %c0_9 = arith.constant 0 : index
    %26 = vector.load %arg4[%c0_8, %c0_9] : memref<128x512xbf16, #tpu.memory_space<vmem>>, vector<128x512xbf16>
    %cst_10 = arith.constant dense<0.000000e+00> : vector<128x512xf32>
    %27 = tpu.matmul %1, %26, %cst_10 {dimension_numbers = #tpu.dot_dimension_numbers<[1], [0], [0], [1], [0, 0, 1, 1], [], []>} : vector<128x128xbf16>, vector<128x512xbf16>, vector<128x512xf32> -> vector<128x512xf32>
    %cst_11 = arith.constant 0.000000e+00 : f32
    %28 = vector.broadcast %cst_11 : f32 to vector<16x128xf32>
    %29 = vector.extract_strided_slice %27 {offsets = [0, 0], sizes = [128, 128], strides = [1, 1]} : vector<128x512xf32> to vector<128x128xf32>
    %30 = vector.shape_cast %29 : vector<128x128xf32> to vector<16x8x128xf32>
    %31 = vector.extract_strided_slice %25 {offsets = [0, 0, 0], sizes = [16, 8, 1], strides = [1, 1, 1]} : vector<16x8x128xf32> to vector<16x8x1xf32>
    %32 = vector.broadcast %31 : vector<16x8x1xf32> to vector<16x8x128xf32>
    %33 = arith.mulf %32, %30 : vector<16x8x128xf32>
    %cst_12 = arith.constant dense<0.000000e+00> : vector<16x128xf32>
    %34 = vector.multi_reduction <add>, %33, %cst_12 [1] : vector<16x8x128xf32> to vector<16x128xf32>
    %35 = arith.addf %28, %34 : vector<16x128xf32>
    %36 = vector.extract_strided_slice %27 {offsets = [0, 128], sizes = [128, 128], strides = [1, 1]} : vector<128x512xf32> to vector<128x128xf32>
    %37 = vector.shape_cast %36 : vector<128x128xf32> to vector<16x8x128xf32>
    %38 = vector.extract_strided_slice %25 {offsets = [0, 0, 1], sizes = [16, 8, 1], strides = [1, 1, 1]} : vector<16x8x128xf32> to vector<16x8x1xf32>
    %39 = vector.broadcast %38 : vector<16x8x1xf32> to vector<16x8x128xf32>
    %40 = arith.mulf %39, %37 : vector<16x8x128xf32>
    %cst_13 = arith.constant dense<0.000000e+00> : vector<16x128xf32>
    %41 = vector.multi_reduction <add>, %40, %cst_13 [1] : vector<16x8x128xf32> to vector<16x128xf32>
    %42 = arith.addf %35, %41 : vector<16x128xf32>
    %43 = vector.extract_strided_slice %27 {offsets = [0, 256], sizes = [128, 128], strides = [1, 1]} : vector<128x512xf32> to vector<128x128xf32>
    %44 = vector.shape_cast %43 : vector<128x128xf32> to vector<16x8x128xf32>
    %45 = vector.extract_strided_slice %25 {offsets = [0, 0, 2], sizes = [16, 8, 1], strides = [1, 1, 1]} : vector<16x8x128xf32> to vector<16x8x1xf32>
    %46 = vector.broadcast %45 : vector<16x8x1xf32> to vector<16x8x128xf32>
    %47 = arith.mulf %46, %44 : vector<16x8x128xf32>
    %cst_14 = arith.constant dense<0.000000e+00> : vector<16x128xf32>
    %48 = vector.multi_reduction <add>, %47, %cst_14 [1] : vector<16x8x128xf32> to vector<16x128xf32>
    %49 = arith.addf %42, %48 : vector<16x128xf32>
    %50 = vector.extract_strided_slice %27 {offsets = [0, 384], sizes = [128, 128], strides = [1, 1]} : vector<128x512xf32> to vector<128x128xf32>
    %51 = vector.shape_cast %50 : vector<128x128xf32> to vector<16x8x128xf32>
    %52 = vector.extract_strided_slice %25 {offsets = [0, 0, 3], sizes = [16, 8, 1], strides = [1, 1, 1]} : vector<16x8x128xf32> to vector<16x8x1xf32>
    %53 = vector.broadcast %52 : vector<16x8x1xf32> to vector<16x8x128xf32>
    %54 = arith.mulf %53, %51 : vector<16x8x128xf32>
    %cst_15 = arith.constant dense<0.000000e+00> : vector<16x128xf32>
    %55 = vector.multi_reduction <add>, %54, %cst_15 [1] : vector<16x8x128xf32> to vector<16x128xf32>
    %56 = arith.addf %49, %55 : vector<16x128xf32>
    %c0_16 = arith.constant 0 : index
    %c0_17 = arith.constant 0 : index
    %57 = vector.load %arg5[%c0_16, %c0_17] : memref<1x128xf32, #tpu.memory_space<vmem>>, vector<1x128xf32>
    %58 = vector.broadcast %57 : vector<1x128xf32> to vector<16x128xf32>
    %59 = arith.addf %56, %58 : vector<16x128xf32>
    %c0_18 = arith.constant 0 : index
    %c0_19 = arith.constant 0 : index
    %60 = vector.load %arg6[%c0_18, %c0_19] : memref<16x128xf32, #tpu.memory_space<vmem>>, vector<16x128xf32>
    tpu.vector_store %arg6[%c0_18, %c0_19], %59 {strides = array<i32>} : memref<16x128xf32, #tpu.memory_space<vmem>>, vector<16x128xf32>,
    return
  }
  func.func @transform_0(%arg0: i32) -> (i32, i32) {
    %c0_i32 = arith.constant 0 : i32
    %c0_i32_0 = arith.constant 0 : i32
    return %arg0, %c0_i32 : i32, i32
  }
  func.func @transform_1(%arg0: i32) -> (i32, i32) {
    %c0_i32 = arith.constant 0 : i32
    %c0_i32_0 = arith.constant 0 : i32
    %c0_i32_1 = arith.constant 0 : i32
    return %c0_i32, %c0_i32_0 : i32, i32
  }
  func.func @transform_2(%arg0: i32) -> (i32, i32) {
    %c0_i32 = arith.constant 0 : i32
    %c0_i32_0 = arith.constant 0 : i32
    %c0_i32_1 = arith.constant 0 : i32
    return %c0_i32, %c0_i32_0 : i32, i32
  }
  func.func @transform_3(%arg0: i32) -> (i32, i32) {
    %c0_i32 = arith.constant 0 : i32
    %c0_i32_0 = arith.constant 0 : i32
    %c0_i32_1 = arith.constant 0 : i32
    return %c0_i32, %c0_i32_0 : i32, i32
  }
  func.func @transform_4(%arg0: i32) -> (i32, i32) {
    %c0_i32 = arith.constant 0 : i32
    %c0_i32_0 = arith.constant 0 : i32
    %c0_i32_1 = arith.constant 0 : i32
    return %c0_i32, %c0_i32_0 : i32, i32
  }
  func.func @transform_5(%arg0: i32) -> (i32, i32) {
    %c0_i32 = arith.constant 0 : i32
    %c0_i32_0 = arith.constant 0 : i32
    return %arg0, %c0_i32 : i32, i32
  }
}

</mosaic_0001>

<bundles_post_ra>
// kernel: tpu_custom_call.1
= control target key start
LH: loop header
LB: loop body
LE: loop exit
PB: predicated region body
PF: predicated region fallthrough
CT: control target
= control target key end

     0   :  { %10 = vsyncpa [#allocation3], 0  ;;  %s3878_s0 = inlined_call_operand.hbm [shape: f32[128,128], index: 0, kind: input, shape index: {}]   ;;  %s3879_s1 = inlined_call_operand.hbm [shape: bf16[128,256], index: 1, kind: input, shape index: {}]   ;;  %s3880_s2 = inlined_call_operand.hbm [shape: f32[1,256], index: 2, kind: input, shape index: {}]   ;;  %s3881_s3 = inlined_call_operand.hbm [shape: bf16[128,512], index: 3, kind: input, shape index: {}]   ;;  %s3882_s4 = inlined_call_operand.vmem [shape: f32[1,128], index: 4, kind: input, shape index: {}]   ;;  %s3883_s5 = inlined_call_operand.hbm [shape: f32[16,128], index: 5, kind: output, shape index: {}]  }
   0x1   :  { %11 = vsyncpa [#allocation6], 0 }
   0x2   :  { %12 = vsyncpa [#allocation9], 0 }
   0x3   :  { %13 = vsyncpa [#allocation4], 0  ;;  %s31_s20 = sshll.u32 %s3879_s1, 4  ;;  %s2766_s21 = smov [#allocation5]   ;;  %s32_s20 = int_to_ptr.hbm [resolvable:$true] %s31_s20 }
   0x4   :  { %s33_s22 = sshll.u32 %s2766_s21, 4  ;;  %s18_s25 = sshll.u32 %s3878_s0, 4  ;;  %s34_s22 = int_to_ptr.vmem [resolvable:$true] %s33_s22  ;;  %s19_s25 = int_to_ptr.hbm [resolvable:$true] %s18_s25 }
   0x5   :  { %s2767_s26 = smov 128   ;;  %s2768_s27 = smov 8  }
   0x6   :  { %39 = dma.hbm_to_vmem [thread:$0]  %s32_s20, 2048, %s34_s22, [#allocation6], %s2767_s26, %s2767_s26, %s2768_s27  }
   0x7   :  { %s2769_s28 = smov [#allocation2]   ;;  %s45_s1 = sshll.u32 %s3880_s2, 4  ;;  %s46_s1 = int_to_ptr.hbm [resolvable:$true] %s45_s1 }
   0x8   :  { %s20_s29 = sshll.u32 %s2769_s28, 4  ;;  %s55_s8 = sshll.u32 %s3881_s3, 4  ;;  %s21_s29 = int_to_ptr.vmem [resolvable:$true] %s20_s29  ;;  %s56_s8 = int_to_ptr.hbm [resolvable:$true] %s55_s8 }
   0x9   :  { %26 = dma.hbm_to_vmem [thread:$0]  %s19_s25, 2048, %s21_s29, [#allocation3], %s2767_s26, %s2767_s26, %s2768_s27  }
   0xa   :  { %s2770_s9 = smov [#allocation7]   ;;  %s2771_s11 = smov [#allocation8]  }
   0xb   :  { %s47_s10 = sshll.u32 %s2770_s9, 4  ;;  %s57_s12 = sshll.u32 %s2771_s11, 4  ;;  %s48_s10 = int_to_ptr.vmem [resolvable:$true] %s47_s10  ;;  %s58_s12 = int_to_ptr.vmem [resolvable:$true] %s57_s12 }
   0xc   :  { %50 = dma.hbm_to_vmem [thread:$0]  %s46_s1, 32, %s48_s10, [#allocation6]  }
   0xd   :  { %s2772_s13 = smov 256   ;;  %s2773_s2 = smov 16  }
   0xe   :  { %63 = dma.hbm_to_vmem [thread:$0]  %s56_s8, 4096, %s58_s12, [#allocation9], %s2772_s13, %s2772_s13, %s2773_s2  }
   0xf   :  { %2758 = dma.done.wait [#allocation3], 2048  }
  0x10   :  { %2759 = vsyncadd [#allocation3], 4294965248 }
  0x11   :  { %2760 = dma.done.wait [#allocation6], 2080  }
  0x12   :  { %2761 = vsyncadd [#allocation6], 4294965216 }
  0x13   :  { %2762 = dma.done.wait [#allocation9], 4096  }
  0x14   :  { %2763 = vsyncadd [#allocation9], 4294963200  ;;  %v2224_v0 = vld [vmem:[#allocation5 + $0x70] sm:$0xf]  ;;  %v2389_v1 = vld [vmem:[#allocation5 + $0x74] sm:$0xf0] }
  0x15   :  { %v2388_v2 = vld [vmem:[#allocation5 + $0x74] sm:$0xf]  ;;  %v2225_v3 = vor.u32 %v2389_v1, %v2224_v0  ;;  %v2226_v4 = vld [vmem:[#allocation5 + $0x78] sm:$0xf0]  ;;  %v2216_v5 = vld [vmem:[#allocation5 + $0x60] sm:$0xf] }
  0x16   :  { %v2387_v6 = vld [vmem:[#allocation5 + $0x64] sm:$0xf0]  ;;  %v2229_v7 = vor.u32 %v2388_v2, %v2226_v4  ;;  %v2386_v8 = vld [vmem:[#allocation5 + $0x64] sm:$0xf]  ;;  %v2218_v9 = vld [vmem:[#allocation5 + $0x68] sm:$0xf0] }
  0x17   :  { %208 = vmatpush.bf16.msra.mxu0 %v2225_v3  ;;  %2422 = vmatpush.bf16.msra.mxu2 %v2225_v3  ;;  %v2217_v10 = vor.u32 %v2387_v6, %v2216_v5  ;;  %v2221_v11 = vor.u32 %v2386_v8, %v2218_v9  ;;  %v2208_v12 = vld [vmem:[#allocation5 + $0x50] sm:$0xf]  ;;  %v2385_v13 = vld [vmem:[#allocation5 + $0x54] sm:$0xf0]  ;;  %v2384_v14 = vld [vmem:[#allocation5 + $0x54] sm:$0xf] }
  0x18   :  { %257 = vmatpush.bf16.msra.mxu1 %v2229_v7  ;;  %2430 = vmatpush.bf16.msra.mxu3 %v2229_v7  ;;  %v2210_v15 = vld [vmem:[#allocation5 + $0x58] sm:$0xf0]  ;;  %v2209_v16 = vor.u32 %v2385_v13, %v2208_v12  ;;  %v2200_v18 = vld [vmem:[#allocation5 + $0x40] sm:$0xf]  ;;  %v2383_v19 = vld [vmem:[#allocation5 + $0x44] sm:$0xf0] }
  0x19   :  { %v2213_v17 = vor.u32 %v2384_v14, %v2210_v15  ;;  %v2382_v20 = vld [vmem:[#allocation5 + $0x44] sm:$0xf]  ;;  %v2202_v21 = vld [vmem:[#allocation5 + $0x48] sm:$0xf0]  ;;  %v2201_v22 = vor.u32 %v2383_v19, %v2200_v18  ;;  %v2192_v24 = vld [vmem:[#allocation5 + $0x30] sm:$0xf] }
  0x1a   :  { %v2205_v23 = vor.u32 %v2382_v20, %v2202_v21  ;;  %v2381_v25 = vld [vmem:[#allocation5 + $0x34] sm:$0xf0]  ;;  %v2380_v26 = vld [vmem:[#allocation5 + $0x34] sm:$0xf]  ;;  %v2194_v27 = vld [vmem:[#allocation5 + $0x38] sm:$0xf0] }
  0x1b   :  { %209 = vmatpush.bf16.msra.mxu0 %v2217_v10  ;;  %2423 = vmatpush.bf16.msra.mxu2 %v2217_v10  ;;  %v2193_v28 = vor.u32 %v2381_v25, %v2192_v24  ;;  %v2197_v29 = vor.u32 %v2380_v26, %v2194_v27  ;;  %v2184_v30 = vld [vmem:[#allocation5 + $0x20] sm:$0xf]  ;;  %v2379_v31 = vld [vmem:[#allocation5 + $0x24] sm:$0xf0]  ;;  %v2378_v32 = vld [vmem:[#allocation5 + $0x24] sm:$0xf] }
  0x1c   :  { %258 = vmatpush.bf16.msra.mxu1 %v2221_v11  ;;  %2431 = vmatpush.bf16.msra.mxu3 %v2221_v11  ;;  %v2186_v33 = vld [vmem:[#allocation5 + $0x28] sm:$0xf0]  ;;  %v2185_v34 = vor.u32 %v2379_v31, %v2184_v30  ;;  %v2176_v36 = vld [vmem:[#allocation5 + $0x10] sm:$0xf]  ;;  %v2377_v37 = vld [vmem:[#allocation5 + $0x14] sm:$0xf0] }
  0x1d   :  { %v2189_v35 = vor.u32 %v2378_v32, %v2186_v33  ;;  %v2376_v38 = vld [vmem:[#allocation5 + $0x14] sm:$0xf]  ;;  %v2178_v39 = vld [vmem:[#allocation5 + $0x18] sm:$0xf0]  ;;  %v2177_v40 = vor.u32 %v2377_v37, %v2176_v36  ;;  %v2168_v42 = vld [vmem:[#allocation5] sm:$0xf] }
  0x1e   :  { %v2181_v41 = vor.u32 %v2376_v38, %v2178_v39  ;;  %v2375_v43 = vld [vmem:[#allocation5 + $0x4] sm:$0xf0]  ;;  %v2374_v44 = vld [vmem:[#allocation5 + $0x4] sm:$0xf]  ;;  %v2170_v45 = vld [vmem:[#allocation5 + $0x8] sm:$0xf0] }
  0x1f   :  { %210 = vmatpush.bf16.msra.mxu0 %v2209_v16  ;;  %2424 = vmatpush.bf16.msra.mxu2 %v2209_v16  ;;  %v82_v46 = vld [vmem:[#allocation2] sm:$0xff]  ;;  %v2169_v47 = vor.u32 %v2375_v43, %v2168_v42  ;;  %v83_v48 = vld [vmem:[#allocation2 + $0x8] sm:$0xff]  ;;  %v2173_v51 = vor.u32 %v2374_v44, %v2170_v45  ;;  %v2420_v55 = vld [vmem:[#allocation8 + $0xec] sm:$0xf0]  ;;  %s2778_s17 = smov [#allocation10]   ;;  %s2151_s21 = sshll.u32 %s3883_s5, 4  ;;  %s2152_s21 = int_to_ptr.hbm [resolvable:$true] %s2151_s21 }
  0x20   :  { %259 = vmatpush.bf16.msra.mxu1 %v2213_v17  ;;  %2432 = vmatpush.bf16.msra.mxu3 %v2213_v17  ;;  %v90_v49 = vld [vmem:[#allocation2 + $0x40] sm:$0xff]  ;;  %v91_v50 = vld [vmem:[#allocation2 + $0x48] sm:$0xff]  ;;  %v2827_v52 = vpack.c.bf16 %v83_v48, %v82_v46  ;;  %v2416_v58 = vld [vmem:[#allocation8 + $0xcc] sm:$0xf0]  ;;  %s2149_s18 = sshll.u32 %s2778_s17, 4  ;;  %s2150_s18 = int_to_ptr.vmem [resolvable:$true] %s2149_s18 }
  0x21   :  { %v2829_v53 = vpack.c.bf16 %v91_v50, %v90_v49  ;;  %v2360_v54 = vld [vmem:[#allocation8 + $0xe0] sm:$0xf]  ;;  %v2418_v59 = vld [vmem:[#allocation8 + $0xe4] sm:$0xf]  ;;  %v2362_v60 = vld [vmem:[#allocation8 + $0xf0] sm:$0xf0] }
  0x22   :  { %v2344_v56 = vld [vmem:[#allocation8 + $0xc0] sm:$0xf]  ;;  %v2361_v57 = vor.u32 %v2420_v55, %v2360_v54  ;;  %v2365_v62 = vor.u32 %v2418_v59, %v2362_v60  ;;  %v2414_v63 = vld [vmem:[#allocation8 + $0xc4] sm:$0xf]  ;;  %v2346_v0 = vld [vmem:[#allocation8 + $0xd0] sm:$0xf0] }
  0x23   :  { %211 = vmatpush.bf16.msra.mxu0 %v2201_v22  ;;  %2425 = vmatpush.bf16.msra.mxu2 %v2201_v22  ;;  %v2345_v61 = vor.u32 %v2416_v58, %v2344_v56  ;;  %v2328_v1 = vld [vmem:[#allocation8 + $0xa0] sm:$0xf]  ;;  %v2412_v2 = vld [vmem:[#allocation8 + $0xac] sm:$0xf0]  ;;  %v2349_v3 = vor.u32 %v2414_v63, %v2346_v0  ;;  %v85_v8 = vld [vmem:[#allocation2 + $0x18] sm:$0xff] }
  0x24   :  { %260 = vmatpush.bf16.msra.mxu1 %v2205_v23  ;;  %2433 = vmatpush.bf16.msra.mxu3 %v2205_v23  ;;  %v2329_v4 = vor.u32 %v2412_v2, %v2328_v1  ;;  %v84_v5 = vld [vmem:[#allocation2 + $0x10] sm:$0xff]  ;;  %v2312_v6 = vld [vmem:[#allocation8 + $0x80] sm:$0xf]  ;;  %v93_v10 = vld [vmem:[#allocation2 + $0x58] sm:$0xff] }
  0x25   :  { %v2408_v7 = vld [vmem:[#allocation8 + $0x8c] sm:$0xf0]  ;;  %v2835_v12 = vpack.c.bf16 %v85_v8, %v84_v5  ;;  %v2296_v14 = vld [vmem:[#allocation8 + $0x60] sm:$0xf]  ;;  %v2410_v16 = vld [vmem:[#allocation8 + $0xa4] sm:$0xf] }
  0x26   :  { %v92_v9 = vld [vmem:[#allocation2 + $0x50] sm:$0xff]  ;;  %v2313_v11 = vor.u32 %v2408_v7, %v2312_v6  ;;  %v2280_v20 = vld [vmem:[#allocation8 + $0x40] sm:$0xf]  ;;  %v2406_v22 = vld [vmem:[#allocation8 + $0x84] sm:$0xf] }
  0x27   :  { %212 = vmatpush.bf16.msra.mxu0 %v2193_v28  ;;  %2426 = vmatpush.bf16.msra.mxu2 %v2193_v28  ;;  %v2837_v13 = vpack.c.bf16 %v93_v10, %v92_v9  ;;  %v2404_v15 = vld [vmem:[#allocation8 + $0x6c] sm:$0xf0]  ;;  %v2330_v18 = vld [vmem:[#allocation8 + $0xb0] sm:$0xf0]  ;;  %v2264_v25 = vld [vmem:[#allocation8 + $0x20] sm:$0xf] }
  0x28   :  { %261 = vmatpush.bf16.msra.mxu1 %v2197_v29  ;;  %2434 = vmatpush.bf16.msra.mxu3 %v2197_v29  ;;  %v2297_v17 = vor.u32 %v2404_v15, %v2296_v14  ;;  %v2333_v19 = vor.u32 %v2410_v16, %v2330_v18  ;;  %v2400_v21 = vld [vmem:[#allocation8 + $0x4c] sm:$0xf0]  ;;  %v2314_v24 = vld [vmem:[#allocation8 + $0x90] sm:$0xf0]  ;;  %v2419_v28 = vld [vmem:[#allocation8 + $0xec] sm:$0xf] }
  0x29   :  { %v2281_v23 = vor.u32 %v2400_v21, %v2280_v20  ;;  %v2317_v26 = vor.u32 %v2406_v22, %v2314_v24  ;;  %v2396_v27 = vld [vmem:[#allocation8 + $0x2c] sm:$0xf0]  ;;  %v2370_v29 = vld [vmem:[#allocation8 + $0xf8] sm:$0xf0]  ;;  %v2402_v31 = vld [vmem:[#allocation8 + $0x64] sm:$0xf] }
  0x2a   :  { %v2373_v30 = vor.u32 %v2419_v28, %v2370_v29  ;;  %v2298_v32 = vld [vmem:[#allocation8 + $0x70] sm:$0xf0]  ;;  %v2415_v33 = vld [vmem:[#allocation8 + $0xcc] sm:$0xf]  ;;  %v94_v37 = vld [vmem:[#allocation2 + $0x60] sm:$0xff] }
  0x2b   :  { %213 = vmatpush.bf16.msra.mxu0 %v2185_v34  ;;  %2427 = vmatpush.bf16.msra.mxu2 %v2185_v34  ;;  %v2354_v34 = vld [vmem:[#allocation8 + $0xd8] sm:$0xf0]  ;;  %v2301_v38 = vor.u32 %v2402_v31, %v2298_v32  ;;  %v2248_v39 = vld [vmem:[#allocation8] sm:$0xf]  ;;  %v87_v43 = vld [vmem:[#allocation2 + $0x28] sm:$0xff] }
  0x2c   :  { %262 = vmatpush.bf16.msra.mxu1 %v2189_v35  ;;  %2435 = vmatpush.bf16.msra.mxu3 %v2189_v35  ;;  %v2265_v35 = vor.u32 %v2396_v27, %v2264_v25  ;;  %v2357_v36 = vor.u32 %v2415_v33, %v2354_v34  ;;  %v86_v42 = vld [vmem:[#allocation2 + $0x20] sm:$0xff]  ;;  %v2282_v46 = vld [vmem:[#allocation8 + $0x50] sm:$0xf0]  ;;  %v2411_v50 = vld [vmem:[#allocation8 + $0xac] sm:$0xf] }
  0x2d   :  { %v2398_v45 = vld [vmem:[#allocation8 + $0x44] sm:$0xf]  ;;  %v2845_v48 = vpack.c.bf16 %v87_v43, %v86_v42  ;;  %v2266_v56 = vld [vmem:[#allocation8 + $0x30] sm:$0xf0]  ;;  %v2421_v58 = vld [vmem:[#allocation8 + $0xf4] sm:$0xf0] }
  0x2e   :  { %v2285_v49 = vor.u32 %v2398_v45, %v2282_v46  ;;  %v2394_v54 = vld [vmem:[#allocation8 + $0x24] sm:$0xf]  ;;  %v2250_v1 = vld [vmem:[#allocation8 + $0x10] sm:$0xf0]  ;;  %v2352_v2 = vld [vmem:[#allocation8 + $0xc8] sm:$0xf] }
  0x2f   :  { %214 = vmatpush.bf16.msra.mxu0 %v2177_v40  ;;  %2428 = vmatpush.bf16.msra.mxu2 %v2177_v40  ;;  %v2392_v40 = vld [vmem:[#allocation8 + $0xc] sm:$0xf0]  ;;  %v2269_v59 = vor.u32 %v2394_v54, %v2266_v56  ;;  %v2390_v63 = vld [vmem:[#allocation8 + $0x4] sm:$0xf]  ;;  %v2403_v5 = vld [vmem:[#allocation8 + $0x6c] sm:$0xf] }
  0x30   :  { %263 = vmatpush.bf16.msra.mxu1 %v2181_v41  ;;  %2436 = vmatpush.bf16.msra.mxu3 %v2181_v41  ;;  %v95_v41 = vld [vmem:[#allocation2 + $0x68] sm:$0xff]  ;;  %v2249_v44 = vor.u32 %v2392_v40, %v2248_v39  ;;  %v2306_v6 = vld [vmem:[#allocation8 + $0x78] sm:$0xf0]  ;;  %v2413_v8 = vld [vmem:[#allocation8 + $0xb4] sm:$0xf0]  ;;  %v2253_v9 = vor.u32 %v2390_v63, %v2250_v1 }
  0x31   :  { %v2336_v7 = vld [vmem:[#allocation8 + $0xa8] sm:$0xf]  ;;  %v2309_v10 = vor.u32 %v2403_v5, %v2306_v6  ;;  %v2399_v15 = vld [vmem:[#allocation8 + $0x4c] sm:$0xf]  ;;  %v2290_v16 = vld [vmem:[#allocation8 + $0x58] sm:$0xf0] }
  0x32   :  { %v2337_v14 = vor.u32 %v2413_v8, %v2336_v7  ;;  %v2320_v18 = vld [vmem:[#allocation8 + $0x88] sm:$0xf]  ;;  %v88_v20 = vld [vmem:[#allocation2 + $0x30] sm:$0xff]  ;;  %v89_v21 = vld [vmem:[#allocation2 + $0x38] sm:$0xff]  ;;  %v2293_v22 = vor.u32 %v2399_v15, %v2290_v16 }
  0x33   :  { %215 = vmatpush.bf16.msra.mxu0 %v2169_v47  ;;  %2429 = vmatpush.bf16.msra.mxu2 %v2169_v47  ;;  %v2843_v47 = vpack.c.bf16 %v95_v41, %v94_v37  ;;  %v101_v25 = vpack.c.bf16 %v89_v21, %v88_v20  ;;  %v2274_v27 = vld [vmem:[#allocation8 + $0x38] sm:$0xf0]  ;;  %v2304_v28 = vld [vmem:[#allocation8 + $0x68] sm:$0xf]  ;;  %v2391_v31 = vld [vmem:[#allocation8 + $0xc] sm:$0xf] }
  0x34   :  { %264 = vmatpush.bf16.msra.mxu1 %v2173_v51  ;;  %2437 = vmatpush.bf16.msra.mxu3 %v2173_v51  ;;  %v2338_v51 = vld [vmem:[#allocation8 + $0xb8] sm:$0xf0]  ;;  %v2288_v34 = vld [vmem:[#allocation8 + $0x48] sm:$0xf]  ;;  %v2397_v39 = vld [vmem:[#allocation8 + $0x34] sm:$0xf0] }
  0x35   :  { %v2341_v55 = vor.u32 %v2411_v50, %v2338_v51  ;;  %v2258_v32 = vld [vmem:[#allocation8 + $0x18] sm:$0xf0]  ;;  %v2256_v41 = vld [vmem:[#allocation8 + $0x8] sm:$0xf]  ;;  %v2393_v42 = vld [vmem:[#allocation8 + $0x14] sm:$0xf0] }
  0x36   :  { %216 = vmatmul.bf16.vlgmr.msra.gmra.mxu0 %v2827_v52  ;;  %236 = vmatmul.bf16.vlgmr.msra.gmra.mxu2 %v2829_v53  ;;  %v2257_v43 = vor.u32 %v2393_v42, %v2256_v41 }
  0x37   :  { %265 = vmatmul.bf16.vlgmr.msra.gmra.mxu1 %v2827_v52  ;;  %285 = vmatmul.bf16.vlgmr.msra.gmra.mxu3 %v2829_v53 }
  0x38   :  { %1090 = vmatpush.bf16.msrb.mxu2 %v2361_v57  ;;  %1139 = vmatpush.bf16.msrb.mxu3 %v2365_v62  ;;  %v2368_v57 = vld [vmem:[#allocation8 + $0xe8] sm:$0xf]  ;;  %v2322_v62 = vld [vmem:[#allocation8 + $0x98] sm:$0xf0] }
  0x39   :  { %1237 = vmatpush.bf16.msrb.mxu1 %v2373_v30  ;;  %v2369_v60 = vor.u32 %v2421_v58, %v2368_v57  ;;  %v2405_v30 = vld [vmem:[#allocation8 + $0x74] sm:$0xf0] }
  0x3a   :  { %v2305_v33 = vor.u32 %v2405_v30, %v2304_v28 }
  0x3b   :  { %1188 = vmatpush.bf16.msrb.mxu0 %v2369_v60 }
  0x3c   :  { %1091 = vmatpush.bf16.msrb.mxu2 %v2345_v61  ;;  %1140 = vmatpush.bf16.msrb.mxu3 %v2349_v3  ;;  %v2407_v61 = vld [vmem:[#allocation8 + $0x8c] sm:$0xf]  ;;  %v2417_v3 = vld [vmem:[#allocation8 + $0xd4] sm:$0xf0] }
  0x3d   :  { %1238 = vmatpush.bf16.msrb.mxu1 %v2357_v36  ;;  %v2325_v0 = vor.u32 %v2407_v61, %v2322_v62  ;;  %v2261_v36 = vor.u32 %v2391_v31, %v2258_v32 }
  0x40   :  { %1092 = vmatpush.bf16.msrb.mxu2 %v2329_v4  ;;  %1141 = vmatpush.bf16.msrb.mxu3 %v2333_v19  ;;  %v2353_v4 = vor.u32 %v2417_v3, %v2352_v2  ;;  %v2409_v19 = vld [vmem:[#allocation8 + $0x94] sm:$0xf0] }
  0x41   :  { %1239 = vmatpush.bf16.msrb.mxu1 %v2341_v55  ;;  %v2321_v24 = vor.u32 %v2409_v19, %v2320_v18 }
  0x42   :  { %1189 = vmatpush.bf16.msrb.mxu0 %v2353_v4 }
  0x44   :  { %1093 = vmatpush.bf16.msrb.mxu2 %v2313_v11  ;;  %1142 = vmatpush.bf16.msrb.mxu3 %v2317_v26  ;;  %v96_v11 = vld [vmem:[#allocation2 + $0x70] sm:$0xff] }
  0x45   :  { %1240 = vmatpush.bf16.msrb.mxu1 %v2325_v0  ;;  %v2395_v26 = vld [vmem:[#allocation8 + $0x2c] sm:$0xf] }
  0x46   :  { %221 = vmatmul.bf16.gmra.mxu0 %v2835_v12  ;;  %241 = vmatmul.bf16.gmra.mxu2 %v2837_v13  ;;  %v2277_v29 = vor.u32 %v2395_v26, %v2274_v27 }
  0x47   :  { %270 = vmatmul.bf16.gmra.mxu1 %v2835_v12  ;;  %290 = vmatmul.bf16.gmra.mxu3 %v2837_v13 }
  0x48   :  { %1094 = vmatpush.bf16.msrb.mxu2 %v2297_v17  ;;  %1143 = vmatpush.bf16.msrb.mxu3 %v2301_v38  ;;  %v97_v17 = vld [vmem:[#allocation2 + $0x78] sm:$0xff]  ;;  %v2272_v38 = vld [vmem:[#allocation8 + $0x28] sm:$0xf] }
  0x49   :  { %1241 = vmatpush.bf16.msrb.mxu1 %v2309_v10  ;;  %1190 = vmatpush.bf16.msrb.mxu0 %v2337_v14  ;;  %v2273_v40 = vor.u32 %v2397_v39, %v2272_v38  ;;  %v3884_v10 = vmov 1   ;;  %v3890_v14 = vmov 0  }
  0x4a   :  { %2452 = vset.pattern.permute.xlu1 %v3884_v10  ;;  %2451 = vset.pattern.permute.xlu0 %v3890_v14 }
  0x4c   :  { %1095 = vmatpush.bf16.msrb.mxu2 %v2281_v23  ;;  %1144 = vmatpush.bf16.msrb.mxu3 %v2285_v49  ;;  %v2851_v23 = vpack.c.bf16 %v97_v17, %v96_v11 }
  0x4d   :  { %1242 = vmatpush.bf16.msrb.mxu1 %v2293_v22  ;;  %1191 = vmatpush.bf16.msrb.mxu0 %v2321_v24 }
  0x50   :  { %1096 = vmatpush.bf16.msrb.mxu2 %v2265_v35  ;;  %1145 = vmatpush.bf16.msrb.mxu3 %v2269_v59  ;;  %v2401_v35 = vld [vmem:[#allocation8 + $0x54] sm:$0xf0] }
  0x51   :  { %1243 = vmatpush.bf16.msrb.mxu1 %v2277_v29  ;;  %1192 = vmatpush.bf16.msrb.mxu0 %v2305_v33  ;;  %v2289_v37 = vor.u32 %v2401_v35, %v2288_v34 }
  0x54   :  { %1097 = vmatpush.bf16.msrb.mxu2 %v2249_v44  ;;  %1146 = vmatpush.bf16.msrb.mxu3 %v2253_v9  ;;  %v3886_v9 = vmov 3  }
  0x55   :  { %1244 = vmatpush.bf16.msrb.mxu1 %v2261_v36  ;;  %1193 = vmatpush.bf16.msrb.mxu0 %v2289_v37 }
  0x56   :  { %246 = vmatmul.bf16.gmra.mxu2 %v2843_v47  ;;  %226 = vmatmul.bf16.gmra.mxu0 %v2845_v48 }
  0x57   :  { %295 = vmatmul.bf16.gmra.mxu3 %v2843_v47  ;;  %275 = vmatmul.bf16.gmra.mxu1 %v2845_v48 }
  0x58   :  { %2454 = vset.pattern.permute.xlu2 %v3886_v9 }
  0x59   :  { %1194 = vmatpush.bf16.msrb.mxu0 %v2273_v40 }
  0x5d   :  { %1195 = vmatpush.bf16.msrb.mxu0 %v2257_v43 }
  0x66   :  { %251 = vmatmul.bf16.gmra.mxu2 %v2851_v23  ;;  %231 = vmatmul.bf16.gmra.mxu0 %v101_v25 }
  0x67   :  { %300 = vmatmul.bf16.gmra.mxu3 %v2851_v23  ;;  %280 = vmatmul.bf16.gmra.mxu1 %v101_v25 }
  0x76   :  { %1098 = vmatmul.bf16.vlgmr.msrb.gmra.mxu2 %v2827_v52  ;;  %1196 = vmatmul.bf16.vlgmr.msrb.gmra.mxu0 %v2827_v52 }
  0x77   :  { %1147 = vmatmul.bf16.vlgmr.msrb.gmra.mxu3 %v2827_v52  ;;  %1245 = vmatmul.bf16.vlgmr.msrb.gmra.mxu1 %v2827_v52  ;;  %v122_v52 = vld [vmem:[#allocation7] sm:$0x3] }
  0x78   :  { %v2867_v44 = vperm.slane %v122_v52, 0  ;;  %v2873_v50 = vperm.slane %v122_v52, 1 }
  0x86   :  { %1103 = vmatmul.bf16.gmra.mxu2 %v2835_v12  ;;  %1201 = vmatmul.bf16.gmra.mxu0 %v2835_v12 }
  0x87   :  { %1152 = vmatmul.bf16.gmra.mxu3 %v2835_v12  ;;  %1250 = vmatmul.bf16.gmra.mxu1 %v2835_v12 }
  0x96   :  { %1108 = vmatmul.bf16.gmra.mxu2 %v2845_v48  ;;  %1206 = vmatmul.bf16.gmra.mxu0 %v2845_v48 }
  0x97   :  { %1157 = vmatmul.bf16.gmra.mxu3 %v2845_v48  ;;  %1255 = vmatmul.bf16.gmra.mxu1 %v2845_v48 }
  0xa6   :  { %1113 = vmatmul.bf16.gmra.mxu2 %v101_v25  ;;  %1211 = vmatmul.bf16.gmra.mxu0 %v101_v25 }
  0xa7   :  { %1162 = vmatmul.bf16.gmra.mxu3 %v101_v25  ;;  %1260 = vmatmul.bf16.gmra.mxu1 %v101_v25 }
  0xb3   :  { %v217_v45 = vpop.f32.mrf.mxu0 }
  0xb4   :  { %v218_v46 = vadd.f32 %v217_v45, %v2867_v44  ;;  %v266_v55 = vpop.f32.mrf.mxu1 }
  0xb5   :  { %v267_v58 = vadd.f32 %v266_v55, %v2873_v50 }
  0xb6   :  { %v306_v49 = vrot.slane %v218_v46, 4  ;;  %1118 = vmatmul.bf16.gmra.mxu2 %v2829_v53  ;;  %1216 = vmatmul.bf16.gmra.mxu0 %v2829_v53 }
  0xb7   :  { %1167 = vmatmul.bf16.gmra.mxu3 %v2829_v53  ;;  %1265 = vmatmul.bf16.gmra.mxu1 %v2829_v53  ;;  %v2230_v0 = vmul.f32 -1.442695, %v267_v58 }
  0xb8   :  { %v307_v12 = vmax.f32 %v218_v46, %v306_v49 }
  0xb9   :  { %v237_v48 = vpop.f32.mrf.mxu2  ;;  %2509 = vpow2.f32 %v2230_v0 }
  0xba   :  { %v308_v51 = vrot.slane %v307_v12, 2  ;;  %v238_v54 = vadd.f32 %v237_v48, %v2867_v44  ;;  %v286_v3 = vpop.f32.mrf.mxu3 }
  0xbb   :  { %v219_v56 = vpop.f32.mrf.mxu0  ;;  %v287_v4 = vadd.f32 %v286_v3, %v2873_v50 }
  0xbc   :  { %v309_v57 = vmax.f32 %v307_v12, %v308_v51  ;;  %v354_v59 = vrot.slane %v238_v54, 4  ;;  %v2879_v60 = vadd.f32 %v219_v56, %v2867_v44  ;;  %v268_v20 = vpop.f32.mrf.mxu1 }
  0xbd   :  { %v2238_v15 = vmul.f32 -1.442695, %v287_v4  ;;  %v269_v26 = vadd.f32 %v268_v20, %v2873_v50 }
  0xbe   :  { %v310_v61 = vrot.slane %v309_v57, 1  ;;  %v355_v62 = vmax.f32 %v238_v54, %v354_v59  ;;  %v312_v2 = vrot.slane %v2879_v60, 4 }
  0xbf   :  { %v2510_v19 = vpop.eup %2509  ;;  %2511 = vpow2.f32 %v2238_v15  ;;  %v2231_v33 = vmul.f32 -1.442695, %v269_v26 }
  0xc0   :  { %v311_v63 = vmax.f32 %v309_v57, %v310_v61  ;;  %v356_v1 = vrot.slane %v355_v62, 2  ;;  %v313_v8 = vmax.f32 %v2879_v60, %v312_v2  ;;  %v2895_v25 = vadd.f32 1.0, %v2510_v19 }
  0xc1   :  { %v239_v5 = vpop.f32.mrf.mxu2 }
  0xc2   :  { %v357_v53 = vmax.f32 %v355_v62, %v356_v1  ;;  %v402_v6 = vsub.f32 %v218_v46, %v311_v63  ;;  %v2887_v11 = vadd.f32 %v239_v5, %v2867_v44  ;;  %v314_v18 = vrot.slane %v313_v8, 2  ;;  %v288_v32 = vpop.f32.mrf.mxu3 }
  0xc3   :  { %v222_v29 = vpop.f32.mrf.mxu0  ;;  %v289_v37 = vadd.f32 %v288_v32, %v2873_v50  ;;  %vm647_vm0 = vweird.f32 %v2895_v25 }
  0xc4   :  { %v358_v7 = vrot.slane %v357_v53, 1  ;;  %v418_v16 = vmul.f32 1.442695, %v402_v6  ;;  %v360_v21 = vrot.slane %v2887_v11, 4  ;;  %v315_v24 = vmax.f32 %v313_v8, %v314_v18  ;;  %v271_v59 = vpop.f32.mrf.mxu1 }
  0xc5   :  { %v2901_v34 = vadd.f32 %v222_v29, %v2867_v44  ;;  %v2239_v52 = vmul.f32 -1.442695, %v289_v37  ;;  %v272_v2 = vadd.f32 %v271_v59, %v2873_v50 }
  0xc6   :  { %1123 = vmatmul.bf16.gmra.mxu2 %v2837_v13  ;;  %v359_v17 = vmax.f32 %v357_v53, %v358_v7  ;;  %1221 = vmatmul.bf16.gmra.mxu0 %v2837_v13  ;;  %2513 = vpow2.f32 %v418_v16  ;;  %v361_v28 = vmax.f32 %v2887_v11, %v360_v21  ;;  %v316_v31 = vrot.slane %v315_v24, 1 }
  0xc7   :  { %1270 = vmatmul.bf16.gmra.mxu1 %v2837_v13  ;;  %1172 = vmatmul.bf16.gmra.mxu3 %v2837_v13  ;;  %v2512_v13 = vpop.eup %2511  ;;  %2515 = vrcp.f32 %v2895_v25  ;;  %v318_v41 = vrot.slane %v2901_v34, 4  ;;  %v2232_v21 = vmul.f32 -1.442695, %v272_v2 }
  0xc8   :  { %v410_v22 = vsub.f32 %v238_v54, %v359_v17  ;;  %v362_v36 = vrot.slane %v361_v28, 2  ;;  %v317_v38 = vmax.f32 %v315_v24, %v316_v31  ;;  %v2907_v40 = vadd.f32 1.0, %v2512_v13 }
  0xc9   :  { %v242_v27 = vpop.f32.mrf.mxu2  ;;  %v319_v49 = vmax.f32 %v2901_v34, %v318_v41  ;;  %v651_v13 = vand.u32 2147483647, %v2895_v25 }
  0xca   :  { %v434_v30 = vmul.f32 1.442695, %v410_v22  ;;  %v363_v42 = vmax.f32 %v361_v28, %v362_v36  ;;  %v403_v46 = vsub.f32 %v2879_v60, %v317_v38  ;;  %v2927_v58 = vadd.f32 %v242_v27, %v2867_v44  ;;  %v291_v53 = vpop.f32.mrf.mxu3 }
  0xcb   :  { %v320_v61 = vrot.slane %v319_v49, 2  ;;  %v224_v6 = vpop.f32.mrf.mxu0  ;;  %v653_v28 = vand.u32 2147483648, %v2895_v25  ;;  %v292_v36 = vadd.f32 %v291_v53, %v2873_v50  ;;  %vm652_vm3 = vcmp.eq.f32.partialorder %v651_v13, 8.507059e+37 }
  0xcc   :  { %v2903_v35 = vpop.eup %2513  ;;  %2517 = vpow2.f32 %v434_v30  ;;  %v364_v54 = vrot.slane %v363_v42, 1  ;;  %v420_v57 = vmul.f32 1.442695, %v403_v46  ;;  %v366_v5 = vrot.slane %v2927_v58, 4 }
  0xcd   :  { %v450_v39 = vrot.slane %v2903_v35, 4  ;;  %2519 = vpow2.f32 %v2231_v33  ;;  %v2911_v43 = vpop.eup %2515  ;;  %v321_v8 = vmax.f32 %v319_v49, %v320_v61  ;;  %v2945_v20 = vadd.f32 %v224_v6, %v2867_v44 }
  0xce   :  { %2521 = vrcp.f32 %v2907_v40  ;;  %v643_v51 = vmul.f32 %v2911_v43, %v2895_v25  ;;  %v365_v0 = vmax.f32 %v363_v42, %v364_v54  ;;  %v367_v26 = vmax.f32 %v2927_v58, %v366_v5 }
  0xcf   :  { %v451_v12 = vadd.f32 %v2903_v35, %v450_v39  ;;  %2523 = vpow2.f32 %v2239_v52  ;;  %vm648_vm1 = vweird.f32 %v2911_v43  ;;  %v322_v27 = vrot.slane %v321_v8, 1 }
  0xd0   :  { %v644_v63 = vsub.f32 1.0, %v643_v51  ;;  %2525 = vpow2.f32 %v420_v57  ;;  %v411_v18 = vsub.f32 %v2887_v11, %v365_v0  ;;  %v324_v33 = vrot.slane %v2945_v20, 4  ;;  %vm2962_vm2 = vmor %vm647_vm0, %vm648_vm1 }
  0xd1   :  { %v2913_v45 = vpop.f32.mrf.mxu2  ;;  %v452_v56 = vrot.slane %v451_v12, 2  ;;  %v368_v41 = vrot.slane %v367_v26, 2  ;;  %v323_v52 = vmax.f32 %v321_v8, %v322_v27  ;;  %v654_v49 = vor.u32 1.1754944e-38, %v653_v28 }
  0xd2   :  { %v2922_v48 = vpop.eup %2517  ;;  %v645_v19 = vmul.f32 %v2911_v43, %v644_v63  ;;  %v436_v31 = vmul.f32 1.442695, %v411_v18  ;;  %v293_v46 = vpop.f32.mrf.mxu3  ;;  %v325_v57 = vmax.f32 %v2945_v20, %v324_v33  ;;  %v2240_v59 = vmul.f32 -1.442695, %v292_v36 }
  0xd3   :  { %v2520_v55 = vpop.eup %2519  ;;  %v498_v60 = vrot.slane %v2922_v48, 4  ;;  %v453_v62 = vadd.f32 %v452_v56, %v451_v12  ;;  %vm767_vm4 = vweird.f32 %v2907_v40  ;;  %v369_v61 = vmax.f32 %v367_v26, %v368_v41 }
  0xd4   :  { %v2932_v1 = vpop.eup %2521  ;;  %v646_v32 = vadd.f32 %v2911_v43, %v645_v19  ;;  %v773_v63 = vand.u32 2147483648, %v2907_v40  ;;  %v404_v53 = vsub.f32 %v2901_v34, %v323_v52  ;;  %v326_v5 = vrot.slane %v325_v57, 2  ;;  %v227_v52 = vpop.f32.mrf.mxu0 }
  0xd5   :  { %v454_v3 = vrot.slane %v453_v62, 1  ;;  %v2524_v7 = vpop.eup %2523  ;;  %v499_v16 = vadd.f32 %v2922_v48, %v498_v60  ;;  %v763_v17 = vmul.f32 %v2932_v1, %v2907_v40  ;;  %v2984_v60 = vadd.f32 %v2913_v45, %v2867_v44 }
  0xd6   :  { %1128 = vmatmul.bf16.gmra.mxu2 %v2843_v47  ;;  %1226 = vmatmul.bf16.gmra.mxu0 %v2843_v47  ;;  %v2947_v24 = vadd.f32 1.0, %v2524_v7  ;;  %v2953_v29 = vpop.eup %2525  ;;  %v650_v51 = vsel %vm2962_vm2, %v2911_v43, %v646_v32  ;;  %vm768_vm5 = vweird.f32 %v2932_v1  ;;  %v774_v18 = vor.u32 1.1754944e-38, %v773_v63 }
  0xd7   :  { %1177 = vmatmul.bf16.gmra.mxu3 %v2843_v47  ;;  %1275 = vmatmul.bf16.gmra.mxu1 %v2843_v47  ;;  %v2930_v47 = vadd.f32 1.0, %v2520_v55  ;;  %v455_v15 = vadd.f32 %v454_v3, %v453_v62  ;;  %v500_v22 = vrot.slane %v499_v16, 2  ;;  %v764_v30 = vsub.f32 1.0, %v763_v17  ;;  %vm2996_vm6 = vmor %vm767_vm4, %vm768_vm5 }
  0xd8   :  { %v456_v42 = vrot.slane %v2953_v29, 4  ;;  %v655_v62 = vsel %vm652_vm3, %v654_v49, %v650_v51  ;;  %v370_v17 = vrot.slane %v369_v61, 1  ;;  %vm782_vm12 = vweird.f32 %v2947_v24 }
  0xd9   :  { %v2935_v4 = vpop.f32.mrf.mxu2  ;;  %2527 = vrcp.f32 %v2930_v47  ;;  %v501_v11 = vadd.f32 %v500_v22, %v499_v16  ;;  %v765_v54 = vmul.f32 %v2932_v1, %v764_v30  ;;  %v372_v16 = vrot.slane %v2984_v60, 4  ;;  %v273_v22 = vpop.f32.mrf.mxu1 }
  0xda   :  { %2529 = vrcp.f32 %v455_v15  ;;  %v457_v0 = vadd.f32 %v2953_v29, %v456_v42  ;;  %v3003_v19 = vpop.f32.mrf.mxu3  ;;  %v371_v36 = vmax.f32 %v369_v61, %v370_v17  ;;  %vm662_vm8 = vweird.f32 %v2930_v47 }
  0xdb   :  { %2531 = vpow2.f32 %v2232_v21  ;;  %v502_v38 = vrot.slane %v501_v11, 1  ;;  %v766_v45 = vadd.f32 %v2932_v1, %v765_v54  ;;  %v422_v21 = vmul.f32 1.442695, %v404_v53 }
  0xdc   :  { %2533 = vrcp.f32 %v2947_v24  ;;  %v458_v7 = vrot.slane %v457_v0, 2  ;;  %v373_v32 = vmax.f32 %v2984_v60, %v372_v16  ;;  %v3035_v61 = vadd.f32 %v227_v52, %v2867_v44 }
  0xdd   :  { %v503_v25 = vadd.f32 %v502_v38, %v501_v11  ;;  %2535 = vpow2.f32 %v436_v31  ;;  %v770_v27 = vsel %vm2996_vm6, %v2932_v1, %v766_v45  ;;  %v327_v11 = vmax.f32 %v325_v57, %v326_v5 }
  0xde   :  { %v294_v1 = vadd.f32 %v293_v46, %v2873_v50  ;;  %v374_v54 = vrot.slane %v373_v32, 2  ;;  %v412_v46 = vsub.f32 %v2927_v58, %v371_v36  ;;  %v3888_v57 = vmov 2  }
  0xdf   :  { %v2968_v39 = vpop.eup %2527  ;;  %2537 = vrcp.f32 %v503_v25  ;;  %v328_v25 = vrot.slane %v327_v11, 1 }
  0xe0   :  { %v2530_v55 = vpop.eup %2529  ;;  %v658_v56 = vmul.f32 %v2968_v39, %v2930_v47  ;;  %2539 = vpow2.f32 %v2240_v59  ;;  %vm663_vm9 = vweird.f32 %v2968_v39  ;;  %v668_v59 = vand.u32 2147483648, %v2930_v47 }
  0xe1   :  { %v2972_v12 = vpop.f32.mrf.mxu2  ;;  %v2532_v43 = vpop.eup %2531  ;;  %2541 = vpow2.f32 %v422_v21  ;;  %vm3043_vm10 = vmor %vm662_vm8, %vm663_vm9  ;;  %v375_v5 = vmax.f32 %v373_v32, %v374_v54  ;;  %v2241_v6 = vmul.f32 -1.442695, %v294_v1  ;;  %v788_v1 = vand.u32 2147483648, %v2947_v24 }
  0xe2   :  { %v2991_v2 = vpop.eup %2533  ;;  %v659_v15 = vsub.f32 1.0, %v658_v56  ;;  %v3013_v13 = vadd.f32 1.0, %v2532_v43  ;;  %v3032_v43 = vadd.f32 %v2935_v4, %v2867_v44  ;;  %v3047_v4 = vpop.f32.mrf.mxu3  ;;  %v669_v16 = vor.u32 1.1754944e-38, %v668_v59 }
  0xe3   :  { %v3000_v8 = vpop.eup %2535  ;;  %v778_v49 = vmul.f32 %v2991_v2, %v2947_v24  ;;  %v3049_v53 = vpop.f32.mrf.mxu1  ;;  %vm783_vm13 = vweird.f32 %v2991_v2 }
  0xe4   :  { %v504_v28 = vrot.slane %v3000_v8, 4  ;;  %v660_v33 = vmul.f32 %v2968_v39, %v659_v15  ;;  %vm3089_vm14 = vmor %vm782_vm12, %vm783_vm13  ;;  %vm677_vm0 = vweird.f32 %v3013_v13 }
  0xe5   :  { %v2538_v34 = vpop.eup %2537  ;;  %v779_v58 = vsub.f32 1.0, %v778_v49 }
  0xe6   :  { %1133 = vmatmul.bf16.gmra.mxu2 %v2851_v23  ;;  %1231 = vmatmul.bf16.gmra.mxu0 %v2851_v23  ;;  %v570_v26 = vmul.f32 %v2538_v34, %v2922_v48  ;;  %v274_v48 = vadd.f32 %v273_v22, %v2873_v50  ;;  %v2540_v41 = vpop.eup %2539  ;;  %v505_v51 = vadd.f32 %v3000_v8, %v504_v28  ;;  %v376_v28 = vrot.slane %v375_v5, 1 }
  0xe7   :  { %1182 = vmatmul.bf16.gmra.mxu3 %v2851_v23  ;;  %1280 = vmatmul.bf16.gmra.mxu1 %v2851_v23  ;;  %v562_v23 = vmul.f32 %v2530_v55, %v2903_v35  ;;  %v771_v35 = vand.u32 2147483647, %v2907_v40  ;;  %v459_v40 = vadd.f32 %v458_v7, %v457_v0  ;;  %v661_v55 = vadd.f32 %v2968_v39, %v660_v33  ;;  %v3051_v45 = vpop.eup %2541 }
  0xe8   :  { %v3026_v56 = vadd.f32 1.0, %v2540_v41  ;;  %v2233_v63 = vmul.f32 -1.442695, %v274_v48  ;;  %v462_v33 = vrot.slane %v3051_v45, 4  ;;  %v377_v41 = vmax.f32 %v375_v5, %v376_v28 }
  0xe9   :  { %v882_v3 = vmul.f32 %v655_v62, %v562_v23  ;;  %vm772_vm7 = vcmp.eq.f32.partialorder %v771_v35, 8.507059e+37  ;;  %v460_v30 = vrot.slane %v459_v40, 1  ;;  %v3010_v31 = vpop.f32.mrf.mxu2  ;;  %v506_v23 = vrot.slane %v505_v51, 2 }
  0xea   :  { %v775_v37 = vsel %vm772_vm7, %v774_v18, %v770_v27  ;;  %v666_v62 = vand.u32 2147483647, %v2930_v47  ;;  %v329_v35 = vmax.f32 %v327_v11, %v328_v25  ;;  %v665_v7 = vsel %vm3043_vm10, %v2968_v39, %v661_v55  ;;  %v3084_v49 = vpop.f32.mrf.mxu3 }
  0xeb   :  { %1879 = vperm.xlu2 %2454, %v882_v3   ;;  %1495 = vperm.xlu1 %2452, %v882_v3   ;;  %v461_v38 = vadd.f32 %v460_v30, %v459_v40  ;;  %v890_v42 = vmul.f32 %v775_v37, %v570_v26  ;;  %v438_v47 = vmul.f32 1.442695, %v412_v46  ;;  %v378_v18 = vrot.slane %v3032_v43, 4  ;;  %v229_v30 = vpop.f32.mrf.mxu0  ;;  %v3086_v25 = vpop.f32.mrf.mxu1 }
  0xec   :  { %1288 = vperm.xlu0 %2451, %v882_v3   ;;  %v330_v40 = vrot.slane %v3035_v61, 4  ;;  %vm667_vm11 = vcmp.eq.f32.partialorder %v666_v62, 8.507059e+37  ;;  %v780_v39 = vmul.f32 %v2991_v2, %v779_v58  ;;  %v405_v27 = vsub.f32 %v2945_v20, %v329_v35 }
  0xed   :  { %2543 = vrcp.f32 %v461_v38  ;;  %v670_v22 = vsel %vm667_vm11, %v669_v16, %v665_v7  ;;  %v3077_v48 = vadd.f32 %v229_v30, %v2867_v44  ;;  %v789_v5 = vor.u32 1.1754944e-38, %v788_v1 }
  0xee   :  { %2545 = vrcp.f32 %v3013_v13  ;;  %v331_v36 = vmax.f32 %v3035_v61, %v330_v40  ;;  %v781_v37 = vadd.f32 %v2991_v2, %v780_v39  ;;  %v424_v38 = vmul.f32 1.442695, %v405_v27 }
  0xef   :  { %2547 = vrcp.f32 %v3026_v56  ;;  %v336_v62 = vrot.slane %v3077_v48, 4  ;;  %v297_v39 = vadd.f32 %v3003_v19, %v2873_v50  ;;  %v277_v19 = vadd.f32 %v3049_v53, %v2873_v50 }
  0xf0   :  { %2549 = vpow2.f32 %v2233_v63  ;;  %vm797_vm4 = vweird.f32 %v3026_v56 }
  0xf1   :  { %v3057_v17 = vpop.f32.mrf.mxu2  ;;  %2551 = vpow2.f32 %v2241_v6  ;;  %v3106_v6 = vadd.f32 %v2972_v12, %v2867_v44 }
  0xf2   :  { %2553 = vpow2.f32 %v438_v47 }
  0xf3   :  { %2455 = vset.pattern.permute.xlu2 %v3890_v14  ;;  %1527 = vperm.xlu1 %2452, %v890_v42   ;;  %v2544_v15 = vpop.eup %2543 }
  0xf4   :  { %2453 = vset.pattern.permute.xlu0 %v3888_v57  ;;  %1328 = vperm.xlu2 %2455, %v890_v42   ;;  %v563_v21 = vmul.f32 %v2544_v15, %v2953_v29  ;;  %v3067_v32 = vpop.eup %2545  ;;  %v379_v29 = vmax.f32 %v3032_v43, %v378_v18  ;;  %v337_v18 = vmax.f32 %v3077_v48, %v336_v62 }
  0xf5   :  { %1687 = vperm.xlu0 %2453, %v882_v3   ;;  %v507_v3 = vadd.f32 %v506_v23, %v505_v51  ;;  %v3074_v20 = vpop.eup %2547  ;;  %v463_v51 = vadd.f32 %v3051_v45, %v462_v33  ;;  %v332_v23 = vrot.slane %v331_v36, 2  ;;  %v673_v35 = vmul.f32 %v3067_v32, %v3013_v13 }
  0xf6   :  { %v3065_v11 = vmul.f32 %v670_v22, %v563_v21  ;;  %v2550_v52 = vpop.eup %2549  ;;  %v380_v55 = vrot.slane %v379_v29, 2  ;;  %v3113_v47 = vmul.f32 %v3074_v20, %v3026_v56  ;;  %vm678_vm1 = vweird.f32 %v3067_v32 }
  0xf7   :  { %v508_v34 = vrot.slane %v507_v3, 1  ;;  %v2552_v54 = vpop.eup %2551  ;;  %v464_v63 = vrot.slane %v463_v51, 2  ;;  %v3117_v12 = vadd.f32 1.0, %v2550_v52  ;;  %v674_v40 = vsub.f32 1.0, %v673_v35  ;;  %v3142_v52 = vpop.f32.mrf.mxu0  ;;  %vm3163_vm2 = vmor %vm677_vm0, %vm678_vm1 }
  0xf8   :  { %v3093_v59 = vpop.eup %2553  ;;  %v3123_v21 = vadd.f32 1.0, %v2552_v54  ;;  %v2242_v54 = vmul.f32 -1.442695, %v297_v39  ;;  %vm798_vm5 = vweird.f32 %v3074_v20 }
  0xf9   :  { %v509_v26 = vadd.f32 %v508_v34, %v507_v3  ;;  %v3099_v58 = vpop.f32.mrf.mxu2  ;;  %v413_v3 = vsub.f32 %v2984_v60, %v377_v41  ;;  %v510_v15 = vrot.slane %v3093_v59, 4  ;;  %v381_v60 = vmax.f32 %v379_v29, %v380_v55  ;;  %v3136_v41 = vpop.f32.mrf.mxu1  ;;  %vm3211_vm6 = vmor %vm797_vm4, %vm798_vm5 }
  0xfa   :  { %v333_v34 = vmax.f32 %v331_v36, %v332_v23  ;;  %v794_v29 = vsub.f32 1.0, %v3113_v47  ;;  %v675_v1 = vmul.f32 %v3067_v32, %v674_v40  ;;  %vm692_vm8 = vweird.f32 %v3117_v12 }
  0xfb   :  { %2456 = vset.pattern.permute.xlu1 %v3886_v9  ;;  %2555 = vrcp.f32 %v509_v26  ;;  %v440_v22 = vmul.f32 1.442695, %v413_v3  ;;  %v384_v26 = vrot.slane %v3106_v6, 4  ;;  %v382_v30 = vrot.slane %v381_v60, 1 }
  0xfc   :  { %2458 = vset.pattern.permute.xlu2 %v3884_v10  ;;  %1911 = vperm.xlu1 %2456, %v890_v42   ;;  %2557 = vpow2.f32 %v424_v38  ;;  %v511_v33 = vadd.f32 %v3093_v59, %v510_v15  ;;  %v334_v36 = vrot.slane %v333_v34, 1  ;;  %v3134_v38 = vpop.f32.mrf.mxu3  ;;  %v2234_v3 = vmul.f32 -1.442695, %v277_v19 }
  0xfd   :  { %1719 = vperm.xlu0 %2453, %v890_v42   ;;  %1499 = vperm.xlu2 %2458, %v3065_v11   ;;  %v786_v42 = vand.u32 2147483647, %v2947_v24  ;;  %v785_v24 = vsel %vm3089_vm14, %v2991_v2, %v781_v37  ;;  %v465_v2 = vadd.f32 %v464_v63, %v463_v51  ;;  %2559 = vrcp.f32 %v3117_v12 }
  0xfe   :  { %v338_v37 = vrot.slane %v337_v18, 2  ;;  %2561 = vrcp.f32 %v3123_v21  ;;  %v385_v51 = vmax.f32 %v3106_v6, %v384_v26  ;;  %v383_v23 = vmax.f32 %v381_v60, %v382_v30 }
  0xff   :  { %vm787_vm15 = vcmp.eq.f32.partialorder %v786_v42, 8.507059e+37  ;;  %v466_v27 = vrot.slane %v465_v2, 1  ;;  %v512_v42 = vrot.slane %v511_v33, 2  ;;  %2563 = vpow2.f32 %v440_v22 }
 0x100   :  { %v790_v16 = vsel %vm787_vm15, %v789_v5, %v785_v24  ;;  %v335_v24 = vmax.f32 %v333_v34, %v334_v36  ;;  %v339_v63 = vmax.f32 %v337_v18, %v338_v37  ;;  %v676_v35 = vadd.f32 %v3067_v32, %v675_v1 }
 0x101   :  { %v2556_v0 = vpop.eup %2555  ;;  %v3145_v55 = vpop.f32.mrf.mxu2  ;;  %v467_v46 = vadd.f32 %v466_v27, %v465_v2  ;;  %v513_v53 = vadd.f32 %v512_v42, %v511_v33  ;;  %v681_v5 = vand.u32 2147483647, %v3013_v13  ;;  %v386_v15 = vrot.slane %v385_v51, 2 }
 0x102   :  { %v571_v7 = vmul.f32 %v2556_v0, %v3000_v8  ;;  %v3129_v28 = vpop.eup %2557  ;;  %v683_v0 = vand.u32 2147483648, %v3013_v13  ;;  %v414_v60 = vsub.f32 %v3032_v43, %v383_v23  ;;  %v406_v18 = vsub.f32 %v3035_v61, %v335_v24  ;;  %v3189_v33 = vpop.f32.mrf.mxu1 }
 0x103   :  { %v468_v62 = vrot.slane %v3129_v28, 4  ;;  %v3156_v2 = vpop.eup %2559  ;;  %2565 = vrcp.f32 %v467_v46  ;;  %v340_v40 = vrot.slane %v339_v63, 1  ;;  %v680_v26 = vsel %vm3163_vm2, %v3067_v32, %v676_v35  ;;  %v3194_v32 = vpop.f32.mrf.mxu0 }
 0x104   :  { %2459 = vset.pattern.permute.xlu1 %v3888_v57  ;;  %v3120_v8 = vmul.f32 %v790_v16, %v571_v7  ;;  %v514_v7 = vrot.slane %v513_v53, 1  ;;  %2567 = vpow2.f32 %v2242_v54  ;;  %v684_v22 = vor.u32 1.1754944e-38, %v683_v0  ;;  %v3187_v61 = vpop.f32.mrf.mxu3 }
 0x105   :  { %2457 = vset.pattern.permute.xlu0 %v3890_v14  ;;  %1691 = vperm.xlu1 %2459, %v3065_v11   ;;  %v469_v13 = vadd.f32 %v3129_v28, %v468_v62  ;;  %2569 = vpow2.f32 %v2234_v3  ;;  %vm3178_vm3 = vcmp.eq.f32.partialorder %v681_v5, 8.507059e+37  ;;  %v795_v43 = vmul.f32 %v3074_v20, %v794_v29 }
 0x106   :  { %1293 = vperm.xlu0 %2457, %v3065_v11   ;;  %1531 = vperm.xlu2 %2458, %v3120_v8   ;;  %v515_v16 = vadd.f32 %v514_v7, %v513_v53  ;;  %v688_v27 = vmul.f32 %v3156_v2, %v3117_v12  ;;  %v3185_v30 = vmax.f32 %v385_v51, %v386_v15  ;;  %v442_v36 = vmul.f32 1.442695, %v414_v60 }
 0x107   :  { %v470_v29 = vrot.slane %v469_v13, 2  ;;  %v426_v19 = vmul.f32 1.442695, %v406_v18  ;;  %v341_v1 = vmax.f32 %v339_v63, %v340_v40  ;;  %v685_v42 = vsel %vm3178_vm3, %v684_v22, %v680_v26 }
 0x108   :  { %2571 = vrcp.f32 %v515_v16  ;;  %v803_v54 = vand.u32 2147483648, %v3026_v56  ;;  %v796_v53 = vadd.f32 %v3074_v20, %v795_v43  ;;  %v801_v62 = vand.u32 2147483647, %v3026_v56 }
 0x109   :  { %v3198_v51 = vpop.f32.mrf.mxu2  ;;  %v471_v24 = vadd.f32 %v470_v29, %v469_v13  ;;  %v689_v63 = vsub.f32 1.0, %v688_v27  ;;  %2573 = vpow2.f32 %v442_v36  ;;  %v407_v56 = vsub.f32 %v3077_v48, %v341_v1 }
 0x10a   :  { %2575 = vpow2.f32 %v426_v19  ;;  %v804_v47 = vor.u32 1.1754944e-38, %v803_v54  ;;  %v800_v60 = vsel %vm3211_vm6, %v3074_v20, %v796_v53  ;;  %vm802_vm7 = vcmp.eq.f32.partialorder %v801_v62, 8.507059e+37  ;;  %v3238_v27 = vpop.f32.mrf.mxu1 }
 0x10b   :  { %v472_v5 = vrot.slane %v471_v24, 1  ;;  %v3227_v40 = vadd.f32 %v3142_v52, %v2867_v44  ;;  %v690_v22 = vmul.f32 %v3156_v2, %v689_v63  ;;  %v279_v48 = vadd.f32 %v3086_v25, %v2873_v50  ;;  %v3245_v19 = vpop.f32.mrf.mxu0 }
 0x10c   :  { %v3236_v20 = vpop.f32.mrf.mxu3  ;;  %v805_v43 = vsel %vm802_vm7, %v804_v47, %v800_v60  ;;  %vm693_vm9 = vweird.f32 %v3156_v2  ;;  %v428_v29 = vmul.f32 1.442695, %v407_v56  ;;  %v696_v54 = vand.u32 2147483647, %v3117_v12 }
 0x10d   :  { %1723 = vperm.xlu1 %2459, %v3120_v8   ;;  %v473_v16 = vadd.f32 %v472_v5, %v471_v24  ;;  %v2235_v53 = vmul.f32 -1.442695, %v279_v48  ;;  %vm3262_vm10 = vmor %vm692_vm8, %vm693_vm9  ;;  %v3282_v60 = vadd.f32 %v3194_v32, %v2867_v44  ;;  %vm812_vm12 = vweird.f32 %v3123_v21 }
 0x10e   :  { %2460 = vset.pattern.permute.xlu0 %v3886_v9  ;;  %2462 = vset.pattern.permute.xlu2 %v3886_v9  ;;  %vm697_vm11 = vcmp.eq.f32.partialorder %v696_v54, 8.507059e+37  ;;  %v818_v32 = vand.u32 2147483648, %v3123_v21 }
 0x10f   :  { %1883 = vperm.xlu0 %2460, %v3065_v11   ;;  %v3167_v11 = vpop.eup %2561  ;;  %1915 = vperm.xlu2 %2462, %v3120_v8   ;;  %2577 = vrcp.f32 %v473_v16  ;;  %v348_v54 = vrot.slane %v3282_v60, 4 }
 0x110   :  { %v3171_v34 = vpop.eup %2563  ;;  %v808_v15 = vmul.f32 %v3167_v11, %v3123_v21  ;;  %vm813_vm13 = vweird.f32 %v3167_v11 }
 0x111   :  { %v2566_v37 = vpop.eup %2565  ;;  %v516_v0 = vrot.slane %v3171_v34, 4  ;;  %v3251_v1 = vpop.f32.mrf.mxu2  ;;  %vm3314_vm14 = vmor %vm812_vm12, %vm813_vm13 }
 0x112   :  { %v2568_v46 = vpop.eup %2567  ;;  %v564_v23 = vmul.f32 %v2566_v37, %v3051_v45  ;;  %v698_v37 = vand.u32 2147483648, %v3117_v12  ;;  %v3294_v48 = vpop.f32.mrf.mxu1 }
 0x113   :  { %v2570_v45 = vpop.eup %2569  ;;  %v3223_v18 = vadd.f32 1.0, %v2568_v46  ;;  %v517_v13 = vadd.f32 %v3171_v34, %v516_v0 }
 0x114   :  { %v884_v35 = vmul.f32 %v685_v42, %v564_v23  ;;  %v2572_v7 = vpop.eup %2571  ;;  %v3231_v26 = vadd.f32 1.0, %v2570_v45  ;;  %v691_v42 = vadd.f32 %v3156_v2, %v690_v22  ;;  %v809_v23 = vsub.f32 1.0, %v808_v15 }
 0x115   :  { %2463 = vset.pattern.permute.xlu1 %v3890_v14  ;;  %v572_v39 = vmul.f32 %v2572_v7, %v3093_v59  ;;  %v518_v52 = vrot.slane %v517_v13, 2  ;;  %v3242_v36 = vpop.eup %2573  ;;  %v342_v59 = vrot.slane %v3227_v40, 4  ;;  %2579 = vrcp.f32 %v3223_v18 }
 0x116   :  { %1298 = vperm.xlu1 %2463, %v884_v35   ;;  %v3247_v25 = vpop.eup %2575  ;;  %2581 = vrcp.f32 %v3231_v26  ;;  %v522_v45 = vrot.slane %v3242_v36, 4  ;;  %v699_v12 = vor.u32 1.1754944e-38, %v698_v37  ;;  %v810_v47 = vmul.f32 %v3167_v11, %v809_v23 }
 0x117   :  { %2461 = vset.pattern.permute.xlu0 %v3890_v14  ;;  %2465 = vset.pattern.permute.xlu2 %v3888_v57  ;;  %v519_v46 = vadd.f32 %v518_v52, %v517_v13  ;;  %v3256_v62 = vmul.f32 %v805_v43, %v572_v39  ;;  %v2578_v3 = vpop.eup %2577  ;;  %v474_v5 = vrot.slane %v3247_v25, 4  ;;  %2583 = vpow2.f32 %v428_v29  ;;  %v3301_v52 = vpop.f32.mrf.mxu0 }
 0x118   :  { %1333 = vperm.xlu0 %2461, %v3120_v8   ;;  %v388_v8 = vrot.slane %v3185_v30, 1  ;;  %1695 = vperm.xlu2 %2465, %v884_v35   ;;  %v343_v7 = vmax.f32 %v3227_v40, %v342_v59  ;;  %2585 = vpow2.f32 %v2235_v53  ;;  %v811_v29 = vadd.f32 %v3167_v11, %v810_v47 }
 0x119   :  { %v520_v63 = vrot.slane %v519_v46, 1  ;;  %v816_v37 = vand.u32 2147483647, %v3123_v21  ;;  %v3308_v23 = vpop.f32.mrf.mxu2  ;;  %vm827_vm0 = vweird.f32 %v3223_v18  ;;  %vm707_vm2 = vweird.f32 %v3231_v26 }
 0x11a   :  { %v389_v0 = vmax.f32 %v3185_v30, %v388_v8  ;;  %v695_v30 = vsel %vm3262_vm10, %v3156_v2, %v691_v42  ;;  %v299_v8 = vadd.f32 %v3047_v4, %v2873_v50  ;;  %v475_v4 = vadd.f32 %v3247_v25, %v474_v5 }
 0x11b   :  { %v521_v15 = vadd.f32 %v520_v63, %v519_v46  ;;  %v3285_v16 = vpop.eup %2579  ;;  %v700_v2 = vsel %vm697_vm11, %v699_v12, %v695_v30  ;;  %v344_v13 = vrot.slane %v343_v7, 2  ;;  %v819_v5 = vor.u32 1.1754944e-38, %v818_v32 }
 0x11c   :  { %v415_v56 = vsub.f32 %v3106_v6, %v389_v0  ;;  %v3290_v22 = vpop.eup %2581  ;;  %v3292_v6 = vpop.f32.mrf.mxu3  ;;  %v2243_v43 = vmul.f32 -1.442695, %v299_v8  ;;  %v476_v59 = vrot.slane %v475_v4, 2  ;;  %v823_v63 = vmul.f32 %v3285_v16, %v3223_v18 }
 0x11d   :  { %2587 = vrcp.f32 %v521_v15  ;;  %v3298_v39 = vpop.eup %2583  ;;  %v3325_v30 = vadd.f32 %v3010_v31, %v2867_v44  ;;  %v815_v15 = vsel %vm3314_vm14, %v3167_v11, %v811_v29  ;;  %vm817_vm15 = vcmp.eq.f32.partialorder %v816_v37, 8.507059e+37 }
 0x11e   :  { %2466 = vset.pattern.permute.xlu1 %v3886_v9  ;;  %v444_v42 = vmul.f32 1.442695, %v415_v56  ;;  %v2586_v0 = vpop.eup %2585  ;;  %v477_v12 = vadd.f32 %v476_v59, %v475_v4  ;;  %2589 = vpow2.f32 %v2243_v43  ;;  %v824_v47 = vsub.f32 1.0, %v823_v63  ;;  %v3344_v59 = vpop.f32.mrf.mxu1 }
 0x11f   :  { %1887 = vperm.xlu1 %2466, %v884_v35   ;;  %v703_v56 = vmul.f32 %v3290_v22, %v3231_v26  ;;  %v390_v11 = vrot.slane %v3325_v30, 4  ;;  %v282_v43 = vadd.f32 %v3136_v41, %v2873_v50  ;;  %v3349_v53 = vpop.f32.mrf.mxu0  ;;  %vm828_vm1 = vweird.f32 %v3285_v16 }
 0x120   :  { %2464 = vset.pattern.permute.xlu0 %v3884_v10  ;;  %1727 = vperm.xlu2 %2465, %v3256_v62   ;;  %2591 = vpow2.f32 %v444_v42  ;;  %v478_v32 = vrot.slane %v477_v12, 1  ;;  %vm708_vm3 = vweird.f32 %v3290_v22  ;;  %vm3378_vm4 = vmor %vm827_vm0, %vm828_vm1 }
 0x121   :  { %1503 = vperm.xlu0 %2464, %v884_v35   ;;  %v565_v35 = vmul.f32 %v2578_v3, %v3129_v28  ;;  %v523_v28 = vadd.f32 %v3242_v36, %v522_v45  ;;  %v345_v45 = vmax.f32 %v343_v7, %v344_v13  ;;  %v349_v7 = vmax.f32 %v3282_v60, %v348_v54  ;;  %v3356_v63 = vpop.f32.mrf.mxu2  ;;  %vm3398_vm5 = vmor %vm707_vm2, %vm708_vm3 }
 0x122   :  { %v820_v13 = vsel %vm817_vm15, %v819_v5, %v815_v15  ;;  %v704_v42 = vsub.f32 1.0, %v703_v56  ;;  %v391_v5 = vmax.f32 %v3325_v30, %v390_v11  ;;  %v2236_v15 = vmul.f32 -1.442695, %v282_v43 }
 0x123   :  { %v3306_v46 = vmul.f32 %v700_v2, %v565_v35  ;;  %v524_v24 = vrot.slane %v523_v28, 2  ;;  %v2588_v3 = vpop.eup %2587  ;;  %v480_v35 = vrot.slane %v3298_v39, 4  ;;  %v3336_v2 = vadd.f32 1.0, %v2586_v0 }
 0x124   :  { %v573_v31 = vmul.f32 %v2588_v3, %v3171_v34  ;;  %v346_v4 = vrot.slane %v345_v45, 1  ;;  %v350_v29 = vrot.slane %v349_v7, 2  ;;  %v3342_v37 = vpop.f32.mrf.mxu3  ;;  %v2590_v34 = vpop.eup %2589  ;;  %v479_v3 = vadd.f32 %v478_v32, %v477_v12 }
 0x125   :  { %v525_v21 = vadd.f32 %v524_v24, %v523_v28  ;;  %v481_v24 = vadd.f32 %v3298_v39, %v480_v35  ;;  %2593 = vrcp.f32 %v3336_v2  ;;  %v831_v35 = vand.u32 2147483647, %v3223_v18 }
 0x126   :  { %v3347_v54 = vmul.f32 %v820_v13, %v573_v31  ;;  %v3352_v0 = vpop.eup %2591  ;;  %v347_v41 = vmax.f32 %v345_v45, %v346_v4  ;;  %v351_v45 = vmax.f32 %v349_v7, %v350_v29  ;;  %v392_v31 = vrot.slane %v391_v5, 2 }
 0x127   :  { %2467 = vset.pattern.permute.xlu1 %v3890_v14  ;;  %v526_v8 = vrot.slane %v525_v21, 1  ;;  %v528_v12 = vrot.slane %v3352_v0, 4  ;;  %v482_v56 = vrot.slane %v481_v24, 2  ;;  %v3374_v7 = vadd.f32 1.0, %v2590_v34 }
 0x128   :  { %2471 = vset.pattern.permute.xlu2 %v3886_v9  ;;  %1338 = vperm.xlu1 %2467, %v3256_v62   ;;  %v352_v32 = vrot.slane %v351_v45, 1  ;;  %v711_v43 = vand.u32 2147483647, %v3231_v26  ;;  %vm3405_vm6 = vcmp.eq.f32.partialorder %v831_v35, 8.507059e+37  ;;  %vm722_vm8 = vweird.f32 %v3336_v2 }
 0x129   :  { %1535 = vperm.xlu0 %2464, %v3256_v62   ;;  %1891 = vperm.xlu2 %2471, %v3306_v46   ;;  %v527_v28 = vadd.f32 %v526_v8, %v525_v21  ;;  %v3362_v21 = vadd.f32 %v3057_v17, %v2867_v44  ;;  %v705_v8 = vmul.f32 %v3290_v22, %v704_v42  ;;  %vm842_vm12 = vweird.f32 %v3374_v7 }
 0x12a   :  { %v408_v44 = vsub.f32 %v3227_v40, %v347_v41  ;;  %v483_v34 = vadd.f32 %v482_v56, %v481_v24  ;;  %v529_v24 = vadd.f32 %v3352_v0, %v528_v12  ;;  %vm712_vm7 = vcmp.eq.f32.partialorder %v711_v43, 8.507059e+37 }
 0x12b   :  { %2595 = vrcp.f32 %v527_v28  ;;  %v3382_v13 = vpop.eup %2593  ;;  %v396_v40 = vrot.slane %v3362_v21, 4  ;;  %v706_v28 = vadd.f32 %v3290_v22, %v705_v8 }
 0x12c   :  { %2597 = vrcp.f32 %v479_v3  ;;  %v430_v42 = vmul.f32 1.442695, %v408_v44  ;;  %v3390_v41 = vpop.f32.mrf.mxu3  ;;  %v3392_v3 = vpop.f32.mrf.mxu1  ;;  %v718_v44 = vmul.f32 %v3382_v13, %v3336_v2  ;;  %v484_v4 = vrot.slane %v483_v34, 1 }
 0x12d   :  { %2599 = vpow2.f32 %v2236_v15  ;;  %v710_v35 = vsel %vm3398_vm5, %v3290_v22, %v706_v28  ;;  %vm723_vm9 = vweird.f32 %v3382_v13 }
 0x12e   :  { %2601 = vrcp.f32 %v3374_v7  ;;  %v485_v43 = vadd.f32 %v484_v4, %v483_v34  ;;  %v726_v4 = vand.u32 2147483647, %v3336_v2  ;;  %vm3472_vm10 = vmor %vm722_vm8, %vm723_vm9 }
 0x12f   :  { %2603 = vpow2.f32 %v430_v42 }
 0x130   :  { %1303 = vperm.xlu1 %2467, %v3306_v46   ;;  %2605 = vrcp.f32 %v485_v43  ;;  %vm3484_vm11 = vcmp.eq.f32.partialorder %v726_v4, 8.507059e+37 }
 0x131   :  { %2468 = vset.pattern.permute.xlu0 %v3886_v9  ;;  %2472 = vset.pattern.permute.xlu2 %v3890_v14  ;;  %v2596_v11 = vpop.eup %2595 }
 0x132   :  { %1919 = vperm.xlu0 %2468, %v3256_v62   ;;  %v825_v62 = vmul.f32 %v3285_v16, %v824_v47  ;;  %1343 = vperm.xlu2 %2472, %v3347_v54   ;;  %v833_v47 = vand.u32 2147483648, %v3223_v18  ;;  %v713_v18 = vand.u32 2147483648, %v3231_v26  ;;  %v3413_v26 = vpop.f32.mrf.mxu0  ;;  %v2598_v56 = vpop.eup %2597  ;;  %v574_v12 = vmul.f32 %v2596_v11, %v3242_v36 }
 0x133   :  { %v302_v36 = vadd.f32 %v3084_v49, %v2873_v50 }
 0x134   :  { %v826_v17 = vadd.f32 %v3285_v16, %v825_v62  ;;  %v834_v29 = vor.u32 1.1754944e-38, %v833_v47  ;;  %v393_v47 = vmax.f32 %v391_v5, %v392_v31  ;;  %v714_v5 = vor.u32 1.1754944e-38, %v713_v18 }
 0x135   :  { %v719_v18 = vsub.f32 1.0, %v718_v44  ;;  %v3444_v44 = vpop.f32.mrf.mxu3 }
 0x136   :  { %v830_v15 = vsel %vm3378_vm4, %v3285_v16, %v826_v17  ;;  %v353_v16 = vmax.f32 %v351_v45, %v352_v32  ;;  %v3419_v17 = vpop.f32.mrf.mxu2  ;;  %v397_v45 = vmax.f32 %v3362_v21, %v396_v40  ;;  %v530_v32 = vrot.slane %v529_v24, 2  ;;  %3917 = vst [vmem:[#allocation16_spill] sm:$0xff] %v3444_v44 }
 0x137   :  { %3916 = vst [vmem:[#allocation15_spill] sm:$0xff] %v3419_v17  ;;  %v835_v31 = vsel %vm3405_vm6, %v834_v29, %v830_v15  ;;  %v715_v11 = vsel %vm712_vm7, %v714_v5, %v710_v35  ;;  %v3446_v5 = vpop.f32.mrf.mxu1  ;;  %v728_v35 = vand.u32 2147483648, %v3336_v2 }
 0x138   :  { %2469 = vset.pattern.permute.xlu1 %v3884_v10  ;;  %v2600_v10 = vpop.eup %2599  ;;  %v3431_v62 = vmul.f32 %v835_v31, %v574_v12  ;;  %v409_v28 = vsub.f32 %v3282_v60, %v353_v16  ;;  %v398_v40 = vrot.slane %v397_v45, 2  ;;  %v531_v29 = vadd.f32 %v530_v32, %v529_v24 }
 0x139   :  { %1507 = vperm.xlu1 %2469, %v3306_v46   ;;  %v3433_v22 = vpop.eup %2601  ;;  %v3438_v42 = vadd.f32 1.0, %v2600_v10  ;;  %v3918_v60 = vmov 2   ;;  %v720_v10 = vmul.f32 %v3382_v13, %v719_v18 }
 0x13a   :  { %2474 = vset.pattern.permute.xlu0 %v3888_v57  ;;  %2475 = vset.pattern.permute.xlu2 %v3886_v9  ;;  %v394_v9 = vrot.slane %v393_v47, 1  ;;  %v566_v57 = vmul.f32 %v2598_v56, %v3247_v25  ;;  %v3442_v15 = vpop.eup %2603  ;;  %v2244_v56 = vmul.f32 -1.442695, %v302_v36  ;;  %v432_v24 = vmul.f32 1.442695, %v409_v28 }
 0x13b   :  { %1731 = vperm.xlu0 %2474, %v3347_v54   ;;  %1923 = vperm.xlu2 %2475, %v3347_v54   ;;  %v399_v16 = vmax.f32 %v397_v45, %v398_v40  ;;  %2607 = vrcp.f32 %v3438_v42  ;;  %v721_v31 = vadd.f32 %v3382_v13, %v720_v10  ;;  %v3922_v28 = vmov 3  }
 0x13c   :  { %v3440_v25 = vmul.f32 %v715_v11, %v566_v57  ;;  %v395_v8 = vmax.f32 %v393_v47, %v394_v9  ;;  %v838_v57 = vmul.f32 %v3433_v22, %v3374_v7  ;;  %v284_v9 = vadd.f32 %v3189_v33, %v2873_v50  ;;  %v3460_v47 = vpop.f32.mrf.mxu0 }
 0x13d   :  { %v486_v33 = vrot.slane %v3442_v15, 4  ;;  %2609 = vpow2.f32 %v2244_v56  ;;  %v400_v18 = vrot.slane %v399_v16, 1  ;;  %v304_v11 = vadd.f32 %v3134_v38, %v2873_v50 }
 0x13e   :  { %v3462_v12 = vpop.f32.mrf.mxu2  ;;  %v839_v45 = vsub.f32 1.0, %v838_v57  ;;  %v2237_v32 = vmul.f32 -1.442695, %v284_v9  ;;  %2611 = vpow2.f32 %v432_v24  ;;  %v729_v40 = vor.u32 1.1754944e-38, %v728_v35 }
 0x13f   :  { %3919 = vst [vmem:[#allocation17_spill] sm:$0xff] %v3462_v12  ;;  %v487_v2 = vadd.f32 %v3442_v15, %v486_v33  ;;  %v725_v56 = vsel %vm3472_vm10, %v3382_v13, %v721_v31  ;;  %v3925_v38 = vmov 1   ;;  %v401_v24 = vmax.f32 %v399_v16, %v400_v18  ;;  %v3493_v33 = vpop.f32.mrf.mxu3  ;;  %v3495_v13 = vpop.f32.mrf.mxu1 }
 0x140   :  { %2613 = vpow2.f32 %v2237_v32  ;;  %3926 = vst [vmem:[#allocation18_spill] sm:$0xff] %v3493_v33  ;;  %v730_v4 = vsel %vm3484_vm11, %v729_v40, %v725_v56  ;;  %vm843_vm13 = vweird.f32 %v3433_v22  ;;  %v846_v36 = vand.u32 2147483647, %v3374_v7 }
 0x141   :  { %2470 = vset.pattern.permute.xlu1 %v3918_v60  ;;  %v488_v57 = vrot.slane %v487_v2, 2  ;;  %3927 = vst [vmem:[#allocation19_spill] sm:$0xff] %v3495_v13  ;;  %vm3519_vm14 = vmor %vm842_vm12, %vm843_vm13  ;;  %vm737_vm0 = vweird.f32 %v3438_v42 }
 0x142   :  { %1699 = vperm.xlu1 %2470, %v3306_v46   ;;  %v416_v46 = vsub.f32 %v3325_v30, %v395_v8  ;;  %v2606_v30 = vpop.eup %2605  ;;  %vm3529_vm15 = vcmp.eq.f32.partialorder %v846_v36, 8.507059e+37 }
 0x143   :  { %2480 = vset.pattern.permute.xlu0 %v3890_v14  ;;  %2476 = vset.pattern.permute.xlu2 %v3890_v14  ;;  %v3488_v50 = vpop.eup %2607  ;;  %v567_v35 = vmul.f32 %v2606_v30, %v3298_v39  ;;  %v489_v16 = vadd.f32 %v488_v57, %v487_v2  ;;  %v848_v39 = vand.u32 2147483648, %v3374_v7 }
 0x144   :  { %1348 = vperm.xlu0 %2480, %v3431_v62   ;;  %1308 = vperm.xlu2 %2476, %v3440_v25   ;;  %v2610_v9 = vpop.eup %2609  ;;  %v3502_v31 = vpop.f32.mrf.mxu0  ;;  %vm738_vm1 = vweird.f32 %v3488_v50 }
 0x145   :  { %v1880_v49 = vpop.permute.xlu2 %1879  ;;  %3928 = vst [vmem:[#allocation20_spill] sm:$0xff] %v3502_v31  ;;  %v490_v18 = vrot.slane %v489_v16, 1  ;;  %v3517_v40 = vmul.f32 %v730_v4, %v567_v35  ;;  %vm3564_vm2 = vmor %vm737_vm0, %vm738_vm1  ;;  %vm2107_vm0 = vcmask 1041409   ;;  %vm2110_vm1 = vcmask 1042434  }
 0x146   :  { %v3451_v34 = vmul.f32 %v1880_v49, %v3238_v27  ;;  %v532_v27 = vrot.slane %v531_v29, 1  ;;  %v446_v49 = vmul.f32 1.442695, %v416_v46  ;;  %v3500_v46 = vpop.eup %2611 }
 0x147   :  { %v492_v30 = vrot.slane %v3500_v46, 4  ;;  %v491_v10 = vadd.f32 %v490_v18, %v489_v16 }
 0x148   :  { %v533_v43 = vadd.f32 %v532_v27, %v531_v29  ;;  %v840_v29 = vmul.f32 %v3433_v22, %v839_v45  ;;  %v2245_v27 = vmul.f32 -1.442695, %v304_v11  ;;  %v1119_v45 = vpop.f32.mrf.mxu2  ;;  %v417_v11 = vsub.f32 %v3362_v21, %v401_v24 }
 0x149   :  { %v849_v21 = vor.u32 1.1754944e-38, %v848_v39  ;;  %v1958_v57 = vrot.slane %v3451_v34, 4  ;;  %v493_v4 = vadd.f32 %v3500_v46, %v492_v30  ;;  %v3548_v39 = vpop.f32.mrf.mxu1  ;;  %v743_v30 = vand.u32 2147483648, %v3438_v42 }
 0x14a   :  { %2473 = vset.pattern.permute.xlu1 %v3925_v38  ;;  %2615 = vrcp.f32 %v533_v43  ;;  %v841_v32 = vadd.f32 %v3433_v22, %v840_v29  ;;  %v3514_v43 = vadd.f32 1.0, %v2610_v9  ;;  %3934 = vst [vmem:[#allocation22_spill] sm:$0xff] %v3548_v39 }
 0x14b   :  { %1539 = vperm.xlu1 %2473, %v3347_v54   ;;  %2617 = vpow2.f32 %v446_v49  ;;  %v733_v54 = vmul.f32 %v3488_v50, %v3438_v42  ;;  %v2614_v49 = vpop.eup %2613 }
 0x14c   :  { %2483 = vset.pattern.permute.xlu0 %v3922_v28  ;;  %2477 = vset.pattern.permute.xlu2 %v3925_v38  ;;  %2619 = vpow2.f32 %v2245_v27  ;;  %v845_v9 = vsel %vm3519_vm14, %v3433_v22, %v841_v32  ;;  %v3541_v16 = vadd.f32 1.0, %v2614_v49  ;;  %v741_v49 = vand.u32 2147483647, %v3438_v42 }
 0x14d   :  { %1927 = vperm.xlu0 %2483, %v3431_v62   ;;  %1511 = vperm.xlu2 %2477, %v3440_v25   ;;  %v734_v29 = vsub.f32 1.0, %v733_v54  ;;  %2621 = vrcp.f32 %v3514_v43  ;;  %v850_v32 = vsel %vm3529_vm15, %v849_v21, %v845_v9  ;;  %vm857_vm4 = vweird.f32 %v3514_v43 }
 0x14e   :  { %v1329_v8 = vpop.permute.xlu2 %1328  ;;  %2623 = vrcp.f32 %v491_v10  ;;  %v494_v10 = vrot.slane %v493_v4, 2  ;;  %vm3581_vm3 = vcmp.eq.f32.partialorder %v741_v49, 8.507059e+37  ;;  %vm752_vm8 = vweird.f32 %v3541_v16 }
 0x14f   :  { %v1374_v56 = vmul.f32 %v1329_v8, %v1119_v45  ;;  %v448_v8 = vmul.f32 1.442695, %v417_v11  ;;  %v3546_v45 = vpop.f32.mrf.mxu3  ;;  %v735_v36 = vmul.f32 %v3488_v50, %v734_v29 }
 0x150   :  { %v2616_v7 = vpop.eup %2615  ;;  %3933 = vst [vmem:[#allocation21_spill] sm:$0xff] %v3546_v45 }
 0x151   :  { %v3533_v27 = vpop.eup %2617  ;;  %v1430_v22 = vrot.slane %v1374_v56, 4  ;;  %v575_v54 = vmul.f32 %v2616_v7, %v3352_v0  ;;  %v3557_v0 = vpop.f32.mrf.mxu0  ;;  %2625 = vpow2.f32 %v448_v8  ;;  %v736_v2 = vadd.f32 %v3488_v50, %v735_v36 }
 0x152   :  { %v2620_v18 = vpop.eup %2619  ;;  %v534_v11 = vrot.slane %v3533_v27, 4  ;;  %3935 = vst [vmem:[#allocation23_spill] sm:$0xff] %v3557_v0  ;;  %2627 = vrcp.f32 %v3541_v16  ;;  %v3601_v39 = vpop.f32.mrf.mxu1 }
 0x153   :  { %2479 = vset.pattern.permute.xlu1 %v3922_v28  ;;  %v1431_v7 = vadd.f32 %v1430_v22, %v1374_v56  ;;  %v3562_v21 = vmul.f32 %v850_v32, %v575_v54  ;;  %v3568_v24 = vpop.eup %2621  ;;  %v744_v54 = vor.u32 1.1754944e-38, %v743_v30  ;;  %3940 = vst [vmem:[#allocation24_spill] sm:$0xff] %v3601_v39 }
 0x154   :  { %1895 = vperm.xlu1 %2479, %v3440_v25   ;;  %v2624_v8 = vpop.eup %2623  ;;  %v535_v32 = vadd.f32 %v3533_v27, %v534_v11  ;;  %v853_v11 = vmul.f32 %v3568_v24, %v3514_v43  ;;  %vm858_vm5 = vweird.f32 %v3568_v24 }
 0x155   :  { %2486 = vset.pattern.permute.xlu0 %v3918_v60  ;;  %2478 = vset.pattern.permute.xlu2 %v3918_v60  ;;  %vm3635_vm6 = vmor %vm857_vm4, %vm858_vm5  ;;  %vm2119_vm4 = vcmask 1045509   ;;  %vm2122_vm5 = vcmask 1046534  }
 0x156   :  { %1707 = vperm.xlu0 %2486, %v3517_v40   ;;  %1703 = vperm.xlu2 %2478, %v3440_v25   ;;  %v1959_v25 = vadd.f32 %v1958_v57, %v3451_v34  ;;  %v3570_v34 = vadd.f32 1.0, %v2620_v18  ;;  %v740_v18 = vsel %vm3564_vm2, %v3488_v50, %v736_v2  ;;  %v568_v2 = vmul.f32 %v2624_v8, %v3442_v15 }
 0x157   :  { %v3538_v35 = vpop.permute.xlu2 %1499  ;;  %v3587_v30 = vpop.eup %2625  ;;  %v745_v9 = vsel %vm3581_vm3, %v744_v54, %v740_v18  ;;  %v854_v8 = vsub.f32 1.0, %v853_v11  ;;  %vm2113_vm2 = vcmask 1043459   ;;  %vm2116_vm3 = vcmask 1044484  }
 0x158   :  { %v1960_v56 = vrot.slane %v1959_v25, 2  ;;  %2629 = vrcp.f32 %v3570_v34  ;;  %v3599_v45 = vpop.eup %2627  ;;  %v1168_v0 = vpop.f32.mrf.mxu3  ;;  %v1559_v11 = vmul.f32 %v3538_v35, %v3236_v20  ;;  %vm872_vm12 = vweird.f32 %v3570_v34 }
 0x159   :  { %v3604_v17 = vpop.f32.mrf.mxu0  ;;  %v748_v54 = vmul.f32 %v3599_v45, %v3541_v16  ;;  %vm753_vm9 = vweird.f32 %v3599_v45 }
 0x15a   :  { %v1961_v49 = vadd.f32 %v1960_v56, %v1959_v25  ;;  %3941 = vst [vmem:[#allocation25_spill] sm:$0xff] %v3604_v17  ;;  %vm3669_vm10 = vmor %vm752_vm8, %vm753_vm9 }
 0x15c   :  { %2482 = vset.pattern.permute.xlu1 %v3918_v60 }
 0x15d   :  { %v1496_v29 = vpop.permute.xlu1 %1495  ;;  %1735 = vperm.xlu1 %2482, %v3431_v62  }
 0x15e   :  { %v1558_v57 = vmul.f32 %v1496_v29, %v3187_v61  ;;  %2489 = vset.pattern.permute.xlu0 %v3925_v38  ;;  %v1289_v42 = vpop.permute.xlu0 %1288  ;;  %v495_v61 = vadd.f32 %v494_v10, %v493_v4  ;;  %v1432_v29 = vrot.slane %v1431_v7, 2  ;;  %2481 = vset.pattern.permute.xlu2 %v3925_v38 }
 0x15f   :  { %v1366_v22 = vmul.f32 %v1289_v42, %v3099_v58  ;;  %1547 = vperm.xlu0 %2489, %v3562_v21   ;;  %v536_v42 = vrot.slane %v535_v32, 2  ;;  %1543 = vperm.xlu2 %2481, %v3431_v62  }
 0x160   :  { %v1574_v36 = vrot.slane %v1558_v57, 4  ;;  %v3594_v4 = vpop.permute.xlu2 %1531  ;;  %v496_v33 = vrot.slane %v495_v61, 1  ;;  %v1433_v62 = vadd.f32 %v1432_v29, %v1431_v7  ;;  %v3611_v7 = vpop.eup %2629 }
 0x161   :  { %v1382_v58 = vrot.slane %v1366_v22, 4  ;;  %v537_v12 = vadd.f32 %v536_v42, %v535_v32  ;;  %v1962_v32 = vrot.slane %v1961_v49, 1  ;;  %v3629_v20 = vmul.f32 %v3611_v7, %v3570_v34 }
 0x162   :  { %v1575_v50 = vadd.f32 %v1574_v36, %v1558_v57  ;;  %v540_v57 = vrot.slane %v3587_v30, 4  ;;  %vm873_vm13 = vweird.f32 %v3611_v7 }
 0x163   :  { %v1383_v10 = vadd.f32 %v1382_v58, %v1366_v22  ;;  %v538_v25 = vrot.slane %v537_v12, 1  ;;  %v3606_v22 = vmul.f32 %v745_v9, %v568_v2  ;;  %v3942_v58 = vmov 0   ;;  %vm3706_vm14 = vmor %vm872_vm12, %vm873_vm13 }
 0x164   :  { %v1576_v13 = vrot.slane %v1575_v50, 2  ;;  %v541_v2 = vadd.f32 %v3587_v30, %v540_v57 }
 0x165   :  { %v1384_v36 = vrot.slane %v1383_v10, 2  ;;  %v1528_v15 = vpop.permute.xlu1 %1527  ;;  %v539_v39 = vadd.f32 %v538_v25, %v537_v12  ;;  %2485 = vset.pattern.permute.xlu1 %v3925_v38  ;;  %v863_v25 = vand.u32 2147483648, %v3514_v43 }
 0x166   :  { %v1577_v56 = vadd.f32 %v1576_v13, %v1575_v50  ;;  %v1566_v14 = vmul.f32 %v1528_v15, %v1168_v0  ;;  %v497_v13 = vadd.f32 %v496_v33, %v495_v61  ;;  %v1434_v0 = vrot.slane %v1433_v62, 1  ;;  %1515 = vperm.xlu1 %2485, %v3517_v40  }
 0x167   :  { %v1385_v18 = vadd.f32 %v1384_v36, %v1383_v10  ;;  %2492 = vset.pattern.permute.xlu0 %v3942_v58  ;;  %v1688_v42 = vpop.permute.xlu0 %1687  ;;  %2484 = vset.pattern.permute.xlu2 %v3942_v58  ;;  %v855_v36 = vmul.f32 %v3568_v24, %v854_v8  ;;  %2631 = vrcp.f32 %v539_v39  ;;  %v542_v8 = vrot.slane %v541_v2, 2 }
 0x168   :  { %v1578_v29 = vrot.slane %v1577_v56, 1  ;;  %v1622_v17 = vrot.slane %v1566_v14, 4  ;;  %v1750_v44 = vmul.f32 %v1688_v42, %v3245_v19  ;;  %1318 = vperm.xlu0 %2492, %v3606_v22   ;;  %1313 = vperm.xlu2 %2484, %v3517_v40   ;;  %2633 = vrcp.f32 %v497_v13 }
 0x169   :  { %v1386_v50 = vrot.slane %v1385_v18, 1  ;;  %v3623_v33 = vpop.permute.xlu2 %1915  ;;  %v856_v15 = vadd.f32 %v3568_v24, %v855_v36 }
 0x16a   :  { %v1579_v10 = vadd.f32 %v1578_v29, %v1577_v56  ;;  %v1623_v12 = vadd.f32 %v1622_v17, %v1566_v14  ;;  %v1766_v9 = vrot.slane %v1750_v44, 4  ;;  %v749_v17 = vsub.f32 1.0, %v748_v54  ;;  %v1266_v14 = vpop.f32.mrf.mxu1 }
 0x16b   :  { %v1387_v19 = vadd.f32 %v1386_v50, %v1385_v18  ;;  %v1963_v56 = vadd.f32 %v1962_v32, %v1961_v49  ;;  %v861_v54 = vand.u32 2147483647, %v3514_v43  ;;  %v1580_v50 = vrot.slane %v1559_v11, 4 }
 0x16c   :  { %v1624_v35 = vrot.slane %v1623_v12, 2  ;;  %v1767_v61 = vadd.f32 %v1766_v9, %v1750_v44  ;;  %v1435_v44 = vadd.f32 %v1434_v0, %v1433_v62  ;;  %v860_v43 = vsel %vm3635_vm6, %v3568_v24, %v856_v15 }
 0x16d   :  { %v1670_v57 = vadd.f32 %v1579_v10, %v1387_v19  ;;  %v1217_v10 = vpop.f32.mrf.mxu0  ;;  %v864_v62 = vor.u32 1.1754944e-38, %v863_v25  ;;  %v543_v0 = vadd.f32 %v542_v8, %v541_v2  ;;  %vm3646_vm7 = vcmp.eq.f32.partialorder %v861_v54, 8.507059e+37 }
 0x16e   :  { %v1625_v39 = vadd.f32 %v1624_v35, %v1623_v12  ;;  %v1768_v18 = vrot.slane %v1767_v61, 2  ;;  %v1912_v42 = vpop.permute.xlu1 %1911  ;;  %v750_v12 = vmul.f32 %v3599_v45, %v749_v17  ;;  %v2632_v35 = vpop.eup %2631  ;;  %2487 = vset.pattern.permute.xlu1 %v3922_v28  ;;  %v758_v29 = vand.u32 2147483648, %v3541_v16 }
 0x16f   :  { %v1950_v9 = vmul.f32 %v1912_v42, %v1266_v14  ;;  %v1720_v36 = vpop.permute.xlu0 %1719  ;;  %1899 = vperm.xlu1 %2487, %v3517_v40   ;;  %v576_v25 = vmul.f32 %v2632_v35, %v3533_v27  ;;  %v2634_v8 = vpop.eup %2633  ;;  %v544_v54 = vrot.slane %v543_v0, 1  ;;  %v756_v40 = vand.u32 2147483647, %v3541_v16 }
 0x170   :  { %v1626_v19 = vrot.slane %v1625_v39, 1  ;;  %v1769_v49 = vadd.f32 %v1768_v18, %v1767_v61  ;;  %v1758_v32 = vmul.f32 %v1720_v36, %v1217_v10  ;;  %2495 = vset.pattern.permute.xlu0 %v3922_v28  ;;  %v1581_v18 = vadd.f32 %v1580_v50, %v1559_v11  ;;  %2490 = vset.pattern.permute.xlu2 %v3918_v60 }
 0x171   :  { %v2006_v31 = vrot.slane %v1950_v9, 4  ;;  %1903 = vperm.xlu0 %2495, %v3606_v22   ;;  %1739 = vperm.xlu2 %2490, %v3562_v21   ;;  %v751_v10 = vadd.f32 %v3599_v45, %v750_v12  ;;  %v869_v27 = vsub.f32 1.0, %v3629_v20  ;;  %v545_v16 = vadd.f32 %v544_v54, %v543_v0 }
 0x172   :  { %v1627_v14 = vadd.f32 %v1626_v19, %v1625_v39  ;;  %v1770_v42 = vrot.slane %v1769_v49, 1  ;;  %v1814_v13 = vrot.slane %v1758_v32, 4  ;;  %v3657_v11 = vpop.permute.xlu2 %1695  ;;  %vm757_vm11 = vcmp.eq.f32.partialorder %v756_v40, 8.507059e+37 }
 0x173   :  { %v2007_v17 = vadd.f32 %v2006_v31, %v1950_v9  ;;  %v865_v31 = vsel %vm3646_vm7, %v864_v62, %v860_v43  ;;  %v1170_v43 = vpop.f32.mrf.mxu3  ;;  %v870_v0 = vmul.f32 %v3611_v7, %v869_v27  ;;  %2635 = vrcp.f32 %v545_v16 }
 0x174   :  { %v1678_v24 = vadd.f32 %v1627_v14, %v1435_v44  ;;  %v1771_v15 = vadd.f32 %v1770_v42, %v1769_v49  ;;  %v1815_v2 = vadd.f32 %v1814_v13, %v1758_v32  ;;  %v1582_v49 = vrot.slane %v1581_v18, 2 }
 0x175   :  { %v2008_v39 = vrot.slane %v2007_v17, 2  ;;  %v3675_v12 = vmul.f32 %v865_v31, %v576_v25  ;;  %v759_v14 = vor.u32 1.1754944e-38, %v758_v29  ;;  %v1219_v40 = vpop.f32.mrf.mxu0  ;;  %v871_v27 = vadd.f32 %v3611_v7, %v870_v0 }
 0x176   :  { %v1862_v50 = vadd.f32 %v1771_v15, %v1670_v57  ;;  %v1816_v44 = vrot.slane %v1815_v2, 2  ;;  %v569_v15 = vmul.f32 %v2634_v8, %v3500_v46  ;;  %vm2125_vm6 = vcmask 1047559  }
 0x177   :  { %v2009_v9 = vadd.f32 %v2008_v39, %v2007_v17  ;;  %v1692_v36 = vpop.permute.xlu1 %1691  ;;  %2488 = vset.pattern.permute.xlu1 %v3942_v58 }
 0x178   :  { %v3673_v32 = vadd.f32 %v1963_v56, %v1862_v50  ;;  %v1817_v57 = vadd.f32 %v1816_v44, %v1815_v2  ;;  %v1294_v35 = vpop.permute.xlu0 %1293  ;;  %v1751_v20 = vmul.f32 %v1692_v36, %v3301_v52  ;;  %v755_v56 = vsel %vm3669_vm10, %v3599_v45, %v751_v10  ;;  %1353 = vperm.xlu1 %2488, %v3562_v21  }
 0x179   :  { %v1367_v62 = vmul.f32 %v1294_v35, %v3145_v55  ;;  %2498 = vset.pattern.permute.xlu0 %v3918_v60  ;;  %v2010_v42 = vrot.slane %v2009_v9, 1  ;;  %v1583_v52 = vadd.f32 %v1582_v49, %v1581_v18  ;;  %v1567_v55 = vmul.f32 %v3594_v4, %v1170_v43  ;;  %2491 = vset.pattern.permute.xlu2 %v3922_v28  ;;  %v1268_v4 = vpop.f32.mrf.mxu1 }
 0x17a   :  { %v1818_v13 = vrot.slane %v1817_v57, 1  ;;  %1743 = vperm.xlu0 %2498, %v3675_v12   ;;  %v1772_v61 = vrot.slane %v1751_v20, 4  ;;  %v3690_v45 = vpop.permute.xlu2 %1727  ;;  %v760_v31 = vsel %vm757_vm11, %v759_v14, %v755_v56  ;;  %1931 = vperm.xlu2 %2491, %v3562_v21   ;;  %v878_v50 = vand.u32 2147483648, %v3570_v34 }
 0x17b   :  { %v1388_v17 = vrot.slane %v1367_v62, 4  ;;  %v2011_v29 = vadd.f32 %v2010_v42, %v2009_v9  ;;  %v1584_v44 = vrot.slane %v1583_v52, 1  ;;  %v3700_v49 = vmul.f32 %v760_v31, %v569_v15 }
 0x17c   :  { %v1819_v2 = vadd.f32 %v1818_v13, %v1817_v57  ;;  %v1773_v25 = vadd.f32 %v1772_v61, %v1751_v20  ;;  %v1628_v35 = vrot.slane %v1567_v55, 4  ;;  %v1951_v43 = vmul.f32 %v3623_v33, %v1268_v4  ;;  %v2636_v20 = vpop.eup %2635 }
 0x17d   :  { %v1389_v39 = vadd.f32 %v1388_v17, %v1367_v62  ;;  %v879_v42 = vor.u32 1.1754944e-38, %v878_v50  ;;  %v1585_v56 = vadd.f32 %v1584_v44, %v1583_v52 }
 0x17e   :  { %v1870_v46 = vadd.f32 %v1819_v2, %v1678_v24  ;;  %v1774_v18 = vrot.slane %v1773_v25, 2  ;;  %v876_v24 = vand.u32 2147483647, %v3570_v34  ;;  %v875_v34 = vsel %vm3706_vm14, %v3611_v7, %v871_v27 }
 0x17f   :  { %v1390_v8 = vrot.slane %v1389_v39, 2  ;;  %v1724_v54 = vpop.permute.xlu1 %1723  ;;  %v1629_v15 = vadd.f32 %v1628_v35, %v1567_v55  ;;  %v2012_v2 = vrot.slane %v1951_v43, 4  ;;  %v577_v7 = vmul.f32 %v2636_v20, %v3587_v30  ;;  %v3745_v35 = vld [vmem:[%s3882_s4] ss:$0 sm:$0xff] }
 0x180   :  { %v3696_v10 = vadd.f32 %v2011_v29, %v1870_v46  ;;  %v1775_v9 = vadd.f32 %v1774_v18, %v1773_v25  ;;  %v1759_v36 = vmul.f32 %v1724_v54, %v1219_v40  ;;  %vm3717_vm15 = vcmp.eq.f32.partialorder %v876_v24, 8.507059e+37  ;;  %2494 = vset.pattern.permute.xlu1 %v3918_v60  ;;  %v1121_v18 = vpop.f32.mrf.mxu2 }
 0x181   :  { %v1391_v21 = vadd.f32 %v1390_v8, %v1389_v39  ;;  %v1884_v19 = vpop.permute.xlu0 %1883  ;;  %1711 = vperm.xlu1 %2494, %v3606_v22   ;;  %v880_v52 = vsel %vm3717_vm15, %v879_v42, %v875_v34  ;;  %v1752_v55 = vmul.f32 %v3657_v11, %v3349_v53  ;;  %v1630_v4 = vrot.slane %v1629_v15, 2  ;;  %v1222_v42 = vpop.f32.mrf.mxu0 }
 0x182   :  { %2500 = vset.pattern.permute.xlu0 %v3925_v38  ;;  %v1776_v62 = vrot.slane %v1775_v9, 1  ;;  %v1943_v16 = vmul.f32 %v1884_v19, %v3294_v48  ;;  %v1820_v61 = vrot.slane %v1759_v36, 4  ;;  %2493 = vset.pattern.permute.xlu2 %v3925_v38  ;;  %v3732_v54 = vmul.f32 %v880_v52, %v577_v7 }
 0x183   :  { %v1392_v14 = vrot.slane %v1391_v21, 1  ;;  %1523 = vperm.xlu0 %2500, %v3700_v49   ;;  %v3724_v48 = vpop.permute.xlu2 %1891  ;;  %1519 = vperm.xlu2 %2493, %v3606_v22   ;;  %v2013_v30 = vadd.f32 %v2012_v2, %v1951_v43  ;;  %v1778_v22 = vrot.slane %v1752_v55, 4  ;;  %v1631_v11 = vadd.f32 %v1630_v4, %v1629_v15 }
 0x184   :  { %v1964_v17 = vrot.slane %v1943_v16, 4  ;;  %v1777_v0 = vadd.f32 %v1776_v62, %v1775_v9  ;;  %v1821_v31 = vadd.f32 %v1820_v61, %v1759_v36 }
 0x185   :  { %v1393_v33 = vadd.f32 %v1392_v14, %v1391_v21  ;;  %v2014_v21 = vrot.slane %v2013_v30, 2  ;;  %v1779_v43 = vadd.f32 %v1778_v22, %v1752_v55 }
 0x186   :  { %v1965_v39 = vadd.f32 %v1964_v17, %v1943_v16  ;;  %v1822_v40 = vrot.slane %v1821_v31, 2  ;;  %v1632_v16 = vrot.slane %v1631_v11, 1  ;;  %v2074_v17 = vadd.f32 %v3745_v35, %v3673_v32 }
 0x187   :  { %v1671_v25 = vadd.f32 %v1585_v56, %v1393_v33  ;;  %v2015_v13 = vadd.f32 %v2014_v21, %v2013_v30  ;;  %v1780_v15 = vrot.slane %v1779_v43, 2 }
 0x188   :  { %v1966_v46 = vrot.slane %v1965_v39, 2  ;;  %v1299_v24 = vpop.permute.xlu1 %1298  ;;  %v1633_v55 = vadd.f32 %v1632_v16, %v1631_v11 }
 0x189   :  { %v1863_v29 = vadd.f32 %v1777_v0, %v1671_v25  ;;  %v1368_v9 = vmul.f32 %v1299_v24, %v3198_v51  ;;  %2497 = vset.pattern.permute.xlu1 %v3925_v38  ;;  %v1823_v51 = vadd.f32 %v1822_v40, %v1821_v31  ;;  %v1760_v0 = vmul.f32 %v3690_v45, %v1222_v42  ;;  %v1124_v42 = vpop.f32.mrf.mxu2 }
 0x18a   :  { %v1334_v8 = vpop.permute.xlu0 %1333  ;;  %v1967_v50 = vadd.f32 %v1966_v46, %v1965_v39  ;;  %1551 = vperm.xlu1 %2497, %v3675_v12   ;;  %v2016_v46 = vrot.slane %v2015_v13, 1 }
 0x18b   :  { %v1375_v44 = vmul.f32 %v1334_v8, %v1121_v18  ;;  %2502 = vset.pattern.permute.xlu0 %v3942_v58  ;;  %2496 = vset.pattern.permute.xlu2 %v3942_v58  ;;  %v1394_v20 = vrot.slane %v1368_v9, 4  ;;  %v1824_v25 = vrot.slane %v1823_v51, 1 }
 0x18c   :  { %1363 = vperm.xlu0 %2502, %v3732_v54   ;;  %v1968_v27 = vrot.slane %v1967_v50, 1  ;;  %v3740_v57 = vpop.permute.xlu2 %1343  ;;  %1358 = vperm.xlu2 %2496, %v3675_v12  }
 0x18d   :  { %v1436_v53 = vrot.slane %v1375_v44, 4  ;;  %v1395_v34 = vadd.f32 %v1394_v20, %v1368_v9 }
 0x18e   :  { %v1969_v36 = vadd.f32 %v1968_v27, %v1967_v50  ;;  %v1826_v50 = vrot.slane %v1760_v0, 4  ;;  %v1173_v27 = vpop.f32.mrf.mxu3 }
 0x18f   :  { %v1437_v19 = vadd.f32 %v1436_v53, %v1375_v44  ;;  %v1396_v2 = vrot.slane %v1395_v34, 2  ;;  %v1825_v44 = vadd.f32 %v1824_v25, %v1823_v51  ;;  %v2082_v51 = vadd.f32 %v3745_v35, %v3696_v10 }
 0x190   :  { %v2055_v62 = vadd.f32 %v1969_v36, %v1863_v29 }
 0x191   :  { %v1438_v14 = vrot.slane %v1437_v19, 2  ;;  %v1888_v31 = vpop.permute.xlu1 %1887  ;;  %v1397_v8 = vadd.f32 %v1396_v2, %v1395_v34 }
 0x192   :  { %v2075_v56 = vadd.f32 %v3745_v35, %v2055_v62  ;;  %v1944_v18 = vmul.f32 %v1888_v31, %v3344_v59  ;;  %2499 = vset.pattern.permute.xlu1 %v3942_v58  ;;  %v2017_v59 = vadd.f32 %v2016_v46, %v2015_v13 }
 0x193   :  { %v1439_v33 = vadd.f32 %v1438_v14, %v1437_v19  ;;  %v1504_v61 = vpop.permute.xlu0 %1503  ;;  %1323 = vperm.xlu1 %2499, %v3700_v49   ;;  %v1398_v9 = vrot.slane %v1397_v8, 1 }
 0x194   :  { %v1560_v7 = vmul.f32 %v1504_v61, %v3292_v6  ;;  %2507 = vset.pattern.permute.xlu0 %v3922_v28  ;;  %v2106_v39 = vrot.slane %v2075_v56, 7  ;;  %v1781_v6 = vadd.f32 %v1780_v15, %v1779_v43  ;;  %2501 = vset.pattern.permute.xlu2 %v3918_v60  ;;  %v1970_v40 = vrot.slane %v1944_v18, 4 }
 0x195   :  { %v1440_v52 = vrot.slane %v1439_v33, 1  ;;  %1939 = vperm.xlu0 %2507, %v3732_v54   ;;  %v3762_v30 = vpop.permute.xlu2 %1923  ;;  %1715 = vperm.xlu2 %2501, %v3700_v49   ;;  %v1827_v43 = vadd.f32 %v1826_v50, %v1760_v0 }
 0x196   :  { %v1586_v29 = vrot.slane %v1560_v7, 4  ;;  %v3756_v4 = vsel %vm2107_vm0, %v2106_v39, %v2074_v17  ;;  %v1971_v58 = vadd.f32 %v1970_v40, %v1944_v18  ;;  %v1782_v19 = vrot.slane %v1781_v6, 1 }
 0x197   :  { %v1441_v32 = vadd.f32 %v1440_v52, %v1439_v33  ;;  %v1399_v33 = vadd.f32 %v1398_v9, %v1397_v8 }
 0x198   :  { %v1587_v45 = vadd.f32 %v1586_v29, %v1560_v7  ;;  %v1972_v62 = vrot.slane %v1971_v58, 2  ;;  %v1783_v2 = vadd.f32 %v1782_v19, %v1781_v6  ;;  %v1828_v7 = vrot.slane %v1827_v43, 2 }
 0x199   :  { %v1679_v22 = vadd.f32 %v1633_v55, %v1441_v32 }
 0x19a   :  { %v1588_v24 = vrot.slane %v1587_v45, 2  ;;  %v1973_v56 = vadd.f32 %v1972_v62, %v1971_v58  ;;  %v1339_v13 = vpop.permute.xlu1 %1338  ;;  %v1126_v62 = vpop.f32.mrf.mxu2 }
 0x19b   :  { %v1871_v53 = vadd.f32 %v1825_v44, %v1679_v22  ;;  %v1536_v11 = vpop.permute.xlu0 %1535  ;;  %v1376_v17 = vmul.f32 %v1339_v13, %v1124_v42  ;;  %2504 = vset.pattern.permute.xlu1 %v3918_v60  ;;  %v1271_v60 = vpop.f32.mrf.mxu1 }
 0x19c   :  { %v1589_v21 = vadd.f32 %v1588_v24, %v1587_v45  ;;  %v1568_v36 = vmul.f32 %v1536_v11, %v1173_v27  ;;  %v1974_v25 = vrot.slane %v1973_v56, 1  ;;  %1747 = vperm.xlu1 %2504, %v3732_v54   ;;  %v1829_v45 = vadd.f32 %v1828_v7, %v1827_v43 }
 0x19d   :  { %v2063_v20 = vadd.f32 %v2017_v59, %v1871_v53  ;;  %2503 = vset.pattern.permute.xlu2 %v3925_v38  ;;  %v1442_v52 = vrot.slane %v1376_v17, 4 }
 0x19e   :  { %v1590_v14 = vrot.slane %v1589_v21, 1  ;;  %v1634_v16 = vrot.slane %v1568_v36, 4  ;;  %v1309_v10 = vpop.permute.xlu2 %1308  ;;  %1555 = vperm.xlu2 %2503, %v3732_v54   ;;  %v1975_v29 = vadd.f32 %v1974_v25, %v1973_v56  ;;  %v1830_v58 = vrot.slane %v1829_v45, 1 }
 0x19f   :  { %v2083_v34 = vadd.f32 %v3745_v35, %v2063_v20  ;;  %v1370_v31 = vmul.f32 %v1309_v10, %v3308_v23  ;;  %v1443_v18 = vadd.f32 %v1442_v52, %v1376_v17 }
 0x1a0   :  { %v1591_v61 = vadd.f32 %v1590_v14, %v1589_v21  ;;  %v1635_v15 = vadd.f32 %v1634_v16, %v1568_v36  ;;  %v1831_v56 = vadd.f32 %v1830_v58, %v1829_v45 }
 0x1a1   :  { %v2127_v0 = vrot.slane %v2083_v34, 7  ;;  %v1406_v8 = vrot.slane %v1370_v31, 4  ;;  %v1444_v22 = vrot.slane %v1443_v18, 2 }
 0x1a2   :  { %v1672_v39 = vadd.f32 %v1591_v61, %v1399_v33  ;;  %v1636_v55 = vrot.slane %v1635_v15, 2  ;;  %v1304_v24 = vpop.permute.xlu1 %1303  ;;  %v1945_v61 = vmul.f32 %v3724_v48, %v3392_v3  ;;  %v1129_v48 = vpop.f32.mrf.mxu2 }
 0x1a3   :  { %v3774_v46 = vsel %vm2107_vm0, %v2127_v0, %v2082_v51  ;;  %v1407_v27 = vadd.f32 %v1406_v8, %v1370_v31  ;;  %v1445_v59 = vadd.f32 %v1444_v22, %v1443_v18  ;;  %v1369_v23 = vmul.f32 %v1304_v24, %v3251_v1 }
 0x1a4   :  { %v1864_v32 = vadd.f32 %v1783_v2, %v1672_v39  ;;  %v1637_v6 = vadd.f32 %v1636_v55, %v1635_v15  ;;  %v1920_v38 = vpop.permute.xlu0 %1919  ;;  %2505 = vset.pattern.permute.xlu1 %v3922_v28  ;;  %v3785_v2 = vpop.f32.mrf.mxu3 }
 0x1a5   :  { %v1952_v50 = vmul.f32 %v1920_v38, %v1271_v60  ;;  %v1446_v11 = vrot.slane %v1445_v59, 1  ;;  %v1408_v21 = vrot.slane %v1407_v27, 2  ;;  %1935 = vperm.xlu1 %2505, %v3675_v12   ;;  %v1400_v19 = vrot.slane %v1369_v23, 4  ;;  %v1224_v38 = vpop.f32.mrf.mxu0 }
 0x1a6   :  { %v2056_v44 = vadd.f32 %v1975_v29, %v1864_v32  ;;  %v1638_v40 = vrot.slane %v1637_v6, 1  ;;  %2506 = vset.pattern.permute.xlu2 %v3922_v28  ;;  %v1976_v29 = vrot.slane %v1945_v61, 4 }
 0x1a7   :  { %v2018_v54 = vrot.slane %v1952_v50, 4  ;;  %v1512_v36 = vpop.permute.xlu2 %1511  ;;  %1907 = vperm.xlu2 %2506, %v3700_v49   ;;  %v1447_v14 = vadd.f32 %v1446_v11, %v1445_v59  ;;  %v1401_v16 = vadd.f32 %v1400_v19, %v1369_v23  ;;  %v1409_v28 = vadd.f32 %v1408_v21, %v1407_v27 }
 0x1a8   :  { %v1639_v9 = vadd.f32 %v1638_v40, %v1637_v6  ;;  %v1562_v20 = vmul.f32 %v1512_v36, %v3390_v41  ;;  %v2076_v1 = vadd.f32 %v3745_v35, %v2056_v44 }
 0x1a9   :  { %v2019_v53 = vadd.f32 %v2018_v54, %v1952_v50  ;;  %v1402_v49 = vrot.slane %v1401_v16, 2  ;;  %v1410_v10 = vrot.slane %v1409_v28, 1  ;;  %v1273_v54 = vpop.f32.mrf.mxu1 }
 0x1aa   :  { %v1598_v42 = vrot.slane %v1562_v20, 4  ;;  %v1680_v13 = vadd.f32 %v1639_v9, %v1447_v14  ;;  %v2109_v17 = vrot.slane %v2076_v1, 6 }
 0x1ab   :  { %v2020_v43 = vrot.slane %v2019_v53, 2  ;;  %v1508_v41 = vpop.permute.xlu1 %1507  ;;  %v1403_v60 = vadd.f32 %v1402_v49, %v1401_v16  ;;  %v1411_v45 = vadd.f32 %v1410_v10, %v1409_v28 }
 0x1ac   :  { %v1599_v12 = vadd.f32 %v1598_v42, %v1562_v20  ;;  %v1872_v15 = vadd.f32 %v1831_v56, %v1680_v13  ;;  %v1561_v25 = vmul.f32 %v1508_v41, %v3342_v37  ;;  %v3791_v32 = vsel %vm2110_vm1, %v2109_v17, %v3756_v4 }
 0x1ad   :  { %v2021_v51 = vadd.f32 %v2020_v43, %v2019_v53  ;;  %v1732_v34 = vpop.permute.xlu0 %1731  ;;  %v1377_v37 = vmul.f32 %v3740_v57, %v1126_v62  ;;  %v1404_v59 = vrot.slane %v1403_v60, 1  ;;  %v1178_v43 = vpop.f32.mrf.mxu3  ;;  %v1953_v20 = vmul.f32 %v3762_v30, %v1273_v54 }
 0x1ae   :  { %v1600_v0 = vrot.slane %v1599_v12, 2  ;;  %v1592_v55 = vrot.slane %v1561_v25, 4  ;;  %v1761_v23 = vmul.f32 %v1732_v34, %v1224_v38 }
 0x1af   :  { %v2022_v33 = vrot.slane %v2021_v51, 1  ;;  %v1448_v21 = vrot.slane %v1377_v37, 4  ;;  %v2024_v17 = vrot.slane %v1953_v20, 4 }
 0x1b0   :  { %v1601_v52 = vadd.f32 %v1600_v0, %v1599_v12  ;;  %v1704_v31 = vpop.permute.xlu2 %1703  ;;  %v1593_v8 = vadd.f32 %v1592_v55, %v1561_v25  ;;  %v1832_v16 = vrot.slane %v1761_v23, 4 }
 0x1b1   :  { %v2023_v7 = vadd.f32 %v2022_v33, %v2021_v51  ;;  %v1754_v3 = vmul.f32 %v1704_v31, %v3460_v47  ;;  %v1977_v47 = vadd.f32 %v1976_v29, %v1945_v61  ;;  %v1449_v33 = vadd.f32 %v1448_v21, %v1377_v37  ;;  %v1276_v54 = vpop.f32.mrf.mxu1 }
 0x1b2   :  { %v1602_v6 = vrot.slane %v1601_v52, 1  ;;  %v1594_v27 = vrot.slane %v1593_v8, 2  ;;  %v1833_v0 = vadd.f32 %v1832_v16, %v1761_v23  ;;  %v2025_v29 = vadd.f32 %v2024_v17, %v1953_v20 }
 0x1b3   :  { %v2064_v39 = vadd.f32 %v2023_v7, %v1872_v15  ;;  %v1790_v50 = vrot.slane %v1754_v3, 4  ;;  %v1978_v14 = vrot.slane %v1977_v47, 2 }
 0x1b4   :  { %v1603_v40 = vadd.f32 %v1602_v6, %v1601_v52  ;;  %v1595_v11 = vadd.f32 %v1594_v27, %v1593_v8  ;;  %v1700_v9 = vpop.permute.xlu1 %1699  ;;  %v1834_v6 = vrot.slane %v1833_v0, 2 }
 0x1b5   :  { %v2084_v18 = vadd.f32 %v3745_v35, %v2064_v39  ;;  %v1791_v4 = vadd.f32 %v1790_v50, %v1754_v3  ;;  %v1753_v19 = vmul.f32 %v1700_v9, %v3413_v26  ;;  %v1979_v41 = vadd.f32 %v1978_v14, %v1977_v47 }
 0x1b6   :  { %v1349_v44 = vpop.permute.xlu0 %1348  ;;  %v1674_v58 = vadd.f32 %v1603_v40, %v1411_v45  ;;  %v1596_v62 = vrot.slane %v1595_v11, 1  ;;  %v1450_v39 = vrot.slane %v1449_v33, 2  ;;  %v1835_v23 = vadd.f32 %v1834_v6, %v1833_v0 }
 0x1b7   :  { %v2129_v22 = vrot.slane %v2084_v18, 6  ;;  %v1378_v24 = vmul.f32 %v1349_v44, %v1129_v48  ;;  %v1792_v36 = vrot.slane %v1791_v4, 2  ;;  %v1784_v42 = vrot.slane %v1753_v19, 4 }
 0x1b8   :  { %v1597_v56 = vadd.f32 %v1596_v62, %v1595_v11  ;;  %v1980_v48 = vrot.slane %v1979_v41, 1  ;;  %v1451_v50 = vadd.f32 %v1450_v39, %v1449_v33 }
 0x1b9   :  { %v3797_v53 = vsel %vm2110_vm1, %v2129_v22, %v3774_v46  ;;  %v1454_v57 = vrot.slane %v1378_v24, 4  ;;  %v1793_v51 = vadd.f32 %v1792_v36, %v1791_v4  ;;  %v1544_v34 = vpop.permute.xlu2 %1543  ;;  %v1405_v46 = vadd.f32 %v1404_v59, %v1403_v60 }
 0x1ba   :  { %v1570_v28 = vmul.f32 %v1544_v34, %v1178_v43  ;;  %v1785_v61 = vadd.f32 %v1784_v42, %v1753_v19  ;;  %v2026_v22 = vrot.slane %v2025_v29, 2  ;;  %v1452_v11 = vrot.slane %v1451_v50, 1 }
 0x1bb   :  { %v1455_v1 = vadd.f32 %v1454_v57, %v1378_v24  ;;  %v1794_v12 = vrot.slane %v1793_v51, 1  ;;  %v1673_v49 = vadd.f32 %v1597_v56, %v1405_v46  ;;  %v1981_v24 = vadd.f32 %v1980_v48, %v1979_v41  ;;  %v1227_v41 = vpop.f32.mrf.mxu0 }
 0x1bc   :  { %v1646_v26 = vrot.slane %v1570_v28, 4  ;;  %v1786_v7 = vrot.slane %v1785_v61, 2  ;;  %v2027_v57 = vadd.f32 %v2026_v22, %v2025_v29 }
 0x1bd   :  { %v1456_v13 = vrot.slane %v1455_v1, 2  ;;  %v1795_v30 = vadd.f32 %v1794_v12, %v1793_v51  ;;  %v1540_v31 = vpop.permute.xlu1 %1539  ;;  %v1453_v51 = vadd.f32 %v1452_v11, %v1451_v50 }
 0x1be   :  { %v1647_v10 = vadd.f32 %v1646_v26, %v1570_v28  ;;  %v1787_v55 = vadd.f32 %v1786_v7, %v1785_v61  ;;  %v1569_v3 = vmul.f32 %v1540_v31, %v3785_v2  ;;  %v2028_v42 = vrot.slane %v2027_v57, 1 }
 0x1bf   :  { %v1928_v15 = vpop.permute.xlu0 %1927  ;;  %v1457_v25 = vadd.f32 %v1456_v13, %v1455_v1  ;;  %v3801_v52 = vadd.f32 %v1795_v30, %v1674_v58  ;;  %v1836_v1 = vrot.slane %v1835_v23, 1 }
 0x1c0   :  { %v1648_v60 = vrot.slane %v1647_v10, 2  ;;  %v1788_v18 = vrot.slane %v1787_v55, 1  ;;  %v1640_v37 = vrot.slane %v1569_v3, 4  ;;  %v1954_v19 = vmul.f32 %v1928_v15, %v1276_v54 }
 0x1c1   :  { %v1458_v8 = vrot.slane %v1457_v25, 1  ;;  %v1837_v33 = vadd.f32 %v1836_v1, %v1835_v23 }
 0x1c2   :  { %v1649_v38 = vadd.f32 %v1648_v60, %v1647_v10  ;;  %v3804_v45 = vpop.permute.xlu2 %1313  ;;  %v1789_v44 = vadd.f32 %v1788_v18, %v1787_v55  ;;  %v1641_v27 = vadd.f32 %v1640_v37, %v1569_v3  ;;  %v2030_v46 = vrot.slane %v1954_v19, 4 }
 0x1c3   :  { %v1459_v2 = vadd.f32 %v1458_v8, %v1457_v25 }
 0x1c4   :  { %v1650_v40 = vrot.slane %v1649_v38, 1  ;;  %v1865_v47 = vadd.f32 %v1789_v44, %v1673_v49  ;;  %v1642_v58 = vrot.slane %v1641_v27, 2  ;;  %v2029_v49 = vadd.f32 %v2028_v42, %v2027_v57 }
 0x1c5   :  { %v2031_v15 = vadd.f32 %v2030_v46, %v1954_v19  ;;  %v3953_v19 = vld [vmem:[#allocation20_spill] sm:$0xff] }
 0x1c6   :  { %v1651_v4 = vadd.f32 %v1650_v40, %v1649_v38  ;;  %v2057_v9 = vadd.f32 %v1981_v24, %v1865_v47  ;;  %v1643_v36 = vadd.f32 %v1642_v58, %v1641_v27  ;;  %v1896_v43 = vpop.permute.xlu1 %1895 }
 0x1c7   :  { %v1946_v62 = vmul.f32 %v1896_v43, %v3446_v5  ;;  %v2032_v55 = vrot.slane %v2031_v15, 2 }
 0x1c8   :  { %v3806_v59 = vpop.permute.xlu0 %1707  ;;  %v1682_v21 = vadd.f32 %v1651_v4, %v1459_v2  ;;  %v2077_v20 = vadd.f32 %v3745_v35, %v2057_v9  ;;  %v1644_v14 = vrot.slane %v1643_v36, 1  ;;  %v1229_v9 = vpop.f32.mrf.mxu0 }
 0x1c9   :  { %v1982_v16 = vrot.slane %v1946_v62, 4  ;;  %v2033_v8 = vadd.f32 %v2032_v55, %v2031_v15  ;;  %v1755_v43 = vmul.f32 %v3806_v59, %v3953_v19 }
 0x1ca   :  { %v1645_v34 = vadd.f32 %v1644_v14, %v1643_v36  ;;  %v2112_v13 = vrot.slane %v2077_v20, 5 }
 0x1cb   :  { %v1740_v56 = vpop.permute.xlu2 %1739  ;;  %v1983_v28 = vadd.f32 %v1982_v16, %v1946_v62  ;;  %v2034_v22 = vrot.slane %v2033_v8, 1  ;;  %v3954_v62 = vld [vmem:[#allocation16_spill] sm:$0xff]  ;;  %v1796_v46 = vrot.slane %v1755_v43, 4 }
 0x1cc   :  { %v1681_v12 = vadd.f32 %v1645_v34, %v1453_v51  ;;  %v2114_v7 = vsel %vm2113_vm2, %v2112_v13, %v3791_v32  ;;  %v1763_v20 = vmul.f32 %v1740_v56, %v1229_v9  ;;  %v3955_v13 = vld [vmem:[#allocation15_spill] sm:$0xff]  ;;  %v3956_v56 = vld [vmem:[#allocation18_spill] sm:$0xff] }
 0x1cd   :  { %v1984_v17 = vrot.slane %v1983_v28, 2  ;;  %v2035_v54 = vadd.f32 %v2034_v22, %v2033_v8 }
 0x1ce   :  { %v1873_v26 = vadd.f32 %v1837_v33, %v1681_v12  ;;  %v1131_v33 = vpop.f32.mrf.mxu2 }
 0x1cf   :  { %v1985_v5 = vadd.f32 %v1984_v17, %v1983_v28  ;;  %v1736_v30 = vpop.permute.xlu1 %1735 }
 0x1d0   :  { %v2065_v0 = vadd.f32 %v2029_v49, %v1873_v26  ;;  %v1762_v25 = vmul.f32 %v1736_v30, %v1227_v41  ;;  %v1797_v26 = vadd.f32 %v1796_v46, %v1755_v43  ;;  %v1278_v41 = vpop.f32.mrf.mxu1  ;;  %v3960_v43 = vld [vmem:[#allocation21_spill] sm:$0xff] }
 0x1d1   :  { %v1548_v61 = vpop.permute.xlu0 %1547  ;;  %v1986_v10 = vrot.slane %v1985_v5, 1 }
 0x1d2   :  { %v2085_v39 = vadd.f32 %v3745_v35, %v2065_v0  ;;  %v1838_v31 = vrot.slane %v1762_v25, 4 }
 0x1d3   :  { %v1987_v29 = vadd.f32 %v1986_v10, %v1985_v5 }
 0x1d4   :  { %v1932_v60 = vpop.permute.xlu2 %1931  ;;  %v1839_v3 = vadd.f32 %v1838_v31, %v1762_v25  ;;  %v2131_v48 = vrot.slane %v2085_v39, 5  ;;  %v1798_v39 = vrot.slane %v1797_v26, 2  ;;  %v3957_v31 = vld [vmem:[#allocation19_spill] sm:$0xff] }
 0x1d5   :  { %v2058_v18 = vadd.f32 %v1987_v29, %v3801_v52 }
 0x1d6   :  { %v1840_v38 = vrot.slane %v1839_v3, 2  ;;  %v2132_v44 = vsel %vm2113_vm2, %v2131_v48, %v3797_v53  ;;  %v1371_v53 = vmul.f32 %v3804_v45, %v3356_v63  ;;  %v1844_v63 = vrot.slane %v1763_v20, 4 }
 0x1d7   :  { %v2078_v37 = vadd.f32 %v3745_v35, %v2058_v18 }
 0x1d8   :  { %v1841_v50 = vadd.f32 %v1840_v38, %v1839_v3  ;;  %v1516_v32 = vpop.permute.xlu1 %1515  ;;  %v1412_v16 = vrot.slane %v1371_v53, 4  ;;  %v1845_v15 = vadd.f32 %v1844_v63, %v1763_v20  ;;  %v3959_v38 = vld [vmem:[#allocation23_spill] sm:$0xff] }
 0x1d9   :  { %v2115_v40 = vrot.slane %v2078_v37, 4  ;;  %v1563_v1 = vmul.f32 %v1516_v32, %v3954_v62 }
 0x1da   :  { %v1319_v6 = vpop.permute.xlu0 %1318  ;;  %v1842_v27 = vrot.slane %v1841_v50, 1  ;;  %v1413_v12 = vadd.f32 %v1412_v16, %v1371_v53  ;;  %v1846_v55 = vrot.slane %v1845_v15, 2 }
 0x1db   :  { %v3818_v52 = vsel %vm2116_vm3, %v2115_v40, %v2114_v7  ;;  %v1604_v45 = vrot.slane %v1563_v1, 4  ;;  %v1372_v28 = vmul.f32 %v1319_v6, %v3955_v13  ;;  %v3958_v6 = vld [vmem:[#allocation22_spill] sm:$0xff]  ;;  %v1134_v40 = vpop.f32.mrf.mxu2  ;;  %v3961_v13 = vld [vmem:[#allocation25_spill] sm:$0xff] }
 0x1dc   :  { %v1843_v24 = vadd.f32 %v1842_v27, %v1841_v50  ;;  %v1414_v7 = vrot.slane %v1413_v12, 2 }
 0x1dd   :  { %v1520_v47 = vpop.permute.xlu2 %1519  ;;  %v1605_v5 = vadd.f32 %v1604_v45, %v1563_v1  ;;  %v1418_v30 = vrot.slane %v1372_v28, 4 }
 0x1de   :  { %v1874_v23 = vadd.f32 %v1843_v24, %v1682_v21  ;;  %v1180_v21 = vpop.f32.mrf.mxu3  ;;  %v1564_v17 = vmul.f32 %v1520_v47, %v3956_v56  ;;  %v1415_v50 = vadd.f32 %v1414_v7, %v1413_v12  ;;  %v1799_v24 = vadd.f32 %v1798_v39, %v1797_v26 }
 0x1df   :  { %v1571_v42 = vmul.f32 %v1548_v61, %v1180_v21  ;;  %v1955_v61 = vmul.f32 %v1932_v60, %v1278_v41  ;;  %v1606_v48 = vrot.slane %v1605_v5, 2  ;;  %v1419_v18 = vadd.f32 %v1418_v30, %v1372_v28 }
 0x1e0   :  { %v2066_v4 = vadd.f32 %v2035_v54, %v1874_v23  ;;  %v1610_v25 = vrot.slane %v1564_v17, 4  ;;  %v1847_v47 = vadd.f32 %v1846_v55, %v1845_v15  ;;  %v1416_v9 = vrot.slane %v1415_v50, 1 }
 0x1e1   :  { %v1900_v58 = vpop.permute.xlu1 %1899  ;;  %v1652_v59 = vrot.slane %v1571_v42, 4  ;;  %v1800_v21 = vrot.slane %v1799_v24, 1 }
 0x1e2   :  { %v2086_v11 = vadd.f32 %v3745_v35, %v2066_v4  ;;  %v1947_v29 = vmul.f32 %v1900_v58, %v3957_v31  ;;  %v1611_v22 = vadd.f32 %v1610_v25, %v1564_v17  ;;  %v1607_v4 = vadd.f32 %v1606_v48, %v1605_v5  ;;  %v3962_v48 = vld [vmem:[#allocation24_spill] sm:$0xff] }
 0x1e3   :  { %v1904_v2 = vpop.permute.xlu0 %1903  ;;  %v1653_v0 = vadd.f32 %v1652_v59, %v1571_v42  ;;  %v1420_v58 = vrot.slane %v1419_v18, 2  ;;  %v1848_v62 = vrot.slane %v1847_v47, 1  ;;  %v3839_v42 = vpop.f32.mrf.mxu1  ;;  %v1417_v56 = vadd.f32 %v1416_v9, %v1415_v50 }
 0x1e4   :  { %v2133_v57 = vrot.slane %v2086_v11, 4  ;;  %v1948_v8 = vmul.f32 %v1904_v2, %v3958_v6  ;;  %v1988_v54 = vrot.slane %v1947_v29, 4  ;;  %v1612_v19 = vrot.slane %v1611_v22, 2  ;;  %v1136_v30 = vpop.f32.mrf.mxu2 }
 0x1e5   :  { %v1654_v32 = vrot.slane %v1653_v0, 2  ;;  %v1608_v46 = vrot.slane %v1607_v4, 1  ;;  %v1421_v63 = vadd.f32 %v1420_v58, %v1419_v18  ;;  %v1801_v7 = vadd.f32 %v1800_v21, %v1799_v24 }
 0x1e6   :  { %v3823_v36 = vpop.permute.xlu2 %1358  ;;  %v3831_v51 = vsel %vm2116_vm3, %v2133_v57, %v2132_v44  ;;  %v2036_v44 = vrot.slane %v1955_v61, 4  ;;  %v1183_v27 = vpop.f32.mrf.mxu3  ;;  %v1994_v11 = vrot.slane %v1948_v8, 4  ;;  %v1989_v1 = vadd.f32 %v1988_v54, %v1947_v29 }
 0x1e7   :  { %v1655_v57 = vadd.f32 %v1654_v32, %v1653_v0  ;;  %v1613_v41 = vadd.f32 %v1612_v19, %v1611_v22  ;;  %v3842_v0 = vadd.f32 %v1848_v62, %v1847_v47  ;;  %v1422_v25 = vrot.slane %v1421_v63, 1  ;;  %v3963_v19 = vld [vmem:[#allocation17_spill] sm:$0xff] }
 0x1e8   :  { %v2037_v2 = vadd.f32 %v2036_v44, %v1955_v61  ;;  %v1995_v45 = vadd.f32 %v1994_v11, %v1948_v8  ;;  %v1609_v61 = vadd.f32 %v1608_v46, %v1607_v4  ;;  %v1380_v31 = vmul.f32 %v3823_v36, %v1134_v40  ;;  %v1232_v44 = vpop.f32.mrf.mxu0 }
 0x1e9   :  { %v1656_v26 = vrot.slane %v1655_v57, 1  ;;  %v1423_v47 = vadd.f32 %v1422_v25, %v1421_v63 }
 0x1ea   :  { %v1354_v34 = vpop.permute.xlu1 %1353  ;;  %v2038_v15 = vrot.slane %v2037_v2, 2  ;;  %v1675_v24 = vadd.f32 %v1609_v61, %v1417_v56  ;;  %v1466_v40 = vrot.slane %v1380_v31, 4 }
 0x1eb   :  { %v1379_v16 = vmul.f32 %v1354_v34, %v1131_v33  ;;  %v1990_v34 = vrot.slane %v1989_v1, 2  ;;  %v3846_v6 = vadd.f32 %v1656_v26, %v1655_v57 }
 0x1ec   :  { %v3828_v14 = vpop.permute.xlu0 %1743  ;;  %v3848_v8 = vadd.f32 %v2038_v15, %v2037_v2  ;;  %v1867_v46 = vadd.f32 %v1801_v7, %v1675_v24  ;;  %v1467_v56 = vadd.f32 %v1466_v40, %v1380_v31 }
 0x1ed   :  { %v1460_v33 = vrot.slane %v1379_v16, 4  ;;  %v1991_v50 = vadd.f32 %v1990_v34, %v1989_v1 }
 0x1ee   :  { %v1185_v55 = vpop.f32.mrf.mxu3 }
 0x1ef   :  { %v1716_v49 = vpop.permute.xlu2 %1715  ;;  %v1461_v32 = vadd.f32 %v1460_v33, %v1379_v16 }
 0x1f0   :  { %v1757_v28 = vmul.f32 %v1716_v49, %v3961_v13  ;;  %v1234_v7 = vpop.f32.mrf.mxu0 }
 0x1f1   :  { %v1462_v1 = vrot.slane %v1461_v32, 2 }
 0x1f2   :  { %v1808_v39 = vrot.slane %v1757_v28, 4 }
 0x1f3   :  { %v1712_v3 = vpop.permute.xlu1 %1711 }
 0x1f4   :  { %v1756_v37 = vmul.f32 %v1712_v3, %v3959_v38  ;;  %v1614_v38 = vrot.slane %v1613_v41, 1  ;;  %v1809_v54 = vadd.f32 %v1808_v39, %v1757_v28 }
 0x1f5   :  { %v1524_v10 = vpop.permute.xlu0 %1523 }
 0x1f6   :  { %v1802_v60 = vrot.slane %v1756_v37, 4  ;;  %v1565_v20 = vmul.f32 %v1524_v10, %v3960_v43  ;;  %v1996_v10 = vrot.slane %v1995_v45, 2  ;;  %v1615_v62 = vadd.f32 %v1614_v38, %v1613_v41 }
 0x1f7   :  { %v1810_v63 = vrot.slane %v1809_v54, 2 }
 0x1f8   :  { %v1556_v23 = vpop.permute.xlu2 %1555  ;;  %v1803_v53 = vadd.f32 %v1802_v60, %v1756_v37  ;;  %v1616_v5 = vrot.slane %v1565_v20, 4  ;;  %v1997_v36 = vadd.f32 %v1996_v10, %v1995_v45  ;;  %v1676_v15 = vadd.f32 %v1615_v62, %v1423_v47 }
 0x1f9   :  { %v1573_v22 = vmul.f32 %v1556_v23, %v1185_v55  ;;  %v1992_v23 = vrot.slane %v1991_v50, 1  ;;  %v1811_v33 = vadd.f32 %v1810_v63, %v1809_v54 }
 0x1fa   :  { %v1804_v17 = vrot.slane %v1803_v53, 2  ;;  %v1617_v37 = vadd.f32 %v1616_v5, %v1565_v20  ;;  %v1283_v20 = vpop.f32.mrf.mxu1  ;;  %v1998_v13 = vrot.slane %v1997_v36, 1 }
 0x1fb   :  { %v1664_v16 = vrot.slane %v1573_v22, 4  ;;  %v1993_v5 = vadd.f32 %v1992_v23, %v1991_v50 }
 0x1fc   :  { %v1552_v12 = vpop.permute.xlu1 %1551  ;;  %v1805_v29 = vadd.f32 %v1804_v17, %v1803_v53  ;;  %v1764_v53 = vmul.f32 %v3828_v14, %v1232_v44  ;;  %v1618_v57 = vrot.slane %v1617_v37, 2  ;;  %v1999_v10 = vadd.f32 %v1998_v13, %v1997_v36 }
 0x1fd   :  { %v1572_v4 = vmul.f32 %v1552_v12, %v1183_v27  ;;  %v1665_v34 = vadd.f32 %v1664_v16, %v1573_v22  ;;  %v2059_v38 = vadd.f32 %v1993_v5, %v1867_v46  ;;  %v1812_v22 = vrot.slane %v1811_v33, 1 }
 0x1fe   :  { %v1364_v59 = vpop.permute.xlu0 %1363  ;;  %v1806_v58 = vrot.slane %v1805_v29, 1  ;;  %v1619_v14 = vadd.f32 %v1618_v57, %v1617_v37  ;;  %v1850_v41 = vrot.slane %v1764_v53, 4 }
 0x1ff   :  { %v1381_v3 = vmul.f32 %v1364_v59, %v1136_v30  ;;  %v1658_v27 = vrot.slane %v1572_v4, 4  ;;  %v1463_v30 = vadd.f32 %v1462_v1, %v1461_v32  ;;  %v1666_v44 = vrot.slane %v1665_v34, 2 }
 0x200   :  { %v1807_v28 = vadd.f32 %v1806_v58, %v1805_v29  ;;  %v1468_v29 = vrot.slane %v1467_v56, 2  ;;  %v1851_v32 = vadd.f32 %v1850_v41, %v1764_v53  ;;  %v2079_v57 = vadd.f32 %v3745_v35, %v2059_v38 }
 0x201   :  { %v1908_v49 = vpop.permute.xlu2 %1907  ;;  %v1472_v11 = vrot.slane %v1381_v3, 4  ;;  %v1659_v61 = vadd.f32 %v1658_v27, %v1572_v4  ;;  %v1464_v37 = vrot.slane %v1463_v30, 1 }
 0x202   :  { %v1949_v18 = vmul.f32 %v1908_v49, %v3962_v48  ;;  %v1868_v39 = vadd.f32 %v1807_v28, %v1676_v15  ;;  %v1469_v40 = vadd.f32 %v1468_v29, %v1467_v56  ;;  %v1852_v27 = vrot.slane %v1851_v32, 2 }
 0x203   :  { %v1473_v12 = vadd.f32 %v1472_v11, %v1381_v3  ;;  %v1620_v3 = vrot.slane %v1619_v14, 1  ;;  %v2118_v28 = vrot.slane %v2079_v57, 3 }
 0x204   :  { %v2000_v60 = vrot.slane %v1949_v18, 4  ;;  %v2060_v47 = vadd.f32 %v1999_v10, %v1868_v39  ;;  %v1470_v63 = vrot.slane %v1469_v40, 1 }
 0x205   :  { %v1324_v9 = vpop.permute.xlu1 %1323  ;;  %v1474_v55 = vrot.slane %v1473_v12, 2  ;;  %v1621_v58 = vadd.f32 %v1620_v3, %v1619_v14 }
 0x206   :  { %v2001_v2 = vadd.f32 %v2000_v60, %v1949_v18  ;;  %v1373_v43 = vmul.f32 %v1324_v9, %v3963_v19  ;;  %v1660_v60 = vrot.slane %v1659_v61, 2  ;;  %v1667_v19 = vadd.f32 %v1666_v44, %v1665_v34 }
 0x207   :  { %v1940_v21 = vpop.permute.xlu0 %1939  ;;  %v1475_v54 = vadd.f32 %v1474_v55, %v1473_v12  ;;  %v2080_v23 = vadd.f32 %v3745_v35, %v2060_v47 }
 0x208   :  { %v1424_v45 = vrot.slane %v1373_v43, 4  ;;  %v1957_v59 = vmul.f32 %v1940_v21, %v1283_v20  ;;  %v2002_v17 = vrot.slane %v2001_v2, 2  ;;  %v2040_v20 = vrot.slane %v3848_v8, 1 }
 0x209   :  { %v1813_v21 = vadd.f32 %v1812_v22, %v1811_v33  ;;  %v1661_v53 = vadd.f32 %v1660_v60, %v1659_v61  ;;  %v1476_v1 = vrot.slane %v1475_v54, 1  ;;  %v2121_v5 = vrot.slane %v2080_v23, 2 }
 0x20a   :  { %v1425_v26 = vadd.f32 %v1424_v45, %v1373_v43  ;;  %v2048_v49 = vrot.slane %v1957_v59, 4  ;;  %v2003_v48 = vadd.f32 %v2002_v17, %v2001_v2  ;;  %v1465_v2 = vadd.f32 %v1464_v37, %v1463_v30 }
 0x20b   :  { %v1662_v17 = vrot.slane %v1661_v53, 1  ;;  %v1477_v30 = vadd.f32 %v1476_v1, %v1475_v54  ;;  %v1853_v33 = vadd.f32 %v1852_v27, %v1851_v32  ;;  %v2041_v29 = vadd.f32 %v2040_v20, %v3848_v8 }
 0x20c   :  { %v1426_v25 = vrot.slane %v1425_v26, 2  ;;  %v2049_v4 = vadd.f32 %v2048_v49, %v1957_v59  ;;  %v2004_v11 = vrot.slane %v2003_v48, 1  ;;  %v1683_v12 = vadd.f32 %v3846_v6, %v1465_v2 }
 0x20d   :  { %v1668_v59 = vrot.slane %v1667_v19, 1  ;;  %v1663_v39 = vadd.f32 %v1662_v17, %v1661_v53  ;;  %v1854_v38 = vrot.slane %v1853_v33, 1 }
 0x20e   :  { %v1427_v31 = vadd.f32 %v1426_v25, %v1425_v26  ;;  %v1748_v18 = vpop.permute.xlu1 %1747  ;;  %v2050_v16 = vrot.slane %v2049_v4, 2  ;;  %v2005_v45 = vadd.f32 %v2004_v11, %v2003_v48 }
 0x20f   :  { %v1765_v50 = vmul.f32 %v1748_v18, %v1234_v7  ;;  %v1875_v7 = vadd.f32 %v3842_v0, %v1683_v12  ;;  %v1669_v6 = vadd.f32 %v1668_v59, %v1667_v19  ;;  %v1471_v18 = vadd.f32 %v1470_v63, %v1469_v40  ;;  %v2637_v40 = vld [vmem:[%s3882_s4] ss:$0 sm:$0xff] }
 0x210   :  { %v1428_v24 = vrot.slane %v1427_v31, 1  ;;  %v2051_v34 = vadd.f32 %v2050_v16, %v2049_v4 }
 0x211   :  { %v1856_v36 = vrot.slane %v1765_v50, 4  ;;  %v1685_v3 = vadd.f32 %v1669_v6, %v1477_v30  ;;  %v2067_v44 = vadd.f32 %v2041_v29, %v1875_v7  ;;  %v1684_v32 = vadd.f32 %v1663_v39, %v1471_v18 }
 0x212   :  { %v1429_v9 = vadd.f32 %v1428_v24, %v1427_v31  ;;  %v2052_v48 = vrot.slane %v2051_v34, 1  ;;  %v1855_v24 = vadd.f32 %v1854_v38, %v1853_v33 }
 0x213   :  { %v1857_v43 = vadd.f32 %v1856_v36, %v1765_v50  ;;  %v2087_v47 = vadd.f32 %v3745_v35, %v2067_v44 }
 0x214   :  { %v1677_v62 = vadd.f32 %v1621_v58, %v1429_v9  ;;  %v2053_v60 = vadd.f32 %v2052_v48, %v2051_v34  ;;  %v1876_v54 = vadd.f32 %v1855_v24, %v1684_v32 }
 0x215   :  { %v1858_v46 = vrot.slane %v1857_v43, 2  ;;  %v2135_v58 = vrot.slane %v2087_v47, 3 }
 0x216   :  { %v1869_v13 = vadd.f32 %v1813_v21, %v1677_v62 }
 0x217   :  { %v1859_v56 = vadd.f32 %v1858_v46, %v1857_v43  ;;  %v1936_v14 = vpop.permute.xlu1 %1935 }
 0x218   :  { %v2061_v26 = vadd.f32 %v2005_v45, %v1869_v13  ;;  %v1956_v15 = vmul.f32 %v1936_v14, %v3839_v42  ;;  %v2120_v42 = vsel %vm2119_vm4, %v2118_v28, %v3818_v52 }
 0x219   :  { %v1860_v41 = vrot.slane %v1859_v56, 1  ;;  %v2123_v31 = vsel %vm2122_vm5, %v2121_v5, %v2120_v42 }
 0x21a   :  { %v2042_v61 = vrot.slane %v1956_v15, 4  ;;  %v2081_v25 = vadd.f32 %v3745_v35, %v2061_v26  ;;  %v2136_v35 = vsel %vm2119_vm4, %v2135_v58, %v3831_v51 }
 0x21b   :  { %v1861_v10 = vadd.f32 %v1860_v41, %v1859_v56 }
 0x21c   :  { %v2043_v55 = vadd.f32 %v2042_v61, %v1956_v15  ;;  %v2124_v49 = vrot.slane %v2081_v25, 1 }
 0x21d   :  { %v1877_v50 = vadd.f32 %v1861_v10, %v1685_v3 }
 0x21e   :  { %v2044_v37 = vrot.slane %v2043_v55, 2  ;;  %v2126_v0 = vsel %vm2125_vm6, %v2124_v49, %v2123_v31 }
 0x21f   :  { %2143 = vst [vmem:[#allocation10] sm:$0xff] %v2126_v0  ;;  %v2069_v8 = vadd.f32 %v2053_v60, %v1877_v50 }
 0x220   :  { %v2045_v22 = vadd.f32 %v2044_v37, %v2043_v55 }
 0x221   :  { %v2089_v11 = vadd.f32 %v2637_v40, %v2069_v8 }
 0x222   :  { %v2046_v52 = vrot.slane %v2045_v22, 1 }
 0x223   :  { %v2139_v2 = vrot.slane %v2089_v11, 1 }
 0x224   :  { %v2047_v4 = vadd.f32 %v2046_v52, %v2045_v22 }
 0x226   :  { %v2068_v36 = vadd.f32 %v2047_v4, %v1876_v54 }
 0x228   :  { %v2088_v9 = vadd.f32 %v2637_v40, %v2068_v36 }
 0x22a   :  { %v2137_v57 = vrot.slane %v2088_v9, 2 }
 0x22c   :  { %v2138_v19 = vsel %vm2122_vm5, %v2137_v57, %v2136_v35 }
 0x22d   :  { %v2140_v43 = vsel %vm2125_vm6, %v2139_v2, %v2138_v19 }
 0x22e   :  { %2144 = vst [vmem:[#allocation10 + $0x8] sm:$0xff] %v2140_v43 }
 0x22f   :  { %2157 = dma.vmem_to_hbm [thread:$0]  %s2150_s18, 256, %s2152_s21, [#allocation4], %s2767_s26, %s2767_s26, %s2768_s27  }
 0x230   :  { %2764 = dma.done.wait [#allocation4], 256  }
 0x231   :  { %2765 = vsyncadd [#allocation4], 4294967040 }
 0x232   :  { %2162 = vsyncpa [#allocation3], 1 }
 0x233   :  { %2163 = vsyncpa [#allocation6], 1 }
 0x234   :  { %2164 = vsyncpa [#allocation9], 1 }
 0x235   :  { %2165 = vsyncpa [#allocation4], 1 }

// kernel: tpu_custom_call.1
= control target key start
LH: loop header
LB: loop body
LE: loop exit
PB: predicated region body
PF: predicated region fallthrough
CT: control target
= control target key end

     0   :  { %10 = vsyncpa [#allocation3], 0  ;;  %s3878_s0 = inlined_call_operand.hbm [shape: f32[128,128], index: 0, kind: input, shape index: {}]   ;;  %s3879_s1 = inlined_call_operand.hbm [shape: bf16[128,256], index: 1, kind: input, shape index: {}]   ;;  %s3880_s2 = inlined_call_operand.hbm [shape: f32[1,256], index: 2, kind: input, shape index: {}]   ;;  %s3881_s3 = inlined_call_operand.hbm [shape: bf16[128,512], index: 3, kind: input, shape index: {}]   ;;  %s3882_s4 = inlined_call_operand.vmem [shape: f32[1,128], index: 4, kind: input, shape index: {}]   ;;  %s3883_s5 = inlined_call_operand.hbm [shape: f32[16,128], index: 5, kind: output, shape index: {}]  }
   0x1   :  { %11 = vsyncpa [#allocation6], 0 }
   0x2   :  { %12 = vsyncpa [#allocation9], 0 }
   0x3   :  { %13 = vsyncpa [#allocation4], 0  ;;  %s31_s20 = sshll.u32 %s3879_s1, 4  ;;  %s2766_s21 = smov [#allocation5]   ;;  %s32_s20 = int_to_ptr.hbm [resolvable:$true] %s31_s20 }
   0x4   :  { %s33_s22 = sshll.u32 %s2766_s21, 4  ;;  %s18_s25 = sshll.u32 %s3878_s0, 4  ;;  %s34_s22 = int_to_ptr.vmem [resolvable:$true] %s33_s22  ;;  %s19_s25 = int_to_ptr.hbm [resolvable:$true] %s18_s25 }
   0x5   :  { %s2767_s26 = smov 128   ;;  %s2768_s27 = smov 8  }
   0x6   :  { %39 = dma.hbm_to_vmem [thread:$0]  %s32_s20, 2048, %s34_s22, [#allocation6], %s2767_s26, %s2767_s26, %s2768_s27  }
   0x7   :  { %s2769_s28 = smov [#allocation2]   ;;  %s45_s1 = sshll.u32 %s3880_s2, 4  ;;  %s46_s1 = int_to_ptr.hbm [resolvable:$true] %s45_s1 }
   0x8   :  { %s20_s29 = sshll.u32 %s2769_s28, 4  ;;  %s55_s8 = sshll.u32 %s3881_s3, 4  ;;  %s21_s29 = int_to_ptr.vmem [resolvable:$true] %s20_s29  ;;  %s56_s8 = int_to_ptr.hbm [resolvable:$true] %s55_s8 }
   0x9   :  { %26 = dma.hbm_to_vmem [thread:$0]  %s19_s25, 2048, %s21_s29, [#allocation3], %s2767_s26, %s2767_s26, %s2768_s27  }
   0xa   :  { %s2770_s9 = smov [#allocation7]   ;;  %s2771_s11 = smov [#allocation8]  }
   0xb   :  { %s47_s10 = sshll.u32 %s2770_s9, 4  ;;  %s57_s12 = sshll.u32 %s2771_s11, 4  ;;  %s48_s10 = int_to_ptr.vmem [resolvable:$true] %s47_s10  ;;  %s58_s12 = int_to_ptr.vmem [resolvable:$true] %s57_s12 }
   0xc   :  { %50 = dma.hbm_to_vmem [thread:$0]  %s46_s1, 32, %s48_s10, [#allocation6]  }
   0xd   :  { %s2772_s13 = smov 256   ;;  %s2773_s2 = smov 16  }
   0xe   :  { %63 = dma.hbm_to_vmem [thread:$0]  %s56_s8, 4096, %s58_s12, [#allocation9], %s2772_s13, %s2772_s13, %s2773_s2  }
   0xf   :  { %2758 = dma.done.wait [#allocation3], 2048  }
  0x10   :  { %2759 = vsyncadd [#allocation3], 4294965248 }
  0x11   :  { %2760 = dma.done.wait [#allocation6], 2080  }
  0x12   :  { %2761 = vsyncadd [#allocation6], 4294965216 }
  0x13   :  { %2762 = dma.done.wait [#allocation9], 4096  }
  0x14   :  { %2763 = vsyncadd [#allocation9], 4294963200  ;;  %v2224_v0 = vld [vmem:[#allocation5 + $0x70] sm:$0xf]  ;;  %v2389_v1 = vld [vmem:[#allocation5 + $0x74] sm:$0xf0] }
  0x15   :  { %v2388_v2 = vld [vmem:[#allocation5 + $0x74] sm:$0xf]  ;;  %v2225_v3 = vor.u32 %v2389_v1, %v2224_v0  ;;  %v2226_v4 = vld [vmem:[#allocation5 + $0x78] sm:$0xf0]  ;;  %v2216_v5 = vld [vmem:[#allocation5 + $0x60] sm:$0xf] }
  0x16   :  { %v2387_v6 = vld [vmem:[#allocation5 + $0x64] sm:$0xf0]  ;;  %v2229_v7 = vor.u32 %v2388_v2, %v2226_v4  ;;  %v2386_v8 = vld [vmem:[#allocation5 + $0x64] sm:$0xf]  ;;  %v2218_v9 = vld [vmem:[#allocation5 + $0x68] sm:$0xf0] }
  0x17   :  { %208 = vmatpush.bf16.msra.mxu0 %v2225_v3  ;;  %2422 = vmatpush.bf16.msra.mxu2 %v2225_v3  ;;  %v2217_v10 = vor.u32 %v2387_v6, %v2216_v5  ;;  %v2221_v11 = vor.u32 %v2386_v8, %v2218_v9  ;;  %v2208_v12 = vld [vmem:[#allocation5 + $0x50] sm:$0xf]  ;;  %v2385_v13 = vld [vmem:[#allocation5 + $0x54] sm:$0xf0]  ;;  %v2384_v14 = vld [vmem:[#allocation5 + $0x54] sm:$0xf] }
  0x18   :  { %257 = vmatpush.bf16.msra.mxu1 %v2229_v7  ;;  %2430 = vmatpush.bf16.msra.mxu3 %v2229_v7  ;;  %v2210_v15 = vld [vmem:[#allocation5 + $0x58] sm:$0xf0]  ;;  %v2209_v16 = vor.u32 %v2385_v13, %v2208_v12  ;;  %v2200_v18 = vld [vmem:[#allocation5 + $0x40] sm:$0xf]  ;;  %v2383_v19 = vld [vmem:[#allocation5 + $0x44] sm:$0xf0] }
  0x19   :  { %v2213_v17 = vor.u32 %v2384_v14, %v2210_v15  ;;  %v2382_v20 = vld [vmem:[#allocation5 + $0x44] sm:$0xf]  ;;  %v2202_v21 = vld [vmem:[#allocation5 + $0x48] sm:$0xf0]  ;;  %v2201_v22 = vor.u32 %v2383_v19, %v2200_v18  ;;  %v2192_v24 = vld [vmem:[#allocation5 + $0x30] sm:$0xf] }
  0x1a   :  { %v2205_v23 = vor.u32 %v2382_v20, %v2202_v21  ;;  %v2381_v25 = vld [vmem:[#allocation5 + $0x34] sm:$0xf0]  ;;  %v2380_v26 = vld [vmem:[#allocation5 + $0x34] sm:$0xf]  ;;  %v2194_v27 = vld [vmem:[#allocation5 + $0x38] sm:$0xf0] }
  0x1b   :  { %209 = vmatpush.bf16.msra.mxu0 %v2217_v10  ;;  %2423 = vmatpush.bf16.msra.mxu2 %v2217_v10  ;;  %v2193_v28 = vor.u32 %v2381_v25, %v2192_v24  ;;  %v2197_v29 = vor.u32 %v2380_v26, %v2194_v27  ;;  %v2184_v30 = vld [vmem:[#allocation5 + $0x20] sm:$0xf]  ;;  %v2379_v31 = vld [vmem:[#allocation5 + $0x24] sm:$0xf0]  ;;  %v2378_v32 = vld [vmem:[#allocation5 + $0x24] sm:$0xf] }
  0x1c   :  { %258 = vmatpush.bf16.msra.mxu1 %v2221_v11  ;;  %2431 = vmatpush.bf16.msra.mxu3 %v2221_v11  ;;  %v2186_v33 = vld [vmem:[#allocation5 + $0x28] sm:$0xf0]  ;;  %v2185_v34 = vor.u32 %v2379_v31, %v2184_v30  ;;  %v2176_v36 = vld [vmem:[#allocation5 + $0x10] sm:$0xf]  ;;  %v2377_v37 = vld [vmem:[#allocation5 + $0x14] sm:$0xf0] }
  0x1d   :  { %v2189_v35 = vor.u32 %v2378_v32, %v2186_v33  ;;  %v2376_v38 = vld [vmem:[#allocation5 + $0x14] sm:$0xf]  ;;  %v2178_v39 = vld [vmem:[#allocation5 + $0x18] sm:$0xf0]  ;;  %v2177_v40 = vor.u32 %v2377_v37, %v2176_v36  ;;  %v2168_v42 = vld [vmem:[#allocation5] sm:$0xf] }
  0x1e   :  { %v2181_v41 = vor.u32 %v2376_v38, %v2178_v39  ;;  %v2375_v43 = vld [vmem:[#allocation5 + $0x4] sm:$0xf0]  ;;  %v2374_v44 = vld [vmem:[#allocation5 + $0x4] sm:$0xf]  ;;  %v2170_v45 = vld [vmem:[#allocation5 + $0x8] sm:$0xf0] }
  0x1f   :  { %210 = vmatpush.bf16.msra.mxu0 %v2209_v16  ;;  %2424 = vmatpush.bf16.msra.mxu2 %v2209_v16  ;;  %v82_v46 = vld [vmem:[#allocation2] sm:$0xff]  ;;  %v2169_v47 = vor.u32 %v2375_v43, %v2168_v42  ;;  %v83_v48 = vld [vmem:[#allocation2 + $0x8] sm:$0xff]  ;;  %v2173_v51 = vor.u32 %v2374_v44, %v2170_v45  ;;  %v2420_v55 = vld [vmem:[#allocation8 + $0xec] sm:$0xf0]  ;;  %s2778_s17 = smov [#allocation10]   ;;  %s2151_s21 = sshll.u32 %s3883_s5, 4  ;;  %s2152_s21 = int_to_ptr.hbm [resolvable:$true] %s2151_s21 }
  0x20   :  { %259 = vmatpush.bf16.msra.mxu1 %v2213_v17  ;;  %2432 = vmatpush.bf16.msra.mxu3 %v2213_v17  ;;  %v90_v49 = vld [vmem:[#allocation2 + $0x40] sm:$0xff]  ;;  %v91_v50 = vld [vmem:[#allocation2 + $0x48] sm:$0xff]  ;;  %v2827_v52 = vpack.c.bf16 %v83_v48, %v82_v46  ;;  %v2416_v58 = vld [vmem:[#allocation8 + $0xcc] sm:$0xf0]  ;;  %s2149_s18 = sshll.u32 %s2778_s17, 4  ;;  %s2150_s18 = int_to_ptr.vmem [resolvable:$true] %s2149_s18 }
  0x21   :  { %v2829_v53 = vpack.c.bf16 %v91_v50, %v90_v49  ;;  %v2360_v54 = vld [vmem:[#allocation8 + $0xe0] sm:$0xf]  ;;  %v2418_v59 = vld [vmem:[#allocation8 + $0xe4] sm:$0xf]  ;;  %v2362_v60 = vld [vmem:[#allocation8 + $0xf0] sm:$0xf0] }
  0x22   :  { %v2344_v56 = vld [vmem:[#allocation8 + $0xc0] sm:$0xf]  ;;  %v2361_v57 = vor.u32 %v2420_v55, %v2360_v54  ;;  %v2365_v62 = vor.u32 %v2418_v59, %v2362_v60  ;;  %v2414_v63 = vld [vmem:[#allocation8 + $0xc4] sm:$0xf]  ;;  %v2346_v0 = vld [vmem:[#allocation8 + $0xd0] sm:$0xf0] }
  0x23   :  { %211 = vmatpush.bf16.msra.mxu0 %v2201_v22  ;;  %2425 = vmatpush.bf16.msra.mxu2 %v2201_v22  ;;  %v2345_v61 = vor.u32 %v2416_v58, %v2344_v56  ;;  %v2328_v1 = vld [vmem:[#allocation8 + $0xa0] sm:$0xf]  ;;  %v2412_v2 = vld [vmem:[#allocation8 + $0xac] sm:$0xf0]  ;;  %v2349_v3 = vor.u32 %v2414_v63, %v2346_v0  ;;  %v85_v8 = vld [vmem:[#allocation2 + $0x18] sm:$0xff] }
  0x24   :  { %260 = vmatpush.bf16.msra.mxu1 %v2205_v23  ;;  %2433 = vmatpush.bf16.msra.mxu3 %v2205_v23  ;;  %v2329_v4 = vor.u32 %v2412_v2, %v2328_v1  ;;  %v84_v5 = vld [vmem:[#allocation2 + $0x10] sm:$0xff]  ;;  %v2312_v6 = vld [vmem:[#allocation8 + $0x80] sm:$0xf]  ;;  %v93_v10 = vld [vmem:[#allocation2 + $0x58] sm:$0xff] }
  0x25   :  { %v2408_v7 = vld [vmem:[#allocation8 + $0x8c] sm:$0xf0]  ;;  %v2835_v12 = vpack.c.bf16 %v85_v8, %v84_v5  ;;  %v2296_v14 = vld [vmem:[#allocation8 + $0x60] sm:$0xf]  ;;  %v2410_v16 = vld [vmem:[#allocation8 + $0xa4] sm:$0xf] }
  0x26   :  { %v92_v9 = vld [vmem:[#allocation2 + $0x50] sm:$0xff]  ;;  %v2313_v11 = vor.u32 %v2408_v7, %v2312_v6  ;;  %v2280_v20 = vld [vmem:[#allocation8 + $0x40] sm:$0xf]  ;;  %v2406_v22 = vld [vmem:[#allocation8 + $0x84] sm:$0xf] }
  0x27   :  { %212 = vmatpush.bf16.msra.mxu0 %v2193_v28  ;;  %2426 = vmatpush.bf16.msra.mxu2 %v2193_v28  ;;  %v2837_v13 = vpack.c.bf16 %v93_v10, %v92_v9  ;;  %v2404_v15 = vld [vmem:[#allocation8 + $0x6c] sm:$0xf0]  ;;  %v2330_v18 = vld [vmem:[#allocation8 + $0xb0] sm:$0xf0]  ;;  %v2264_v25 = vld [vmem:[#allocation8 + $0x20] sm:$0xf] }
  0x28   :  { %261 = vmatpush.bf16.msra.mxu1 %v2197_v29  ;;  %2434 = vmatpush.bf16.msra.mxu3 %v2197_v29  ;;  %v2297_v17 = vor.u32 %v2404_v15, %v2296_v14  ;;  %v2333_v19 = vor.u32 %v2410_v16, %v2330_v18  ;;  %v2400_v21 = vld [vmem:[#allocation8 + $0x4c] sm:$0xf0]  ;;  %v2314_v24 = vld [vmem:[#allocation8 + $0x90] sm:$0xf0]  ;;  %v2419_v28 = vld [vmem:[#allocation8 + $0xec] sm:$0xf] }
  0x29   :  { %v2281_v23 = vor.u32 %v2400_v21, %v2280_v20  ;;  %v2317_v26 = vor.u32 %v2406_v22, %v2314_v24  ;;  %v2396_v27 = vld [vmem:[#allocation8 + $0x2c] sm:$0xf0]  ;;  %v2370_v29 = vld [vmem:[#allocation8 + $0xf8] sm:$0xf0]  ;;  %v2402_v31 = vld [vmem:[#allocation8 + $0x64] sm:$0xf] }
  0x2a   :  { %v2373_v30 = vor.u32 %v2419_v28, %v2370_v29  ;;  %v2298_v32 = vld [vmem:[#allocation8 + $0x70] sm:$0xf0]  ;;  %v2415_v33 = vld [vmem:[#allocation8 + $0xcc] sm:$0xf]  ;;  %v94_v37 = vld [vmem:[#allocation2 + $0x60] sm:$0xff] }
  0x2b   :  { %213 = vmatpush.bf16.msra.mxu0 %v2185_v34  ;;  %2427 = vmatpush.bf16.msra.mxu2 %v2185_v34  ;;  %v2354_v34 = vld [vmem:[#allocation8 + $0xd8] sm:$0xf0]  ;;  %v2301_v38 = vor.u32 %v2402_v31, %v2298_v32  ;;  %v2248_v39 = vld [vmem:[#allocation8] sm:$0xf]  ;;  %v87_v43 = vld [vmem:[#allocation2 + $0x28] sm:$0xff] }
  0x2c   :  { %262 = vmatpush.bf16.msra.mxu1 %v2189_v35  ;;  %2435 = vmatpush.bf16.msra.mxu3 %v2189_v35  ;;  %v2265_v35 = vor.u32 %v2396_v27, %v2264_v25  ;;  %v2357_v36 = vor.u32 %v2415_v33, %v2354_v34  ;;  %v86_v42 = vld [vmem:[#allocation2 + $0x20] sm:$0xff]  ;;  %v2282_v46 = vld [vmem:[#allocation8 + $0x50] sm:$0xf0]  ;;  %v2411_v50 = vld [vmem:[#allocation8 + $0xac] sm:$0xf] }
  0x2d   :  { %v2398_v45 = vld [vmem:[#allocation8 + $0x44] sm:$0xf]  ;;  %v2845_v48 = vpack.c.bf16 %v87_v43, %v86_v42  ;;  %v2266_v56 = vld [vmem:[#allocation8 + $0x30] sm:$0xf0]  ;;  %v2421_v58 = vld [vmem:[#allocation8 + $0xf4] sm:$0xf0] }
  0x2e   :  { %v2285_v49 = vor.u32 %v2398_v45, %v2282_v46  ;;  %v2394_v54 = vld [vmem:[#allocation8 + $0x24] sm:$0xf]  ;;  %v2250_v1 = vld [vmem:[#allocation8 + $0x10] sm:$0xf0]  ;;  %v2352_v2 = vld [vmem:[#allocation8 + $0xc8] sm:$0xf] }
  0x2f   :  { %214 = vmatpush.bf16.msra.mxu0 %v2177_v40  ;;  %2428 = vmatpush.bf16.msra.mxu2 %v2177_v40  ;;  %v2392_v40 = vld [vmem:[#allocation8 + $0xc] sm:$0xf0]  ;;  %v2269_v59 = vor.u32 %v2394_v54, %v2266_v56  ;;  %v2390_v63 = vld [vmem:[#allocation8 + $0x4] sm:$0xf]  ;;  %v2403_v5 = vld [vmem:[#allocation8 + $0x6c] sm:$0xf] }
  0x30   :  { %263 = vmatpush.bf16.msra.mxu1 %v2181_v41  ;;  %2436 = vmatpush.bf16.msra.mxu3 %v2181_v41  ;;  %v95_v41 = vld [vmem:[#allocation2 + $0x68] sm:$0xff]  ;;  %v2249_v44 = vor.u32 %v2392_v40, %v2248_v39  ;;  %v2306_v6 = vld [vmem:[#allocation8 + $0x78] sm:$0xf0]  ;;  %v2413_v8 = vld [vmem:[#allocation8 + $0xb4] sm:$0xf0]  ;;  %v2253_v9 = vor.u32 %v2390_v63, %v2250_v1 }
  0x31   :  { %v2336_v7 = vld [vmem:[#allocation8 + $0xa8] sm:$0xf]  ;;  %v2309_v10 = vor.u32 %v2403_v5, %v2306_v6  ;;  %v2399_v15 = vld [vmem:[#allocation8 + $0x4c] sm:$0xf]  ;;  %v2290_v16 = vld [vmem:[#allocation8 + $0x58] sm:$0xf0] }
  0x32   :  { %v2337_v14 = vor.u32 %v2413_v8, %v2336_v7  ;;  %v2320_v18 = vld [vmem:[#allocation8 + $0x88] sm:$0xf]  ;;  %v88_v20 = vld [vmem:[#allocation2 + $0x30] sm:$0xff]  ;;  %v89_v21 = vld [vmem:[#allocation2 + $0x38] sm:$0xff]  ;;  %v2293_v22 = vor.u32 %v2399_v15, %v2290_v16 }
  0x33   :  { %215 = vmatpush.bf16.msra.mxu0 %v2169_v47  ;;  %2429 = vmatpush.bf16.msra.mxu2 %v2169_v47  ;;  %v2843_v47 = vpack.c.bf16 %v95_v41, %v94_v37  ;;  %v101_v25 = vpack.c.bf16 %v89_v21, %v88_v20  ;;  %v2274_v27 = vld [vmem:[#allocation8 + $0x38] sm:$0xf0]  ;;  %v2304_v28 = vld [vmem:[#allocation8 + $0x68] sm:$0xf]  ;;  %v2391_v31 = vld [vmem:[#allocation8 + $0xc] sm:$0xf] }
  0x34   :  { %264 = vmatpush.bf16.msra.mxu1 %v2173_v51  ;;  %2437 = vmatpush.bf16.msra.mxu3 %v2173_v51  ;;  %v2338_v51 = vld [vmem:[#allocation8 + $0xb8] sm:$0xf0]  ;;  %v2288_v34 = vld [vmem:[#allocation8 + $0x48] sm:$0xf]  ;;  %v2397_v39 = vld [vmem:[#allocation8 + $0x34] sm:$0xf0] }
  0x35   :  { %v2341_v55 = vor.u32 %v2411_v50, %v2338_v51  ;;  %v2258_v32 = vld [vmem:[#allocation8 + $0x18] sm:$0xf0]  ;;  %v2256_v41 = vld [vmem:[#allocation8 + $0x8] sm:$0xf]  ;;  %v2393_v42 = vld [vmem:[#allocation8 + $0x14] sm:$0xf0] }
  0x36   :  { %216 = vmatmul.bf16.vlgmr.msra.gmra.mxu0 %v2827_v52  ;;  %236 = vmatmul.bf16.vlgmr.msra.gmra.mxu2 %v2829_v53  ;;  %v2257_v43 = vor.u32 %v2393_v42, %v2256_v41 }
  0x37   :  { %265 = vmatmul.bf16.vlgmr.msra.gmra.mxu1 %v2827_v52  ;;  %285 = vmatmul.bf16.vlgmr.msra.gmra.mxu3 %v2829_v53 }
  0x38   :  { %1090 = vmatpush.bf16.msrb.mxu2 %v2361_v57  ;;  %1139 = vmatpush.bf16.msrb.mxu3 %v2365_v62  ;;  %v2368_v57 = vld [vmem:[#allocation8 + $0xe8] sm:$0xf]  ;;  %v2322_v62 = vld [vmem:[#allocation8 + $0x98] sm:$0xf0] }
  0x39   :  { %1237 = vmatpush.bf16.msrb.mxu1 %v2373_v30  ;;  %v2369_v60 = vor.u32 %v2421_v58, %v2368_v57  ;;  %v2405_v30 = vld [vmem:[#allocation8 + $0x74] sm:$0xf0] }
  0x3a   :  { %v2305_v33 = vor.u32 %v2405_v30, %v2304_v28 }
  0x3b   :  { %1188 = vmatpush.bf16.msrb.mxu0 %v2369_v60 }
  0x3c   :  { %1091 = vmatpush.bf16.msrb.mxu2 %v2345_v61  ;;  %1140 = vmatpush.bf16.msrb.mxu3 %v2349_v3  ;;  %v2407_v61 = vld [vmem:[#allocation8 + $0x8c] sm:$0xf]  ;;  %v2417_v3 = vld [vmem:[#allocation8 + $0xd4] sm:$0xf0] }
  0x3d   :  { %1238 = vmatpush.bf16.msrb.mxu1 %v2357_v36  ;;  %v2325_v0 = vor.u32 %v2407_v61, %v2322_v62  ;;  %v2261_v36 = vor.u32 %v2391_v31, %v2258_v32 }
  0x40   :  { %1092 = vmatpush.bf16.msrb.mxu2 %v2329_v4  ;;  %1141 = vmatpush.bf16.msrb.mxu3 %v2333_v19  ;;  %v2353_v4 = vor.u32 %v2417_v3, %v2352_v2  ;;  %v2409_v19 = vld [vmem:[#allocation8 + $0x94] sm:$0xf0] }
  0x41   :  { %1239 = vmatpush.bf16.msrb.mxu1 %v2341_v55  ;;  %v2321_v24 = vor.u32 %v2409_v19, %v2320_v18 }
  0x42   :  { %1189 = vmatpush.bf16.msrb.mxu0 %v2353_v4 }
  0x44   :  { %1093 = vmatpush.bf16.msrb.mxu2 %v2313_v11  ;;  %1142 = vmatpush.bf16.msrb.mxu3 %v2317_v26  ;;  %v96_v11 = vld [vmem:[#allocation2 + $0x70] sm:$0xff] }
  0x45   :  { %1240 = vmatpush.bf16.msrb.mxu1 %v2325_v0  ;;  %v2395_v26 = vld [vmem:[#allocation8 + $0x2c] sm:$0xf] }
  0x46   :  { %221 = vmatmul.bf16.gmra.mxu0 %v2835_v12  ;;  %241 = vmatmul.bf16.gmra.mxu2 %v2837_v13  ;;  %v2277_v29 = vor.u32 %v2395_v26, %v2274_v27 }
  0x47   :  { %270 = vmatmul.bf16.gmra.mxu1 %v2835_v12  ;;  %290 = vmatmul.bf16.gmra.mxu3 %v2837_v13 }
  0x48   :  { %1094 = vmatpush.bf16.msrb.mxu2 %v2297_v17  ;;  %1143 = vmatpush.bf16.msrb.mxu3 %v2301_v38  ;;  %v97_v17 = vld [vmem:[#allocation2 + $0x78] sm:$0xff]  ;;  %v2272_v38 = vld [vmem:[#allocation8 + $0x28] sm:$0xf] }
  0x49   :  { %1241 = vmatpush.bf16.msrb.mxu1 %v2309_v10  ;;  %1190 = vmatpush.bf16.msrb.mxu0 %v2337_v14  ;;  %v2273_v40 = vor.u32 %v2397_v39, %v2272_v38  ;;  %v3884_v10 = vmov 1   ;;  %v3890_v14 = vmov 0  }
  0x4a   :  { %2452 = vset.pattern.permute.xlu1 %v3884_v10  ;;  %2451 = vset.pattern.permute.xlu0 %v3890_v14 }
  0x4c   :  { %1095 = vmatpush.bf16.msrb.mxu2 %v2281_v23  ;;  %1144 = vmatpush.bf16.msrb.mxu3 %v2285_v49  ;;  %v2851_v23 = vpack.c.bf16 %v97_v17, %v96_v11 }
  0x4d   :  { %1242 = vmatpush.bf16.msrb.mxu1 %v2293_v22  ;;  %1191 = vmatpush.bf16.msrb.mxu0 %v2321_v24 }
  0x50   :  { %1096 = vmatpush.bf16.msrb.mxu2 %v2265_v35  ;;  %1145 = vmatpush.bf16.msrb.mxu3 %v2269_v59  ;;  %v2401_v35 = vld [vmem:[#allocation8 + $0x54] sm:$0xf0] }
  0x51   :  { %1243 = vmatpush.bf16.msrb.mxu1 %v2277_v29  ;;  %1192 = vmatpush.bf16.msrb.mxu0 %v2305_v33  ;;  %v2289_v37 = vor.u32 %v2401_v35, %v2288_v34 }
  0x54   :  { %1097 = vmatpush.bf16.msrb.mxu2 %v2249_v44  ;;  %1146 = vmatpush.bf16.msrb.mxu3 %v2253_v9  ;;  %v3886_v9 = vmov 3  }
  0x55   :  { %1244 = vmatpush.bf16.msrb.mxu1 %v2261_v36  ;;  %1193 = vmatpush.bf16.msrb.mxu0 %v2289_v37 }
  0x56   :  { %246 = vmatmul.bf16.gmra.mxu2 %v2843_v47  ;;  %226 = vmatmul.bf16.gmra.mxu0 %v2845_v48 }
  0x57   :  { %295 = vmatmul.bf16.gmra.mxu3 %v2843_v47  ;;  %275 = vmatmul.bf16.gmra.mxu1 %v2845_v48 }
  0x58   :  { %2454 = vset.pattern.permute.xlu2 %v3886_v9 }
  0x59   :  { %1194 = vmatpush.bf16.msrb.mxu0 %v2273_v40 }
  0x5d   :  { %1195 = vmatpush.bf16.msrb.mxu0 %v2257_v43 }
  0x66   :  { %251 = vmatmul.bf16.gmra.mxu2 %v2851_v23  ;;  %231 = vmatmul.bf16.gmra.mxu0 %v101_v25 }
  0x67   :  { %300 = vmatmul.bf16.gmra.mxu3 %v2851_v23  ;;  %280 = vmatmul.bf16.gmra.mxu1 %v101_v25 }
  0x76   :  { %1098 = vmatmul.bf16.vlgmr.msrb.gmra.mxu2 %v2827_v52  ;;  %1196 = vmatmul.bf16.vlgmr.msrb.gmra.mxu0 %v2827_v52 }
  0x77   :  { %1147 = vmatmul.bf16.vlgmr.msrb.gmra.mxu3 %v2827_v52  ;;  %1245 = vmatmul.bf16.vlgmr.msrb.gmra.mxu1 %v2827_v52  ;;  %v122_v52 = vld [vmem:[#allocation7] sm:$0x3] }
  0x78   :  { %v2867_v44 = vperm.slane %v122_v52, 0  ;;  %v2873_v50 = vperm.slane %v122_v52, 1 }
  0x86   :  { %1103 = vmatmul.bf16.gmra.mxu2 %v2835_v12  ;;  %1201 = vmatmul.bf16.gmra.mxu0 %v2835_v12 }
  0x87   :  { %1152 = vmatmul.bf16.gmra.mxu3 %v2835_v12  ;;  %1250 = vmatmul.bf16.gmra.mxu1 %v2835_v12 }
  0x96   :  { %1108 = vmatmul.bf16.gmra.mxu2 %v2845_v48  ;;  %1206 = vmatmul.bf16.gmra.mxu0 %v2845_v48 }
  0x97   :  { %1157 = vmatmul.bf16.gmra.mxu3 %v2845_v48  ;;  %1255 = vmatmul.bf16.gmra.mxu1 %v2845_v48 }
  0xa6   :  { %1113 = vmatmul.bf16.gmra.mxu2 %v101_v25  ;;  %1211 = vmatmul.bf16.gmra.mxu0 %v101_v25 }
  0xa7   :  { %1162 = vmatmul.bf16.gmra.mxu3 %v101_v25  ;;  %1260 = vmatmul.bf16.gmra.mxu1 %v101_v25 }
  0xb3   :  { %v217_v45 = vpop.f32.mrf.mxu0 }
  0xb4   :  { %v218_v46 = vadd.f32 %v217_v45, %v2867_v44  ;;  %v266_v55 = vpop.f32.mrf.mxu1 }
  0xb5   :  { %v267_v58 = vadd.f32 %v266_v55, %v2873_v50 }
  0xb6   :  { %v306_v49 = vrot.slane %v218_v46, 4  ;;  %1118 = vmatmul.bf16.gmra.mxu2 %v2829_v53  ;;  %1216 = vmatmul.bf16.gmra.mxu0 %v2829_v53 }
  0xb7   :  { %1167 = vmatmul.bf16.gmra.mxu3 %v2829_v53  ;;  %1265 = vmatmul.bf16.gmra.mxu1 %v2829_v53  ;;  %v2230_v0 = vmul.f32 -1.442695, %v267_v58 }
  0xb8   :  { %v307_v12 = vmax.f32 %v218_v46, %v306_v49 }
  0xb9   :  { %v237_v48 = vpop.f32.mrf.mxu2  ;;  %2509 = vpow2.f32 %v2230_v0 }
  0xba   :  { %v308_v51 = vrot.slane %v307_v12, 2  ;;  %v238_v54 = vadd.f32 %v237_v48, %v2867_v44  ;;  %v286_v3 = vpop.f32.mrf.mxu3 }
  0xbb   :  { %v219_v56 = vpop.f32.mrf.mxu0  ;;  %v287_v4 = vadd.f32 %v286_v3, %v2873_v50 }
  0xbc   :  { %v309_v57 = vmax.f32 %v307_v12, %v308_v51  ;;  %v354_v59 = vrot.slane %v238_v54, 4  ;;  %v2879_v60 = vadd.f32 %v219_v56, %v2867_v44  ;;  %v268_v20 = vpop.f32.mrf.mxu1 }
  0xbd   :  { %v2238_v15 = vmul.f32 -1.442695, %v287_v4  ;;  %v269_v26 = vadd.f32 %v268_v20, %v2873_v50 }
  0xbe   :  { %v310_v61 = vrot.slane %v309_v57, 1  ;;  %v355_v62 = vmax.f32 %v238_v54, %v354_v59  ;;  %v312_v2 = vrot.slane %v2879_v60, 4 }
  0xbf   :  { %v2510_v19 = vpop.eup %2509  ;;  %2511 = vpow2.f32 %v2238_v15  ;;  %v2231_v33 = vmul.f32 -1.442695, %v269_v26 }
  0xc0   :  { %v311_v63 = vmax.f32 %v309_v57, %v310_v61  ;;  %v356_v1 = vrot.slane %v355_v62, 2  ;;  %v313_v8 = vmax.f32 %v2879_v60, %v312_v2  ;;  %v2895_v25 = vadd.f32 1.0, %v2510_v19 }
  0xc1   :  { %v239_v5 = vpop.f32.mrf.mxu2 }
  0xc2   :  { %v357_v53 = vmax.f32 %v355_v62, %v356_v1  ;;  %v402_v6 = vsub.f32 %v218_v46, %v311_v63  ;;  %v2887_v11 = vadd.f32 %v239_v5, %v2867_v44  ;;  %v314_v18 = vrot.slane %v313_v8, 2  ;;  %v288_v32 = vpop.f32.mrf.mxu3 }
  0xc3   :  { %v222_v29 = vpop.f32.mrf.mxu0  ;;  %v289_v37 = vadd.f32 %v288_v32, %v2873_v50  ;;  %vm647_vm0 = vweird.f32 %v2895_v25 }
  0xc4   :  { %v358_v7 = vrot.slane %v357_v53, 1  ;;  %v418_v16 = vmul.f32 1.442695, %v402_v6  ;;  %v360_v21 = vrot.slane %v2887_v11, 4  ;;  %v315_v24 = vmax.f32 %v313_v8, %v314_v18  ;;  %v271_v59 = vpop.f32.mrf.mxu1 }
  0xc5   :  { %v2901_v34 = vadd.f32 %v222_v29, %v2867_v44  ;;  %v2239_v52 = vmul.f32 -1.442695, %v289_v37  ;;  %v272_v2 = vadd.f32 %v271_v59, %v2873_v50 }
  0xc6   :  { %1123 = vmatmul.bf16.gmra.mxu2 %v2837_v13  ;;  %v359_v17 = vmax.f32 %v357_v53, %v358_v7  ;;  %1221 = vmatmul.bf16.gmra.mxu0 %v2837_v13  ;;  %2513 = vpow2.f32 %v418_v16  ;;  %v361_v28 = vmax.f32 %v2887_v11, %v360_v21  ;;  %v316_v31 = vrot.slane %v315_v24, 1 }
  0xc7   :  { %1270 = vmatmul.bf16.gmra.mxu1 %v2837_v13  ;;  %1172 = vmatmul.bf16.gmra.mxu3 %v2837_v13  ;;  %v2512_v13 = vpop.eup %2511  ;;  %2515 = vrcp.f32 %v2895_v25  ;;  %v318_v41 = vrot.slane %v2901_v34, 4  ;;  %v2232_v21 = vmul.f32 -1.442695, %v272_v2 }
  0xc8   :  { %v410_v22 = vsub.f32 %v238_v54, %v359_v17  ;;  %v362_v36 = vrot.slane %v361_v28, 2  ;;  %v317_v38 = vmax.f32 %v315_v24, %v316_v31  ;;  %v2907_v40 = vadd.f32 1.0, %v2512_v13 }
  0xc9   :  { %v242_v27 = vpop.f32.mrf.mxu2  ;;  %v319_v49 = vmax.f32 %v2901_v34, %v318_v41  ;;  %v651_v13 = vand.u32 2147483647, %v2895_v25 }
  0xca   :  { %v434_v30 = vmul.f32 1.442695, %v410_v22  ;;  %v363_v42 = vmax.f32 %v361_v28, %v362_v36  ;;  %v403_v46 = vsub.f32 %v2879_v60, %v317_v38  ;;  %v2927_v58 = vadd.f32 %v242_v27, %v2867_v44  ;;  %v291_v53 = vpop.f32.mrf.mxu3 }
  0xcb   :  { %v320_v61 = vrot.slane %v319_v49, 2  ;;  %v224_v6 = vpop.f32.mrf.mxu0  ;;  %v653_v28 = vand.u32 2147483648, %v2895_v25  ;;  %v292_v36 = vadd.f32 %v291_v53, %v2873_v50  ;;  %vm652_vm3 = vcmp.eq.f32.partialorder %v651_v13, 8.507059e+37 }
  0xcc   :  { %v2903_v35 = vpop.eup %2513  ;;  %2517 = vpow2.f32 %v434_v30  ;;  %v364_v54 = vrot.slane %v363_v42, 1  ;;  %v420_v57 = vmul.f32 1.442695, %v403_v46  ;;  %v366_v5 = vrot.slane %v2927_v58, 4 }
  0xcd   :  { %v450_v39 = vrot.slane %v2903_v35, 4  ;;  %2519 = vpow2.f32 %v2231_v33  ;;  %v2911_v43 = vpop.eup %2515  ;;  %v321_v8 = vmax.f32 %v319_v49, %v320_v61  ;;  %v2945_v20 = vadd.f32 %v224_v6, %v2867_v44 }
  0xce   :  { %2521 = vrcp.f32 %v2907_v40  ;;  %v643_v51 = vmul.f32 %v2911_v43, %v2895_v25  ;;  %v365_v0 = vmax.f32 %v363_v42, %v364_v54  ;;  %v367_v26 = vmax.f32 %v2927_v58, %v366_v5 }
  0xcf   :  { %v451_v12 = vadd.f32 %v2903_v35, %v450_v39  ;;  %2523 = vpow2.f32 %v2239_v52  ;;  %vm648_vm1 = vweird.f32 %v2911_v43  ;;  %v322_v27 = vrot.slane %v321_v8, 1 }
  0xd0   :  { %v644_v63 = vsub.f32 1.0, %v643_v51  ;;  %2525 = vpow2.f32 %v420_v57  ;;  %v411_v18 = vsub.f32 %v2887_v11, %v365_v0  ;;  %v324_v33 = vrot.slane %v2945_v20, 4  ;;  %vm2962_vm2 = vmor %vm647_vm0, %vm648_vm1 }
  0xd1   :  { %v2913_v45 = vpop.f32.mrf.mxu2  ;;  %v452_v56 = vrot.slane %v451_v12, 2  ;;  %v368_v41 = vrot.slane %v367_v26, 2  ;;  %v323_v52 = vmax.f32 %v321_v8, %v322_v27  ;;  %v654_v49 = vor.u32 1.1754944e-38, %v653_v28 }
  0xd2   :  { %v2922_v48 = vpop.eup %2517  ;;  %v645_v19 = vmul.f32 %v2911_v43, %v644_v63  ;;  %v436_v31 = vmul.f32 1.442695, %v411_v18  ;;  %v293_v46 = vpop.f32.mrf.mxu3  ;;  %v325_v57 = vmax.f32 %v2945_v20, %v324_v33  ;;  %v2240_v59 = vmul.f32 -1.442695, %v292_v36 }
  0xd3   :  { %v2520_v55 = vpop.eup %2519  ;;  %v498_v60 = vrot.slane %v2922_v48, 4  ;;  %v453_v62 = vadd.f32 %v452_v56, %v451_v12  ;;  %vm767_vm4 = vweird.f32 %v2907_v40  ;;  %v369_v61 = vmax.f32 %v367_v26, %v368_v41 }
  0xd4   :  { %v2932_v1 = vpop.eup %2521  ;;  %v646_v32 = vadd.f32 %v2911_v43, %v645_v19  ;;  %v773_v63 = vand.u32 2147483648, %v2907_v40  ;;  %v404_v53 = vsub.f32 %v2901_v34, %v323_v52  ;;  %v326_v5 = vrot.slane %v325_v57, 2  ;;  %v227_v52 = vpop.f32.mrf.mxu0 }
  0xd5   :  { %v454_v3 = vrot.slane %v453_v62, 1  ;;  %v2524_v7 = vpop.eup %2523  ;;  %v499_v16 = vadd.f32 %v2922_v48, %v498_v60  ;;  %v763_v17 = vmul.f32 %v2932_v1, %v2907_v40  ;;  %v2984_v60 = vadd.f32 %v2913_v45, %v2867_v44 }
  0xd6   :  { %1128 = vmatmul.bf16.gmra.mxu2 %v2843_v47  ;;  %1226 = vmatmul.bf16.gmra.mxu0 %v2843_v47  ;;  %v2947_v24 = vadd.f32 1.0, %v2524_v7  ;;  %v2953_v29 = vpop.eup %2525  ;;  %v650_v51 = vsel %vm2962_vm2, %v2911_v43, %v646_v32  ;;  %vm768_vm5 = vweird.f32 %v2932_v1  ;;  %v774_v18 = vor.u32 1.1754944e-38, %v773_v63 }
  0xd7   :  { %1177 = vmatmul.bf16.gmra.mxu3 %v2843_v47  ;;  %1275 = vmatmul.bf16.gmra.mxu1 %v2843_v47  ;;  %v2930_v47 = vadd.f32 1.0, %v2520_v55  ;;  %v455_v15 = vadd.f32 %v454_v3, %v453_v62  ;;  %v500_v22 = vrot.slane %v499_v16, 2  ;;  %v764_v30 = vsub.f32 1.0, %v763_v17  ;;  %vm2996_vm6 = vmor %vm767_vm4, %vm768_vm5 }
  0xd8   :  { %v456_v42 = vrot.slane %v2953_v29, 4  ;;  %v655_v62 = vsel %vm652_vm3, %v654_v49, %v650_v51  ;;  %v370_v17 = vrot.slane %v369_v61, 1  ;;  %vm782_vm12 = vweird.f32 %v2947_v24 }
  0xd9   :  { %v2935_v4 = vpop.f32.mrf.mxu2  ;;  %2527 = vrcp.f32 %v2930_v47  ;;  %v501_v11 = vadd.f32 %v500_v22, %v499_v16  ;;  %v765_v54 = vmul.f32 %v2932_v1, %v764_v30  ;;  %v372_v16 = vrot.slane %v2984_v60, 4  ;;  %v273_v22 = vpop.f32.mrf.mxu1 }
  0xda   :  { %2529 = vrcp.f32 %v455_v15  ;;  %v457_v0 = vadd.f32 %v2953_v29, %v456_v42  ;;  %v3003_v19 = vpop.f32.mrf.mxu3  ;;  %v371_v36 = vmax.f32 %v369_v61, %v370_v17  ;;  %vm662_vm8 = vweird.f32 %v2930_v47 }
  0xdb   :  { %2531 = vpow2.f32 %v2232_v21  ;;  %v502_v38 = vrot.slane %v501_v11, 1  ;;  %v766_v45 = vadd.f32 %v2932_v1, %v765_v54  ;;  %v422_v21 = vmul.f32 1.442695, %v404_v53 }
  0xdc   :  { %2533 = vrcp.f32 %v2947_v24  ;;  %v458_v7 = vrot.slane %v457_v0, 2  ;;  %v373_v32 = vmax.f32 %v2984_v60, %v372_v16  ;;  %v3035_v61 = vadd.f32 %v227_v52, %v2867_v44 }
  0xdd   :  { %v503_v25 = vadd.f32 %v502_v38, %v501_v11  ;;  %2535 = vpow2.f32 %v436_v31  ;;  %v770_v27 = vsel %vm2996_vm6, %v2932_v1, %v766_v45  ;;  %v327_v11 = vmax.f32 %v325_v57, %v326_v5 }
  0xde   :  { %v294_v1 = vadd.f32 %v293_v46, %v2873_v50  ;;  %v374_v54 = vrot.slane %v373_v32, 2  ;;  %v412_v46 = vsub.f32 %v2927_v58, %v371_v36  ;;  %v3888_v57 = vmov 2  }
  0xdf   :  { %v2968_v39 = vpop.eup %2527  ;;  %2537 = vrcp.f32 %v503_v25  ;;  %v328_v25 = vrot.slane %v327_v11, 1 }
  0xe0   :  { %v2530_v55 = vpop.eup %2529  ;;  %v658_v56 = vmul.f32 %v2968_v39, %v2930_v47  ;;  %2539 = vpow2.f32 %v2240_v59  ;;  %vm663_vm9 = vweird.f32 %v2968_v39  ;;  %v668_v59 = vand.u32 2147483648, %v2930_v47 }
  0xe1   :  { %v2972_v12 = vpop.f32.mrf.mxu2  ;;  %v2532_v43 = vpop.eup %2531  ;;  %2541 = vpow2.f32 %v422_v21  ;;  %vm3043_vm10 = vmor %vm662_vm8, %vm663_vm9  ;;  %v375_v5 = vmax.f32 %v373_v32, %v374_v54  ;;  %v2241_v6 = vmul.f32 -1.442695, %v294_v1  ;;  %v788_v1 = vand.u32 2147483648, %v2947_v24 }
  0xe2   :  { %v2991_v2 = vpop.eup %2533  ;;  %v659_v15 = vsub.f32 1.0, %v658_v56  ;;  %v3013_v13 = vadd.f32 1.0, %v2532_v43  ;;  %v3032_v43 = vadd.f32 %v2935_v4, %v2867_v44  ;;  %v3047_v4 = vpop.f32.mrf.mxu3  ;;  %v669_v16 = vor.u32 1.1754944e-38, %v668_v59 }
  0xe3   :  { %v3000_v8 = vpop.eup %2535  ;;  %v778_v49 = vmul.f32 %v2991_v2, %v2947_v24  ;;  %v3049_v53 = vpop.f32.mrf.mxu1  ;;  %vm783_vm13 = vweird.f32 %v2991_v2 }
  0xe4   :  { %v504_v28 = vrot.slane %v3000_v8, 4  ;;  %v660_v33 = vmul.f32 %v2968_v39, %v659_v15  ;;  %vm3089_vm14 = vmor %vm782_vm12, %vm783_vm13  ;;  %vm677_vm0 = vweird.f32 %v3013_v13 }
  0xe5   :  { %v2538_v34 = vpop.eup %2537  ;;  %v779_v58 = vsub.f32 1.0, %v778_v49 }
  0xe6   :  { %1133 = vmatmul.bf16.gmra.mxu2 %v2851_v23  ;;  %1231 = vmatmul.bf16.gmra.mxu0 %v2851_v23  ;;  %v570_v26 = vmul.f32 %v2538_v34, %v2922_v48  ;;  %v274_v48 = vadd.f32 %v273_v22, %v2873_v50  ;;  %v2540_v41 = vpop.eup %2539  ;;  %v505_v51 = vadd.f32 %v3000_v8, %v504_v28  ;;  %v376_v28 = vrot.slane %v375_v5, 1 }
  0xe7   :  { %1182 = vmatmul.bf16.gmra.mxu3 %v2851_v23  ;;  %1280 = vmatmul.bf16.gmra.mxu1 %v2851_v23  ;;  %v562_v23 = vmul.f32 %v2530_v55, %v2903_v35  ;;  %v771_v35 = vand.u32 2147483647, %v2907_v40  ;;  %v459_v40 = vadd.f32 %v458_v7, %v457_v0  ;;  %v661_v55 = vadd.f32 %v2968_v39, %v660_v33  ;;  %v3051_v45 = vpop.eup %2541 }
  0xe8   :  { %v3026_v56 = vadd.f32 1.0, %v2540_v41  ;;  %v2233_v63 = vmul.f32 -1.442695, %v274_v48  ;;  %v462_v33 = vrot.slane %v3051_v45, 4  ;;  %v377_v41 = vmax.f32 %v375_v5, %v376_v28 }
  0xe9   :  { %v882_v3 = vmul.f32 %v655_v62, %v562_v23  ;;  %vm772_vm7 = vcmp.eq.f32.partialorder %v771_v35, 8.507059e+37  ;;  %v460_v30 = vrot.slane %v459_v40, 1  ;;  %v3010_v31 = vpop.f32.mrf.mxu2  ;;  %v506_v23 = vrot.slane %v505_v51, 2 }
  0xea   :  { %v775_v37 = vsel %vm772_vm7, %v774_v18, %v770_v27  ;;  %v666_v62 = vand.u32 2147483647, %v2930_v47  ;;  %v329_v35 = vmax.f32 %v327_v11, %v328_v25  ;;  %v665_v7 = vsel %vm3043_vm10, %v2968_v39, %v661_v55  ;;  %v3084_v49 = vpop.f32.mrf.mxu3 }
  0xeb   :  { %1879 = vperm.xlu2 %2454, %v882_v3   ;;  %1495 = vperm.xlu1 %2452, %v882_v3   ;;  %v461_v38 = vadd.f32 %v460_v30, %v459_v40  ;;  %v890_v42 = vmul.f32 %v775_v37, %v570_v26  ;;  %v438_v47 = vmul.f32 1.442695, %v412_v46  ;;  %v378_v18 = vrot.slane %v3032_v43, 4  ;;  %v229_v30 = vpop.f32.mrf.mxu0  ;;  %v3086_v25 = vpop.f32.mrf.mxu1 }
  0xec   :  { %1288 = vperm.xlu0 %2451, %v882_v3   ;;  %v330_v40 = vrot.slane %v3035_v61, 4  ;;  %vm667_vm11 = vcmp.eq.f32.partialorder %v666_v62, 8.507059e+37  ;;  %v780_v39 = vmul.f32 %v2991_v2, %v779_v58  ;;  %v405_v27 = vsub.f32 %v2945_v20, %v329_v35 }
  0xed   :  { %2543 = vrcp.f32 %v461_v38  ;;  %v670_v22 = vsel %vm667_vm11, %v669_v16, %v665_v7  ;;  %v3077_v48 = vadd.f32 %v229_v30, %v2867_v44  ;;  %v789_v5 = vor.u32 1.1754944e-38, %v788_v1 }
  0xee   :  { %2545 = vrcp.f32 %v3013_v13  ;;  %v331_v36 = vmax.f32 %v3035_v61, %v330_v40  ;;  %v781_v37 = vadd.f32 %v2991_v2, %v780_v39  ;;  %v424_v38 = vmul.f32 1.442695, %v405_v27 }
  0xef   :  { %2547 = vrcp.f32 %v3026_v56  ;;  %v336_v62 = vrot.slane %v3077_v48, 4  ;;  %v297_v39 = vadd.f32 %v3003_v19, %v2873_v50  ;;  %v277_v19 = vadd.f32 %v3049_v53, %v2873_v50 }
  0xf0   :  { %2549 = vpow2.f32 %v2233_v63  ;;  %vm797_vm4 = vweird.f32 %v3026_v56 }
  0xf1   :  { %v3057_v17 = vpop.f32.mrf.mxu2  ;;  %2551 = vpow2.f32 %v2241_v6  ;;  %v3106_v6 = vadd.f32 %v2972_v12, %v2867_v44 }
  0xf2   :  { %2553 = vpow2.f32 %v438_v47 }
  0xf3   :  { %2455 = vset.pattern.permute.xlu2 %v3890_v14  ;;  %1527 = vperm.xlu1 %2452, %v890_v42   ;;  %v2544_v15 = vpop.eup %2543 }
  0xf4   :  { %2453 = vset.pattern.permute.xlu0 %v3888_v57  ;;  %1328 = vperm.xlu2 %2455, %v890_v42   ;;  %v563_v21 = vmul.f32 %v2544_v15, %v2953_v29  ;;  %v3067_v32 = vpop.eup %2545  ;;  %v379_v29 = vmax.f32 %v3032_v43, %v378_v18  ;;  %v337_v18 = vmax.f32 %v3077_v48, %v336_v62 }
  0xf5   :  { %1687 = vperm.xlu0 %2453, %v882_v3   ;;  %v507_v3 = vadd.f32 %v506_v23, %v505_v51  ;;  %v3074_v20 = vpop.eup %2547  ;;  %v463_v51 = vadd.f32 %v3051_v45, %v462_v33  ;;  %v332_v23 = vrot.slane %v331_v36, 2  ;;  %v673_v35 = vmul.f32 %v3067_v32, %v3013_v13 }
  0xf6   :  { %v3065_v11 = vmul.f32 %v670_v22, %v563_v21  ;;  %v2550_v52 = vpop.eup %2549  ;;  %v380_v55 = vrot.slane %v379_v29, 2  ;;  %v3113_v47 = vmul.f32 %v3074_v20, %v3026_v56  ;;  %vm678_vm1 = vweird.f32 %v3067_v32 }
  0xf7   :  { %v508_v34 = vrot.slane %v507_v3, 1  ;;  %v2552_v54 = vpop.eup %2551  ;;  %v464_v63 = vrot.slane %v463_v51, 2  ;;  %v3117_v12 = vadd.f32 1.0, %v2550_v52  ;;  %v674_v40 = vsub.f32 1.0, %v673_v35  ;;  %v3142_v52 = vpop.f32.mrf.mxu0  ;;  %vm3163_vm2 = vmor %vm677_vm0, %vm678_vm1 }
  0xf8   :  { %v3093_v59 = vpop.eup %2553  ;;  %v3123_v21 = vadd.f32 1.0, %v2552_v54  ;;  %v2242_v54 = vmul.f32 -1.442695, %v297_v39  ;;  %vm798_vm5 = vweird.f32 %v3074_v20 }
  0xf9   :  { %v509_v26 = vadd.f32 %v508_v34, %v507_v3  ;;  %v3099_v58 = vpop.f32.mrf.mxu2  ;;  %v413_v3 = vsub.f32 %v2984_v60, %v377_v41  ;;  %v510_v15 = vrot.slane %v3093_v59, 4  ;;  %v381_v60 = vmax.f32 %v379_v29, %v380_v55  ;;  %v3136_v41 = vpop.f32.mrf.mxu1  ;;  %vm3211_vm6 = vmor %vm797_vm4, %vm798_vm5 }
  0xfa   :  { %v333_v34 = vmax.f32 %v331_v36, %v332_v23  ;;  %v794_v29 = vsub.f32 1.0, %v3113_v47  ;;  %v675_v1 = vmul.f32 %v3067_v32, %v674_v40  ;;  %vm692_vm8 = vweird.f32 %v3117_v12 }
  0xfb   :  { %2456 = vset.pattern.permute.xlu1 %v3886_v9  ;;  %2555 = vrcp.f32 %v509_v26  ;;  %v440_v22 = vmul.f32 1.442695, %v413_v3  ;;  %v384_v26 = vrot.slane %v3106_v6, 4  ;;  %v382_v30 = vrot.slane %v381_v60, 1 }
  0xfc   :  { %2458 = vset.pattern.permute.xlu2 %v3884_v10  ;;  %1911 = vperm.xlu1 %2456, %v890_v42   ;;  %2557 = vpow2.f32 %v424_v38  ;;  %v511_v33 = vadd.f32 %v3093_v59, %v510_v15  ;;  %v334_v36 = vrot.slane %v333_v34, 1  ;;  %v3134_v38 = vpop.f32.mrf.mxu3  ;;  %v2234_v3 = vmul.f32 -1.442695, %v277_v19 }
  0xfd   :  { %1719 = vperm.xlu0 %2453, %v890_v42   ;;  %1499 = vperm.xlu2 %2458, %v3065_v11   ;;  %v786_v42 = vand.u32 2147483647, %v2947_v24  ;;  %v785_v24 = vsel %vm3089_vm14, %v2991_v2, %v781_v37  ;;  %v465_v2 = vadd.f32 %v464_v63, %v463_v51  ;;  %2559 = vrcp.f32 %v3117_v12 }
  0xfe   :  { %v338_v37 = vrot.slane %v337_v18, 2  ;;  %2561 = vrcp.f32 %v3123_v21  ;;  %v385_v51 = vmax.f32 %v3106_v6, %v384_v26  ;;  %v383_v23 = vmax.f32 %v381_v60, %v382_v30 }
  0xff   :  { %vm787_vm15 = vcmp.eq.f32.partialorder %v786_v42, 8.507059e+37  ;;  %v466_v27 = vrot.slane %v465_v2, 1  ;;  %v512_v42 = vrot.slane %v511_v33, 2  ;;  %2563 = vpow2.f32 %v440_v22 }
 0x100   :  { %v790_v16 = vsel %vm787_vm15, %v789_v5, %v785_v24  ;;  %v335_v24 = vmax.f32 %v333_v34, %v334_v36  ;;  %v339_v63 = vmax.f32 %v337_v18, %v338_v37  ;;  %v676_v35 = vadd.f32 %v3067_v32, %v675_v1 }
 0x101   :  { %v2556_v0 = vpop.eup %2555  ;;  %v3145_v55 = vpop.f32.mrf.mxu2  ;;  %v467_v46 = vadd.f32 %v466_v27, %v465_v2  ;;  %v513_v53 = vadd.f32 %v512_v42, %v511_v33  ;;  %v681_v5 = vand.u32 2147483647, %v3013_v13  ;;  %v386_v15 = vrot.slane %v385_v51, 2 }
 0x102   :  { %v571_v7 = vmul.f32 %v2556_v0, %v3000_v8  ;;  %v3129_v28 = vpop.eup %2557  ;;  %v683_v0 = vand.u32 2147483648, %v3013_v13  ;;  %v414_v60 = vsub.f32 %v3032_v43, %v383_v23  ;;  %v406_v18 = vsub.f32 %v3035_v61, %v335_v24  ;;  %v3189_v33 = vpop.f32.mrf.mxu1 }
 0x103   :  { %v468_v62 = vrot.slane %v3129_v28, 4  ;;  %v3156_v2 = vpop.eup %2559  ;;  %2565 = vrcp.f32 %v467_v46  ;;  %v340_v40 = vrot.slane %v339_v63, 1  ;;  %v680_v26 = vsel %vm3163_vm2, %v3067_v32, %v676_v35  ;;  %v3194_v32 = vpop.f32.mrf.mxu0 }
 0x104   :  { %2459 = vset.pattern.permute.xlu1 %v3888_v57  ;;  %v3120_v8 = vmul.f32 %v790_v16, %v571_v7  ;;  %v514_v7 = vrot.slane %v513_v53, 1  ;;  %2567 = vpow2.f32 %v2242_v54  ;;  %v684_v22 = vor.u32 1.1754944e-38, %v683_v0  ;;  %v3187_v61 = vpop.f32.mrf.mxu3 }
 0x105   :  { %2457 = vset.pattern.permute.xlu0 %v3890_v14  ;;  %1691 = vperm.xlu1 %2459, %v3065_v11   ;;  %v469_v13 = vadd.f32 %v3129_v28, %v468_v62  ;;  %2569 = vpow2.f32 %v2234_v3  ;;  %vm3178_vm3 = vcmp.eq.f32.partialorder %v681_v5, 8.507059e+37  ;;  %v795_v43 = vmul.f32 %v3074_v20, %v794_v29 }
 0x106   :  { %1293 = vperm.xlu0 %2457, %v3065_v11   ;;  %1531 = vperm.xlu2 %2458, %v3120_v8   ;;  %v515_v16 = vadd.f32 %v514_v7, %v513_v53  ;;  %v688_v27 = vmul.f32 %v3156_v2, %v3117_v12  ;;  %v3185_v30 = vmax.f32 %v385_v51, %v386_v15  ;;  %v442_v36 = vmul.f32 1.442695, %v414_v60 }
 0x107   :  { %v470_v29 = vrot.slane %v469_v13, 2  ;;  %v426_v19 = vmul.f32 1.442695, %v406_v18  ;;  %v341_v1 = vmax.f32 %v339_v63, %v340_v40  ;;  %v685_v42 = vsel %vm3178_vm3, %v684_v22, %v680_v26 }
 0x108   :  { %2571 = vrcp.f32 %v515_v16  ;;  %v803_v54 = vand.u32 2147483648, %v3026_v56  ;;  %v796_v53 = vadd.f32 %v3074_v20, %v795_v43  ;;  %v801_v62 = vand.u32 2147483647, %v3026_v56 }
 0x109   :  { %v3198_v51 = vpop.f32.mrf.mxu2  ;;  %v471_v24 = vadd.f32 %v470_v29, %v469_v13  ;;  %v689_v63 = vsub.f32 1.0, %v688_v27  ;;  %2573 = vpow2.f32 %v442_v36  ;;  %v407_v56 = vsub.f32 %v3077_v48, %v341_v1 }
 0x10a   :  { %2575 = vpow2.f32 %v426_v19  ;;  %v804_v47 = vor.u32 1.1754944e-38, %v803_v54  ;;  %v800_v60 = vsel %vm3211_vm6, %v3074_v20, %v796_v53  ;;  %vm802_vm7 = vcmp.eq.f32.partialorder %v801_v62, 8.507059e+37  ;;  %v3238_v27 = vpop.f32.mrf.mxu1 }
 0x10b   :  { %v472_v5 = vrot.slane %v471_v24, 1  ;;  %v3227_v40 = vadd.f32 %v3142_v52, %v2867_v44  ;;  %v690_v22 = vmul.f32 %v3156_v2, %v689_v63  ;;  %v279_v48 = vadd.f32 %v3086_v25, %v2873_v50  ;;  %v3245_v19 = vpop.f32.mrf.mxu0 }
 0x10c   :  { %v3236_v20 = vpop.f32.mrf.mxu3  ;;  %v805_v43 = vsel %vm802_vm7, %v804_v47, %v800_v60  ;;  %vm693_vm9 = vweird.f32 %v3156_v2  ;;  %v428_v29 = vmul.f32 1.442695, %v407_v56  ;;  %v696_v54 = vand.u32 2147483647, %v3117_v12 }
 0x10d   :  { %1723 = vperm.xlu1 %2459, %v3120_v8   ;;  %v473_v16 = vadd.f32 %v472_v5, %v471_v24  ;;  %v2235_v53 = vmul.f32 -1.442695, %v279_v48  ;;  %vm3262_vm10 = vmor %vm692_vm8, %vm693_vm9  ;;  %v3282_v60 = vadd.f32 %v3194_v32, %v2867_v44  ;;  %vm812_vm12 = vweird.f32 %v3123_v21 }
 0x10e   :  { %2460 = vset.pattern.permute.xlu0 %v3886_v9  ;;  %2462 = vset.pattern.permute.xlu2 %v3886_v9  ;;  %vm697_vm11 = vcmp.eq.f32.partialorder %v696_v54, 8.507059e+37  ;;  %v818_v32 = vand.u32 2147483648, %v3123_v21 }
 0x10f   :  { %1883 = vperm.xlu0 %2460, %v3065_v11   ;;  %v3167_v11 = vpop.eup %2561  ;;  %1915 = vperm.xlu2 %2462, %v3120_v8   ;;  %2577 = vrcp.f32 %v473_v16  ;;  %v348_v54 = vrot.slane %v3282_v60, 4 }
 0x110   :  { %v3171_v34 = vpop.eup %2563  ;;  %v808_v15 = vmul.f32 %v3167_v11, %v3123_v21  ;;  %vm813_vm13 = vweird.f32 %v3167_v11 }
 0x111   :  { %v2566_v37 = vpop.eup %2565  ;;  %v516_v0 = vrot.slane %v3171_v34, 4  ;;  %v3251_v1 = vpop.f32.mrf.mxu2  ;;  %vm3314_vm14 = vmor %vm812_vm12, %vm813_vm13 }
 0x112   :  { %v2568_v46 = vpop.eup %2567  ;;  %v564_v23 = vmul.f32 %v2566_v37, %v3051_v45  ;;  %v698_v37 = vand.u32 2147483648, %v3117_v12  ;;  %v3294_v48 = vpop.f32.mrf.mxu1 }
 0x113   :  { %v2570_v45 = vpop.eup %2569  ;;  %v3223_v18 = vadd.f32 1.0, %v2568_v46  ;;  %v517_v13 = vadd.f32 %v3171_v34, %v516_v0 }
 0x114   :  { %v884_v35 = vmul.f32 %v685_v42, %v564_v23  ;;  %v2572_v7 = vpop.eup %2571  ;;  %v3231_v26 = vadd.f32 1.0, %v2570_v45  ;;  %v691_v42 = vadd.f32 %v3156_v2, %v690_v22  ;;  %v809_v23 = vsub.f32 1.0, %v808_v15 }
 0x115   :  { %2463 = vset.pattern.permute.xlu1 %v3890_v14  ;;  %v572_v39 = vmul.f32 %v2572_v7, %v3093_v59  ;;  %v518_v52 = vrot.slane %v517_v13, 2  ;;  %v3242_v36 = vpop.eup %2573  ;;  %v342_v59 = vrot.slane %v3227_v40, 4  ;;  %2579 = vrcp.f32 %v3223_v18 }
 0x116   :  { %1298 = vperm.xlu1 %2463, %v884_v35   ;;  %v3247_v25 = vpop.eup %2575  ;;  %2581 = vrcp.f32 %v3231_v26  ;;  %v522_v45 = vrot.slane %v3242_v36, 4  ;;  %v699_v12 = vor.u32 1.1754944e-38, %v698_v37  ;;  %v810_v47 = vmul.f32 %v3167_v11, %v809_v23 }
 0x117   :  { %2461 = vset.pattern.permute.xlu0 %v3890_v14  ;;  %2465 = vset.pattern.permute.xlu2 %v3888_v57  ;;  %v519_v46 = vadd.f32 %v518_v52, %v517_v13  ;;  %v3256_v62 = vmul.f32 %v805_v43, %v572_v39  ;;  %v2578_v3 = vpop.eup %2577  ;;  %v474_v5 = vrot.slane %v3247_v25, 4  ;;  %2583 = vpow2.f32 %v428_v29  ;;  %v3301_v52 = vpop.f32.mrf.mxu0 }
 0x118   :  { %1333 = vperm.xlu0 %2461, %v3120_v8   ;;  %v388_v8 = vrot.slane %v3185_v30, 1  ;;  %1695 = vperm.xlu2 %2465, %v884_v35   ;;  %v343_v7 = vmax.f32 %v3227_v40, %v342_v59  ;;  %2585 = vpow2.f32 %v2235_v53  ;;  %v811_v29 = vadd.f32 %v3167_v11, %v810_v47 }
 0x119   :  { %v520_v63 = vrot.slane %v519_v46, 1  ;;  %v816_v37 = vand.u32 2147483647, %v3123_v21  ;;  %v3308_v23 = vpop.f32.mrf.mxu2  ;;  %vm827_vm0 = vweird.f32 %v3223_v18  ;;  %vm707_vm2 = vweird.f32 %v3231_v26 }
 0x11a   :  { %v389_v0 = vmax.f32 %v3185_v30, %v388_v8  ;;  %v695_v30 = vsel %vm3262_vm10, %v3156_v2, %v691_v42  ;;  %v299_v8 = vadd.f32 %v3047_v4, %v2873_v50  ;;  %v475_v4 = vadd.f32 %v3247_v25, %v474_v5 }
 0x11b   :  { %v521_v15 = vadd.f32 %v520_v63, %v519_v46  ;;  %v3285_v16 = vpop.eup %2579  ;;  %v700_v2 = vsel %vm697_vm11, %v699_v12, %v695_v30  ;;  %v344_v13 = vrot.slane %v343_v7, 2  ;;  %v819_v5 = vor.u32 1.1754944e-38, %v818_v32 }
 0x11c   :  { %v415_v56 = vsub.f32 %v3106_v6, %v389_v0  ;;  %v3290_v22 = vpop.eup %2581  ;;  %v3292_v6 = vpop.f32.mrf.mxu3  ;;  %v2243_v43 = vmul.f32 -1.442695, %v299_v8  ;;  %v476_v59 = vrot.slane %v475_v4, 2  ;;  %v823_v63 = vmul.f32 %v3285_v16, %v3223_v18 }
 0x11d   :  { %2587 = vrcp.f32 %v521_v15  ;;  %v3298_v39 = vpop.eup %2583  ;;  %v3325_v30 = vadd.f32 %v3010_v31, %v2867_v44  ;;  %v815_v15 = vsel %vm3314_vm14, %v3167_v11, %v811_v29  ;;  %vm817_vm15 = vcmp.eq.f32.partialorder %v816_v37, 8.507059e+37 }
 0x11e   :  { %2466 = vset.pattern.permute.xlu1 %v3886_v9  ;;  %v444_v42 = vmul.f32 1.442695, %v415_v56  ;;  %v2586_v0 = vpop.eup %2585  ;;  %v477_v12 = vadd.f32 %v476_v59, %v475_v4  ;;  %2589 = vpow2.f32 %v2243_v43  ;;  %v824_v47 = vsub.f32 1.0, %v823_v63  ;;  %v3344_v59 = vpop.f32.mrf.mxu1 }
 0x11f   :  { %1887 = vperm.xlu1 %2466, %v884_v35   ;;  %v703_v56 = vmul.f32 %v3290_v22, %v3231_v26  ;;  %v390_v11 = vrot.slane %v3325_v30, 4  ;;  %v282_v43 = vadd.f32 %v3136_v41, %v2873_v50  ;;  %v3349_v53 = vpop.f32.mrf.mxu0  ;;  %vm828_vm1 = vweird.f32 %v3285_v16 }
 0x120   :  { %2464 = vset.pattern.permute.xlu0 %v3884_v10  ;;  %1727 = vperm.xlu2 %2465, %v3256_v62   ;;  %2591 = vpow2.f32 %v444_v42  ;;  %v478_v32 = vrot.slane %v477_v12, 1  ;;  %vm708_vm3 = vweird.f32 %v3290_v22  ;;  %vm3378_vm4 = vmor %vm827_vm0, %vm828_vm1 }
 0x121   :  { %1503 = vperm.xlu0 %2464, %v884_v35   ;;  %v565_v35 = vmul.f32 %v2578_v3, %v3129_v28  ;;  %v523_v28 = vadd.f32 %v3242_v36, %v522_v45  ;;  %v345_v45 = vmax.f32 %v343_v7, %v344_v13  ;;  %v349_v7 = vmax.f32 %v3282_v60, %v348_v54  ;;  %v3356_v63 = vpop.f32.mrf.mxu2  ;;  %vm3398_vm5 = vmor %vm707_vm2, %vm708_vm3 }
 0x122   :  { %v820_v13 = vsel %vm817_vm15, %v819_v5, %v815_v15  ;;  %v704_v42 = vsub.f32 1.0, %v703_v56  ;;  %v391_v5 = vmax.f32 %v3325_v30, %v390_v11  ;;  %v2236_v15 = vmul.f32 -1.442695, %v282_v43 }
 0x123   :  { %v3306_v46 = vmul.f32 %v700_v2, %v565_v35  ;;  %v524_v24 = vrot.slane %v523_v28, 2  ;;  %v2588_v3 = vpop.eup %2587  ;;  %v480_v35 = vrot.slane %v3298_v39, 4  ;;  %v3336_v2 = vadd.f32 1.0, %v2586_v0 }
 0x124   :  { %v573_v31 = vmul.f32 %v2588_v3, %v3171_v34  ;;  %v346_v4 = vrot.slane %v345_v45, 1  ;;  %v350_v29 = vrot.slane %v349_v7, 2  ;;  %v3342_v37 = vpop.f32.mrf.mxu3  ;;  %v2590_v34 = vpop.eup %2589  ;;  %v479_v3 = vadd.f32 %v478_v32, %v477_v12 }
 0x125   :  { %v525_v21 = vadd.f32 %v524_v24, %v523_v28  ;;  %v481_v24 = vadd.f32 %v3298_v39, %v480_v35  ;;  %2593 = vrcp.f32 %v3336_v2  ;;  %v831_v35 = vand.u32 2147483647, %v3223_v18 }
 0x126   :  { %v3347_v54 = vmul.f32 %v820_v13, %v573_v31  ;;  %v3352_v0 = vpop.eup %2591  ;;  %v347_v41 = vmax.f32 %v345_v45, %v346_v4  ;;  %v351_v45 = vmax.f32 %v349_v7, %v350_v29  ;;  %v392_v31 = vrot.slane %v391_v5, 2 }
 0x127   :  { %2467 = vset.pattern.permute.xlu1 %v3890_v14  ;;  %v526_v8 = vrot.slane %v525_v21, 1  ;;  %v528_v12 = vrot.slane %v3352_v0, 4  ;;  %v482_v56 = vrot.slane %v481_v24, 2  ;;  %v3374_v7 = vadd.f32 1.0, %v2590_v34 }
 0x128   :  { %2471 = vset.pattern.permute.xlu2 %v3886_v9  ;;  %1338 = vperm.xlu1 %2467, %v3256_v62   ;;  %v352_v32 = vrot.slane %v351_v45, 1  ;;  %v711_v43 = vand.u32 2147483647, %v3231_v26  ;;  %vm3405_vm6 = vcmp.eq.f32.partialorder %v831_v35, 8.507059e+37  ;;  %vm722_vm8 = vweird.f32 %v3336_v2 }
 0x129   :  { %1535 = vperm.xlu0 %2464, %v3256_v62   ;;  %1891 = vperm.xlu2 %2471, %v3306_v46   ;;  %v527_v28 = vadd.f32 %v526_v8, %v525_v21  ;;  %v3362_v21 = vadd.f32 %v3057_v17, %v2867_v44  ;;  %v705_v8 = vmul.f32 %v3290_v22, %v704_v42  ;;  %vm842_vm12 = vweird.f32 %v3374_v7 }
 0x12a   :  { %v408_v44 = vsub.f32 %v3227_v40, %v347_v41  ;;  %v483_v34 = vadd.f32 %v482_v56, %v481_v24  ;;  %v529_v24 = vadd.f32 %v3352_v0, %v528_v12  ;;  %vm712_vm7 = vcmp.eq.f32.partialorder %v711_v43, 8.507059e+37 }
 0x12b   :  { %2595 = vrcp.f32 %v527_v28  ;;  %v3382_v13 = vpop.eup %2593  ;;  %v396_v40 = vrot.slane %v3362_v21, 4  ;;  %v706_v28 = vadd.f32 %v3290_v22, %v705_v8 }
 0x12c   :  { %2597 = vrcp.f32 %v479_v3  ;;  %v430_v42 = vmul.f32 1.442695, %v408_v44  ;;  %v3390_v41 = vpop.f32.mrf.mxu3  ;;  %v3392_v3 = vpop.f32.mrf.mxu1  ;;  %v718_v44 = vmul.f32 %v3382_v13, %v3336_v2  ;;  %v484_v4 = vrot.slane %v483_v34, 1 }
 0x12d   :  { %2599 = vpow2.f32 %v2236_v15  ;;  %v710_v35 = vsel %vm3398_vm5, %v3290_v22, %v706_v28  ;;  %vm723_vm9 = vweird.f32 %v3382_v13 }
 0x12e   :  { %2601 = vrcp.f32 %v3374_v7  ;;  %v485_v43 = vadd.f32 %v484_v4, %v483_v34  ;;  %v726_v4 = vand.u32 2147483647, %v3336_v2  ;;  %vm3472_vm10 = vmor %vm722_vm8, %vm723_vm9 }
 0x12f   :  { %2603 = vpow2.f32 %v430_v42 }
 0x130   :  { %1303 = vperm.xlu1 %2467, %v3306_v46   ;;  %2605 = vrcp.f32 %v485_v43  ;;  %vm3484_vm11 = vcmp.eq.f32.partialorder %v726_v4, 8.507059e+37 }
 0x131   :  { %2468 = vset.pattern.permute.xlu0 %v3886_v9  ;;  %2472 = vset.pattern.permute.xlu2 %v3890_v14  ;;  %v2596_v11 = vpop.eup %2595 }
 0x132   :  { %1919 = vperm.xlu0 %2468, %v3256_v62   ;;  %v825_v62 = vmul.f32 %v3285_v16, %v824_v47  ;;  %1343 = vperm.xlu2 %2472, %v3347_v54   ;;  %v833_v47 = vand.u32 2147483648, %v3223_v18  ;;  %v713_v18 = vand.u32 2147483648, %v3231_v26  ;;  %v3413_v26 = vpop.f32.mrf.mxu0  ;;  %v2598_v56 = vpop.eup %2597  ;;  %v574_v12 = vmul.f32 %v2596_v11, %v3242_v36 }
 0x133   :  { %v302_v36 = vadd.f32 %v3084_v49, %v2873_v50 }
 0x134   :  { %v826_v17 = vadd.f32 %v3285_v16, %v825_v62  ;;  %v834_v29 = vor.u32 1.1754944e-38, %v833_v47  ;;  %v393_v47 = vmax.f32 %v391_v5, %v392_v31  ;;  %v714_v5 = vor.u32 1.1754944e-38, %v713_v18 }
 0x135   :  { %v719_v18 = vsub.f32 1.0, %v718_v44  ;;  %v3444_v44 = vpop.f32.mrf.mxu3 }
 0x136   :  { %v830_v15 = vsel %vm3378_vm4, %v3285_v16, %v826_v17  ;;  %v353_v16 = vmax.f32 %v351_v45, %v352_v32  ;;  %v3419_v17 = vpop.f32.mrf.mxu2  ;;  %v397_v45 = vmax.f32 %v3362_v21, %v396_v40  ;;  %v530_v32 = vrot.slane %v529_v24, 2  ;;  %3917 = vst [vmem:[#allocation16_spill] sm:$0xff] %v3444_v44 }
 0x137   :  { %3916 = vst [vmem:[#allocation15_spill] sm:$0xff] %v3419_v17  ;;  %v835_v31 = vsel %vm3405_vm6, %v834_v29, %v830_v15  ;;  %v715_v11 = vsel %vm712_vm7, %v714_v5, %v710_v35  ;;  %v3446_v5 = vpop.f32.mrf.mxu1  ;;  %v728_v35 = vand.u32 2147483648, %v3336_v2 }
 0x138   :  { %2469 = vset.pattern.permute.xlu1 %v3884_v10  ;;  %v2600_v10 = vpop.eup %2599  ;;  %v3431_v62 = vmul.f32 %v835_v31, %v574_v12  ;;  %v409_v28 = vsub.f32 %v3282_v60, %v353_v16  ;;  %v398_v40 = vrot.slane %v397_v45, 2  ;;  %v531_v29 = vadd.f32 %v530_v32, %v529_v24 }
 0x139   :  { %1507 = vperm.xlu1 %2469, %v3306_v46   ;;  %v3433_v22 = vpop.eup %2601  ;;  %v3438_v42 = vadd.f32 1.0, %v2600_v10  ;;  %v3918_v60 = vmov 2   ;;  %v720_v10 = vmul.f32 %v3382_v13, %v719_v18 }
 0x13a   :  { %2474 = vset.pattern.permute.xlu0 %v3888_v57  ;;  %2475 = vset.pattern.permute.xlu2 %v3886_v9  ;;  %v394_v9 = vrot.slane %v393_v47, 1  ;;  %v566_v57 = vmul.f32 %v2598_v56, %v3247_v25  ;;  %v3442_v15 = vpop.eup %2603  ;;  %v2244_v56 = vmul.f32 -1.442695, %v302_v36  ;;  %v432_v24 = vmul.f32 1.442695, %v409_v28 }
 0x13b   :  { %1731 = vperm.xlu0 %2474, %v3347_v54   ;;  %1923 = vperm.xlu2 %2475, %v3347_v54   ;;  %v399_v16 = vmax.f32 %v397_v45, %v398_v40  ;;  %2607 = vrcp.f32 %v3438_v42  ;;  %v721_v31 = vadd.f32 %v3382_v13, %v720_v10  ;;  %v3922_v28 = vmov 3  }
 0x13c   :  { %v3440_v25 = vmul.f32 %v715_v11, %v566_v57  ;;  %v395_v8 = vmax.f32 %v393_v47, %v394_v9  ;;  %v838_v57 = vmul.f32 %v3433_v22, %v3374_v7  ;;  %v284_v9 = vadd.f32 %v3189_v33, %v2873_v50  ;;  %v3460_v47 = vpop.f32.mrf.mxu0 }
 0x13d   :  { %v486_v33 = vrot.slane %v3442_v15, 4  ;;  %2609 = vpow2.f32 %v2244_v56  ;;  %v400_v18 = vrot.slane %v399_v16, 1  ;;  %v304_v11 = vadd.f32 %v3134_v38, %v2873_v50 }
 0x13e   :  { %v3462_v12 = vpop.f32.mrf.mxu2  ;;  %v839_v45 = vsub.f32 1.0, %v838_v57  ;;  %v2237_v32 = vmul.f32 -1.442695, %v284_v9  ;;  %2611 = vpow2.f32 %v432_v24  ;;  %v729_v40 = vor.u32 1.1754944e-38, %v728_v35 }
 0x13f   :  { %3919 = vst [vmem:[#allocation17_spill] sm:$0xff] %v3462_v12  ;;  %v487_v2 = vadd.f32 %v3442_v15, %v486_v33  ;;  %v725_v56 = vsel %vm3472_vm10, %v3382_v13, %v721_v31  ;;  %v3925_v38 = vmov 1   ;;  %v401_v24 = vmax.f32 %v399_v16, %v400_v18  ;;  %v3493_v33 = vpop.f32.mrf.mxu3  ;;  %v3495_v13 = vpop.f32.mrf.mxu1 }
 0x140   :  { %2613 = vpow2.f32 %v2237_v32  ;;  %3926 = vst [vmem:[#allocation18_spill] sm:$0xff] %v3493_v33  ;;  %v730_v4 = vsel %vm3484_vm11, %v729_v40, %v725_v56  ;;  %vm843_vm13 = vweird.f32 %v3433_v22  ;;  %v846_v36 = vand.u32 2147483647, %v3374_v7 }
 0x141   :  { %2470 = vset.pattern.permute.xlu1 %v3918_v60  ;;  %v488_v57 = vrot.slane %v487_v2, 2  ;;  %3927 = vst [vmem:[#allocation19_spill] sm:$0xff] %v3495_v13  ;;  %vm3519_vm14 = vmor %vm842_vm12, %vm843_vm13  ;;  %vm737_vm0 = vweird.f32 %v3438_v42 }
 0x142   :  { %1699 = vperm.xlu1 %2470, %v3306_v46   ;;  %v416_v46 = vsub.f32 %v3325_v30, %v395_v8  ;;  %v2606_v30 = vpop.eup %2605  ;;  %vm3529_vm15 = vcmp.eq.f32.partialorder %v846_v36, 8.507059e+37 }
 0x143   :  { %2480 = vset.pattern.permute.xlu0 %v3890_v14  ;;  %2476 = vset.pattern.permute.xlu2 %v3890_v14  ;;  %v3488_v50 = vpop.eup %2607  ;;  %v567_v35 = vmul.f32 %v2606_v30, %v3298_v39  ;;  %v489_v16 = vadd.f32 %v488_v57, %v487_v2  ;;  %v848_v39 = vand.u32 2147483648, %v3374_v7 }
 0x144   :  { %1348 = vperm.xlu0 %2480, %v3431_v62   ;;  %1308 = vperm.xlu2 %2476, %v3440_v25   ;;  %v2610_v9 = vpop.eup %2609  ;;  %v3502_v31 = vpop.f32.mrf.mxu0  ;;  %vm738_vm1 = vweird.f32 %v3488_v50 }
 0x145   :  { %v1880_v49 = vpop.permute.xlu2 %1879  ;;  %3928 = vst [vmem:[#allocation20_spill] sm:$0xff] %v3502_v31  ;;  %v490_v18 = vrot.slane %v489_v16, 1  ;;  %v3517_v40 = vmul.f32 %v730_v4, %v567_v35  ;;  %vm3564_vm2 = vmor %vm737_vm0, %vm738_vm1  ;;  %vm2107_vm0 = vcmask 1041409   ;;  %vm2110_vm1 = vcmask 1042434  }
 0x146   :  { %v3451_v34 = vmul.f32 %v1880_v49, %v3238_v27  ;;  %v532_v27 = vrot.slane %v531_v29, 1  ;;  %v446_v49 = vmul.f32 1.442695, %v416_v46  ;;  %v3500_v46 = vpop.eup %2611 }
 0x147   :  { %v492_v30 = vrot.slane %v3500_v46, 4  ;;  %v491_v10 = vadd.f32 %v490_v18, %v489_v16 }
 0x148   :  { %v533_v43 = vadd.f32 %v532_v27, %v531_v29  ;;  %v840_v29 = vmul.f32 %v3433_v22, %v839_v45  ;;  %v2245_v27 = vmul.f32 -1.442695, %v304_v11  ;;  %v1119_v45 = vpop.f32.mrf.mxu2  ;;  %v417_v11 = vsub.f32 %v3362_v21, %v401_v24 }
 0x149   :  { %v849_v21 = vor.u32 1.1754944e-38, %v848_v39  ;;  %v1958_v57 = vrot.slane %v3451_v34, 4  ;;  %v493_v4 = vadd.f32 %v3500_v46, %v492_v30  ;;  %v3548_v39 = vpop.f32.mrf.mxu1  ;;  %v743_v30 = vand.u32 2147483648, %v3438_v42 }
 0x14a   :  { %2473 = vset.pattern.permute.xlu1 %v3925_v38  ;;  %2615 = vrcp.f32 %v533_v43  ;;  %v841_v32 = vadd.f32 %v3433_v22, %v840_v29  ;;  %v3514_v43 = vadd.f32 1.0, %v2610_v9  ;;  %3934 = vst [vmem:[#allocation22_spill] sm:$0xff] %v3548_v39 }
 0x14b   :  { %1539 = vperm.xlu1 %2473, %v3347_v54   ;;  %2617 = vpow2.f32 %v446_v49  ;;  %v733_v54 = vmul.f32 %v3488_v50, %v3438_v42  ;;  %v2614_v49 = vpop.eup %2613 }
 0x14c   :  { %2483 = vset.pattern.permute.xlu0 %v3922_v28  ;;  %2477 = vset.pattern.permute.xlu2 %v3925_v38  ;;  %2619 = vpow2.f32 %v2245_v27  ;;  %v845_v9 = vsel %vm3519_vm14, %v3433_v22, %v841_v32  ;;  %v3541_v16 = vadd.f32 1.0, %v2614_v49  ;;  %v741_v49 = vand.u32 2147483647, %v3438_v42 }
 0x14d   :  { %1927 = vperm.xlu0 %2483, %v3431_v62   ;;  %1511 = vperm.xlu2 %2477, %v3440_v25   ;;  %v734_v29 = vsub.f32 1.0, %v733_v54  ;;  %2621 = vrcp.f32 %v3514_v43  ;;  %v850_v32 = vsel %vm3529_vm15, %v849_v21, %v845_v9  ;;  %vm857_vm4 = vweird.f32 %v3514_v43 }
 0x14e   :  { %v1329_v8 = vpop.permute.xlu2 %1328  ;;  %2623 = vrcp.f32 %v491_v10  ;;  %v494_v10 = vrot.slane %v493_v4, 2  ;;  %vm3581_vm3 = vcmp.eq.f32.partialorder %v741_v49, 8.507059e+37  ;;  %vm752_vm8 = vweird.f32 %v3541_v16 }
 0x14f   :  { %v1374_v56 = vmul.f32 %v1329_v8, %v1119_v45  ;;  %v448_v8 = vmul.f32 1.442695, %v417_v11  ;;  %v3546_v45 = vpop.f32.mrf.mxu3  ;;  %v735_v36 = vmul.f32 %v3488_v50, %v734_v29 }
 0x150   :  { %v2616_v7 = vpop.eup %2615  ;;  %3933 = vst [vmem:[#allocation21_spill] sm:$0xff] %v3546_v45 }
 0x151   :  { %v3533_v27 = vpop.eup %2617  ;;  %v1430_v22 = vrot.slane %v1374_v56, 4  ;;  %v575_v54 = vmul.f32 %v2616_v7, %v3352_v0  ;;  %v3557_v0 = vpop.f32.mrf.mxu0  ;;  %2625 = vpow2.f32 %v448_v8  ;;  %v736_v2 = vadd.f32 %v3488_v50, %v735_v36 }
 0x152   :  { %v2620_v18 = vpop.eup %2619  ;;  %v534_v11 = vrot.slane %v3533_v27, 4  ;;  %3935 = vst [vmem:[#allocation23_spill] sm:$0xff] %v3557_v0  ;;  %2627 = vrcp.f32 %v3541_v16  ;;  %v3601_v39 = vpop.f32.mrf.mxu1 }
 0x153   :  { %2479 = vset.pattern.permute.xlu1 %v3922_v28  ;;  %v1431_v7 = vadd.f32 %v1430_v22, %v1374_v56  ;;  %v3562_v21 = vmul.f32 %v850_v32, %v575_v54  ;;  %v3568_v24 = vpop.eup %2621  ;;  %v744_v54 = vor.u32 1.1754944e-38, %v743_v30  ;;  %3940 = vst [vmem:[#allocation24_spill] sm:$0xff] %v3601_v39 }
 0x154   :  { %1895 = vperm.xlu1 %2479, %v3440_v25   ;;  %v2624_v8 = vpop.eup %2623  ;;  %v535_v32 = vadd.f32 %v3533_v27, %v534_v11  ;;  %v853_v11 = vmul.f32 %v3568_v24, %v3514_v43  ;;  %vm858_vm5 = vweird.f32 %v3568_v24 }
 0x155   :  { %2486 = vset.pattern.permute.xlu0 %v3918_v60  ;;  %2478 = vset.pattern.permute.xlu2 %v3918_v60  ;;  %vm3635_vm6 = vmor %vm857_vm4, %vm858_vm5  ;;  %vm2119_vm4 = vcmask 1045509   ;;  %vm2122_vm5 = vcmask 1046534  }
 0x156   :  { %1707 = vperm.xlu0 %2486, %v3517_v40   ;;  %1703 = vperm.xlu2 %2478, %v3440_v25   ;;  %v1959_v25 = vadd.f32 %v1958_v57, %v3451_v34  ;;  %v3570_v34 = vadd.f32 1.0, %v2620_v18  ;;  %v740_v18 = vsel %vm3564_vm2, %v3488_v50, %v736_v2  ;;  %v568_v2 = vmul.f32 %v2624_v8, %v3442_v15 }
 0x157   :  { %v3538_v35 = vpop.permute.xlu2 %1499  ;;  %v3587_v30 = vpop.eup %2625  ;;  %v745_v9 = vsel %vm3581_vm3, %v744_v54, %v740_v18  ;;  %v854_v8 = vsub.f32 1.0, %v853_v11  ;;  %vm2113_vm2 = vcmask 1043459   ;;  %vm2116_vm3 = vcmask 1044484  }
 0x158   :  { %v1960_v56 = vrot.slane %v1959_v25, 2  ;;  %2629 = vrcp.f32 %v3570_v34  ;;  %v3599_v45 = vpop.eup %2627  ;;  %v1168_v0 = vpop.f32.mrf.mxu3  ;;  %v1559_v11 = vmul.f32 %v3538_v35, %v3236_v20  ;;  %vm872_vm12 = vweird.f32 %v3570_v34 }
 0x159   :  { %v3604_v17 = vpop.f32.mrf.mxu0  ;;  %v748_v54 = vmul.f32 %v3599_v45, %v3541_v16  ;;  %vm753_vm9 = vweird.f32 %v3599_v45 }
 0x15a   :  { %v1961_v49 = vadd.f32 %v1960_v56, %v1959_v25  ;;  %3941 = vst [vmem:[#allocation25_spill] sm:$0xff] %v3604_v17  ;;  %vm3669_vm10 = vmor %vm752_vm8, %vm753_vm9 }
 0x15c   :  { %2482 = vset.pattern.permute.xlu1 %v3918_v60 }
 0x15d   :  { %v1496_v29 = vpop.permute.xlu1 %1495  ;;  %1735 = vperm.xlu1 %2482, %v3431_v62  }
 0x15e   :  { %v1558_v57 = vmul.f32 %v1496_v29, %v3187_v61  ;;  %2489 = vset.pattern.permute.xlu0 %v3925_v38  ;;  %v1289_v42 = vpop.permute.xlu0 %1288  ;;  %v495_v61 = vadd.f32 %v494_v10, %v493_v4  ;;  %v1432_v29 = vrot.slane %v1431_v7, 2  ;;  %2481 = vset.pattern.permute.xlu2 %v3925_v38 }
 0x15f   :  { %v1366_v22 = vmul.f32 %v1289_v42, %v3099_v58  ;;  %1547 = vperm.xlu0 %2489, %v3562_v21   ;;  %v536_v42 = vrot.slane %v535_v32, 2  ;;  %1543 = vperm.xlu2 %2481, %v3431_v62  }
 0x160   :  { %v1574_v36 = vrot.slane %v1558_v57, 4  ;;  %v3594_v4 = vpop.permute.xlu2 %1531  ;;  %v496_v33 = vrot.slane %v495_v61, 1  ;;  %v1433_v62 = vadd.f32 %v1432_v29, %v1431_v7  ;;  %v3611_v7 = vpop.eup %2629 }
 0x161   :  { %v1382_v58 = vrot.slane %v1366_v22, 4  ;;  %v537_v12 = vadd.f32 %v536_v42, %v535_v32  ;;  %v1962_v32 = vrot.slane %v1961_v49, 1  ;;  %v3629_v20 = vmul.f32 %v3611_v7, %v3570_v34 }
 0x162   :  { %v1575_v50 = vadd.f32 %v1574_v36, %v1558_v57  ;;  %v540_v57 = vrot.slane %v3587_v30, 4  ;;  %vm873_vm13 = vweird.f32 %v3611_v7 }
 0x163   :  { %v1383_v10 = vadd.f32 %v1382_v58, %v1366_v22  ;;  %v538_v25 = vrot.slane %v537_v12, 1  ;;  %v3606_v22 = vmul.f32 %v745_v9, %v568_v2  ;;  %v3942_v58 = vmov 0   ;;  %vm3706_vm14 = vmor %vm872_vm12, %vm873_vm13 }
 0x164   :  { %v1576_v13 = vrot.slane %v1575_v50, 2  ;;  %v541_v2 = vadd.f32 %v3587_v30, %v540_v57 }
 0x165   :  { %v1384_v36 = vrot.slane %v1383_v10, 2  ;;  %v1528_v15 = vpop.permute.xlu1 %1527  ;;  %v539_v39 = vadd.f32 %v538_v25, %v537_v12  ;;  %2485 = vset.pattern.permute.xlu1 %v3925_v38  ;;  %v863_v25 = vand.u32 2147483648, %v3514_v43 }
 0x166   :  { %v1577_v56 = vadd.f32 %v1576_v13, %v1575_v50  ;;  %v1566_v14 = vmul.f32 %v1528_v15, %v1168_v0  ;;  %v497_v13 = vadd.f32 %v496_v33, %v495_v61  ;;  %v1434_v0 = vrot.slane %v1433_v62, 1  ;;  %1515 = vperm.xlu1 %2485, %v3517_v40  }
 0x167   :  { %v1385_v18 = vadd.f32 %v1384_v36, %v1383_v10  ;;  %2492 = vset.pattern.permute.xlu0 %v3942_v58  ;;  %v1688_v42 = vpop.permute.xlu0 %1687  ;;  %2484 = vset.pattern.permute.xlu2 %v3942_v58  ;;  %v855_v36 = vmul.f32 %v3568_v24, %v854_v8  ;;  %2631 = vrcp.f32 %v539_v39  ;;  %v542_v8 = vrot.slane %v541_v2, 2 }
 0x168   :  { %v1578_v29 = vrot.slane %v1577_v56, 1  ;;  %v1622_v17 = vrot.slane %v1566_v14, 4  ;;  %v1750_v44 = vmul.f32 %v1688_v42, %v3245_v19  ;;  %1318 = vperm.xlu0 %2492, %v3606_v22   ;;  %1313 = vperm.xlu2 %2484, %v3517_v40   ;;  %2633 = vrcp.f32 %v497_v13 }
 0x169   :  { %v1386_v50 = vrot.slane %v1385_v18, 1  ;;  %v3623_v33 = vpop.permute.xlu2 %1915  ;;  %v856_v15 = vadd.f32 %v3568_v24, %v855_v36 }
 0x16a   :  { %v1579_v10 = vadd.f32 %v1578_v29, %v1577_v56  ;;  %v1623_v12 = vadd.f32 %v1622_v17, %v1566_v14  ;;  %v1766_v9 = vrot.slane %v1750_v44, 4  ;;  %v749_v17 = vsub.f32 1.0, %v748_v54  ;;  %v1266_v14 = vpop.f32.mrf.mxu1 }
 0x16b   :  { %v1387_v19 = vadd.f32 %v1386_v50, %v1385_v18  ;;  %v1963_v56 = vadd.f32 %v1962_v32, %v1961_v49  ;;  %v861_v54 = vand.u32 2147483647, %v3514_v43  ;;  %v1580_v50 = vrot.slane %v1559_v11, 4 }
 0x16c   :  { %v1624_v35 = vrot.slane %v1623_v12, 2  ;;  %v1767_v61 = vadd.f32 %v1766_v9, %v1750_v44  ;;  %v1435_v44 = vadd.f32 %v1434_v0, %v1433_v62  ;;  %v860_v43 = vsel %vm3635_vm6, %v3568_v24, %v856_v15 }
 0x16d   :  { %v1670_v57 = vadd.f32 %v1579_v10, %v1387_v19  ;;  %v1217_v10 = vpop.f32.mrf.mxu0  ;;  %v864_v62 = vor.u32 1.1754944e-38, %v863_v25  ;;  %v543_v0 = vadd.f32 %v542_v8, %v541_v2  ;;  %vm3646_vm7 = vcmp.eq.f32.partialorder %v861_v54, 8.507059e+37 }
 0x16e   :  { %v1625_v39 = vadd.f32 %v1624_v35, %v1623_v12  ;;  %v1768_v18 = vrot.slane %v1767_v61, 2  ;;  %v1912_v42 = vpop.permute.xlu1 %1911  ;;  %v750_v12 = vmul.f32 %v3599_v45, %v749_v17  ;;  %v2632_v35 = vpop.eup %2631  ;;  %2487 = vset.pattern.permute.xlu1 %v3922_v28  ;;  %v758_v29 = vand.u32 2147483648, %v3541_v16 }
 0x16f   :  { %v1950_v9 = vmul.f32 %v1912_v42, %v1266_v14  ;;  %v1720_v36 = vpop.permute.xlu0 %1719  ;;  %1899 = vperm.xlu1 %2487, %v3517_v40   ;;  %v576_v25 = vmul.f32 %v2632_v35, %v3533_v27  ;;  %v2634_v8 = vpop.eup %2633  ;;  %v544_v54 = vrot.slane %v543_v0, 1  ;;  %v756_v40 = vand.u32 2147483647, %v3541_v16 }
 0x170   :  { %v1626_v19 = vrot.slane %v1625_v39, 1  ;;  %v1769_v49 = vadd.f32 %v1768_v18, %v1767_v61  ;;  %v1758_v32 = vmul.f32 %v1720_v36, %v1217_v10  ;;  %2495 = vset.pattern.permute.xlu0 %v3922_v28  ;;  %v1581_v18 = vadd.f32 %v1580_v50, %v1559_v11  ;;  %2490 = vset.pattern.permute.xlu2 %v3918_v60 }
 0x171   :  { %v2006_v31 = vrot.slane %v1950_v9, 4  ;;  %1903 = vperm.xlu0 %2495, %v3606_v22   ;;  %1739 = vperm.xlu2 %2490, %v3562_v21   ;;  %v751_v10 = vadd.f32 %v3599_v45, %v750_v12  ;;  %v869_v27 = vsub.f32 1.0, %v3629_v20  ;;  %v545_v16 = vadd.f32 %v544_v54, %v543_v0 }
 0x172   :  { %v1627_v14 = vadd.f32 %v1626_v19, %v1625_v39  ;;  %v1770_v42 = vrot.slane %v1769_v49, 1  ;;  %v1814_v13 = vrot.slane %v1758_v32, 4  ;;  %v3657_v11 = vpop.permute.xlu2 %1695  ;;  %vm757_vm11 = vcmp.eq.f32.partialorder %v756_v40, 8.507059e+37 }
 0x173   :  { %v2007_v17 = vadd.f32 %v2006_v31, %v1950_v9  ;;  %v865_v31 = vsel %vm3646_vm7, %v864_v62, %v860_v43  ;;  %v1170_v43 = vpop.f32.mrf.mxu3  ;;  %v870_v0 = vmul.f32 %v3611_v7, %v869_v27  ;;  %2635 = vrcp.f32 %v545_v16 }
 0x174   :  { %v1678_v24 = vadd.f32 %v1627_v14, %v1435_v44  ;;  %v1771_v15 = vadd.f32 %v1770_v42, %v1769_v49  ;;  %v1815_v2 = vadd.f32 %v1814_v13, %v1758_v32  ;;  %v1582_v49 = vrot.slane %v1581_v18, 2 }
 0x175   :  { %v2008_v39 = vrot.slane %v2007_v17, 2  ;;  %v3675_v12 = vmul.f32 %v865_v31, %v576_v25  ;;  %v759_v14 = vor.u32 1.1754944e-38, %v758_v29  ;;  %v1219_v40 = vpop.f32.mrf.mxu0  ;;  %v871_v27 = vadd.f32 %v3611_v7, %v870_v0 }
 0x176   :  { %v1862_v50 = vadd.f32 %v1771_v15, %v1670_v57  ;;  %v1816_v44 = vrot.slane %v1815_v2, 2  ;;  %v569_v15 = vmul.f32 %v2634_v8, %v3500_v46  ;;  %vm2125_vm6 = vcmask 1047559  }
 0x177   :  { %v2009_v9 = vadd.f32 %v2008_v39, %v2007_v17  ;;  %v1692_v36 = vpop.permute.xlu1 %1691  ;;  %2488 = vset.pattern.permute.xlu1 %v3942_v58 }
 0x178   :  { %v3673_v32 = vadd.f32 %v1963_v56, %v1862_v50  ;;  %v1817_v57 = vadd.f32 %v1816_v44, %v1815_v2  ;;  %v1294_v35 = vpop.permute.xlu0 %1293  ;;  %v1751_v20 = vmul.f32 %v1692_v36, %v3301_v52  ;;  %v755_v56 = vsel %vm3669_vm10, %v3599_v45, %v751_v10  ;;  %1353 = vperm.xlu1 %2488, %v3562_v21  }
 0x179   :  { %v1367_v62 = vmul.f32 %v1294_v35, %v3145_v55  ;;  %2498 = vset.pattern.permute.xlu0 %v3918_v60  ;;  %v2010_v42 = vrot.slane %v2009_v9, 1  ;;  %v1583_v52 = vadd.f32 %v1582_v49, %v1581_v18  ;;  %v1567_v55 = vmul.f32 %v3594_v4, %v1170_v43  ;;  %2491 = vset.pattern.permute.xlu2 %v3922_v28  ;;  %v1268_v4 = vpop.f32.mrf.mxu1 }
 0x17a   :  { %v1818_v13 = vrot.slane %v1817_v57, 1  ;;  %1743 = vperm.xlu0 %2498, %v3675_v12   ;;  %v1772_v61 = vrot.slane %v1751_v20, 4  ;;  %v3690_v45 = vpop.permute.xlu2 %1727  ;;  %v760_v31 = vsel %vm757_vm11, %v759_v14, %v755_v56  ;;  %1931 = vperm.xlu2 %2491, %v3562_v21   ;;  %v878_v50 = vand.u32 2147483648, %v3570_v34 }
 0x17b   :  { %v1388_v17 = vrot.slane %v1367_v62, 4  ;;  %v2011_v29 = vadd.f32 %v2010_v42, %v2009_v9  ;;  %v1584_v44 = vrot.slane %v1583_v52, 1  ;;  %v3700_v49 = vmul.f32 %v760_v31, %v569_v15 }
 0x17c   :  { %v1819_v2 = vadd.f32 %v1818_v13, %v1817_v57  ;;  %v1773_v25 = vadd.f32 %v1772_v61, %v1751_v20  ;;  %v1628_v35 = vrot.slane %v1567_v55, 4  ;;  %v1951_v43 = vmul.f32 %v3623_v33, %v1268_v4  ;;  %v2636_v20 = vpop.eup %2635 }
 0x17d   :  { %v1389_v39 = vadd.f32 %v1388_v17, %v1367_v62  ;;  %v879_v42 = vor.u32 1.1754944e-38, %v878_v50  ;;  %v1585_v56 = vadd.f32 %v1584_v44, %v1583_v52 }
 0x17e   :  { %v1870_v46 = vadd.f32 %v1819_v2, %v1678_v24  ;;  %v1774_v18 = vrot.slane %v1773_v25, 2  ;;  %v876_v24 = vand.u32 2147483647, %v3570_v34  ;;  %v875_v34 = vsel %vm3706_vm14, %v3611_v7, %v871_v27 }
 0x17f   :  { %v1390_v8 = vrot.slane %v1389_v39, 2  ;;  %v1724_v54 = vpop.permute.xlu1 %1723  ;;  %v1629_v15 = vadd.f32 %v1628_v35, %v1567_v55  ;;  %v2012_v2 = vrot.slane %v1951_v43, 4  ;;  %v577_v7 = vmul.f32 %v2636_v20, %v3587_v30  ;;  %v3745_v35 = vld [vmem:[%s3882_s4] ss:$0 sm:$0xff] }
 0x180   :  { %v3696_v10 = vadd.f32 %v2011_v29, %v1870_v46  ;;  %v1775_v9 = vadd.f32 %v1774_v18, %v1773_v25  ;;  %v1759_v36 = vmul.f32 %v1724_v54, %v1219_v40  ;;  %vm3717_vm15 = vcmp.eq.f32.partialorder %v876_v24, 8.507059e+37  ;;  %2494 = vset.pattern.permute.xlu1 %v3918_v60  ;;  %v1121_v18 = vpop.f32.mrf.mxu2 }
 0x181   :  { %v1391_v21 = vadd.f32 %v1390_v8, %v1389_v39  ;;  %v1884_v19 = vpop.permute.xlu0 %1883  ;;  %1711 = vperm.xlu1 %2494, %v3606_v22   ;;  %v880_v52 = vsel %vm3717_vm15, %v879_v42, %v875_v34  ;;  %v1752_v55 = vmul.f32 %v3657_v11, %v3349_v53  ;;  %v1630_v4 = vrot.slane %v1629_v15, 2  ;;  %v1222_v42 = vpop.f32.mrf.mxu0 }
 0x182   :  { %2500 = vset.pattern.permute.xlu0 %v3925_v38  ;;  %v1776_v62 = vrot.slane %v1775_v9, 1  ;;  %v1943_v16 = vmul.f32 %v1884_v19, %v3294_v48  ;;  %v1820_v61 = vrot.slane %v1759_v36, 4  ;;  %2493 = vset.pattern.permute.xlu2 %v3925_v38  ;;  %v3732_v54 = vmul.f32 %v880_v52, %v577_v7 }
 0x183   :  { %v1392_v14 = vrot.slane %v1391_v21, 1  ;;  %1523 = vperm.xlu0 %2500, %v3700_v49   ;;  %v3724_v48 = vpop.permute.xlu2 %1891  ;;  %1519 = vperm.xlu2 %2493, %v3606_v22   ;;  %v2013_v30 = vadd.f32 %v2012_v2, %v1951_v43  ;;  %v1778_v22 = vrot.slane %v1752_v55, 4  ;;  %v1631_v11 = vadd.f32 %v1630_v4, %v1629_v15 }
 0x184   :  { %v1964_v17 = vrot.slane %v1943_v16, 4  ;;  %v1777_v0 = vadd.f32 %v1776_v62, %v1775_v9  ;;  %v1821_v31 = vadd.f32 %v1820_v61, %v1759_v36 }
 0x185   :  { %v1393_v33 = vadd.f32 %v1392_v14, %v1391_v21  ;;  %v2014_v21 = vrot.slane %v2013_v30, 2  ;;  %v1779_v43 = vadd.f32 %v1778_v22, %v1752_v55 }
 0x186   :  { %v1965_v39 = vadd.f32 %v1964_v17, %v1943_v16  ;;  %v1822_v40 = vrot.slane %v1821_v31, 2  ;;  %v1632_v16 = vrot.slane %v1631_v11, 1  ;;  %v2074_v17 = vadd.f32 %v3745_v35, %v3673_v32 }
 0x187   :  { %v1671_v25 = vadd.f32 %v1585_v56, %v1393_v33  ;;  %v2015_v13 = vadd.f32 %v2014_v21, %v2013_v30  ;;  %v1780_v15 = vrot.slane %v1779_v43, 2 }
 0x188   :  { %v1966_v46 = vrot.slane %v1965_v39, 2  ;;  %v1299_v24 = vpop.permute.xlu1 %1298  ;;  %v1633_v55 = vadd.f32 %v1632_v16, %v1631_v11 }
 0x189   :  { %v1863_v29 = vadd.f32 %v1777_v0, %v1671_v25  ;;  %v1368_v9 = vmul.f32 %v1299_v24, %v3198_v51  ;;  %2497 = vset.pattern.permute.xlu1 %v3925_v38  ;;  %v1823_v51 = vadd.f32 %v1822_v40, %v1821_v31  ;;  %v1760_v0 = vmul.f32 %v3690_v45, %v1222_v42  ;;  %v1124_v42 = vpop.f32.mrf.mxu2 }
 0x18a   :  { %v1334_v8 = vpop.permute.xlu0 %1333  ;;  %v1967_v50 = vadd.f32 %v1966_v46, %v1965_v39  ;;  %1551 = vperm.xlu1 %2497, %v3675_v12   ;;  %v2016_v46 = vrot.slane %v2015_v13, 1 }
 0x18b   :  { %v1375_v44 = vmul.f32 %v1334_v8, %v1121_v18  ;;  %2502 = vset.pattern.permute.xlu0 %v3942_v58  ;;  %2496 = vset.pattern.permute.xlu2 %v3942_v58  ;;  %v1394_v20 = vrot.slane %v1368_v9, 4  ;;  %v1824_v25 = vrot.slane %v1823_v51, 1 }
 0x18c   :  { %1363 = vperm.xlu0 %2502, %v3732_v54   ;;  %v1968_v27 = vrot.slane %v1967_v50, 1  ;;  %v3740_v57 = vpop.permute.xlu2 %1343  ;;  %1358 = vperm.xlu2 %2496, %v3675_v12  }
 0x18d   :  { %v1436_v53 = vrot.slane %v1375_v44, 4  ;;  %v1395_v34 = vadd.f32 %v1394_v20, %v1368_v9 }
 0x18e   :  { %v1969_v36 = vadd.f32 %v1968_v27, %v1967_v50  ;;  %v1826_v50 = vrot.slane %v1760_v0, 4  ;;  %v1173_v27 = vpop.f32.mrf.mxu3 }
 0x18f   :  { %v1437_v19 = vadd.f32 %v1436_v53, %v1375_v44  ;;  %v1396_v2 = vrot.slane %v1395_v34, 2  ;;  %v1825_v44 = vadd.f32 %v1824_v25, %v1823_v51  ;;  %v2082_v51 = vadd.f32 %v3745_v35, %v3696_v10 }
 0x190   :  { %v2055_v62 = vadd.f32 %v1969_v36, %v1863_v29 }
 0x191   :  { %v1438_v14 = vrot.slane %v1437_v19, 2  ;;  %v1888_v31 = vpop.permute.xlu1 %1887  ;;  %v1397_v8 = vadd.f32 %v1396_v2, %v1395_v34 }
 0x192   :  { %v2075_v56 = vadd.f32 %v3745_v35, %v2055_v62  ;;  %v1944_v18 = vmul.f32 %v1888_v31, %v3344_v59  ;;  %2499 = vset.pattern.permute.xlu1 %v3942_v58  ;;  %v2017_v59 = vadd.f32 %v2016_v46, %v2015_v13 }
 0x193   :  { %v1439_v33 = vadd.f32 %v1438_v14, %v1437_v19  ;;  %v1504_v61 = vpop.permute.xlu0 %1503  ;;  %1323 = vperm.xlu1 %2499, %v3700_v49   ;;  %v1398_v9 = vrot.slane %v1397_v8, 1 }
 0x194   :  { %v1560_v7 = vmul.f32 %v1504_v61, %v3292_v6  ;;  %2507 = vset.pattern.permute.xlu0 %v3922_v28  ;;  %v2106_v39 = vrot.slane %v2075_v56, 7  ;;  %v1781_v6 = vadd.f32 %v1780_v15, %v1779_v43  ;;  %2501 = vset.pattern.permute.xlu2 %v3918_v60  ;;  %v1970_v40 = vrot.slane %v1944_v18, 4 }
 0x195   :  { %v1440_v52 = vrot.slane %v1439_v33, 1  ;;  %1939 = vperm.xlu0 %2507, %v3732_v54   ;;  %v3762_v30 = vpop.permute.xlu2 %1923  ;;  %1715 = vperm.xlu2 %2501, %v3700_v49   ;;  %v1827_v43 = vadd.f32 %v1826_v50, %v1760_v0 }
 0x196   :  { %v1586_v29 = vrot.slane %v1560_v7, 4  ;;  %v3756_v4 = vsel %vm2107_vm0, %v2106_v39, %v2074_v17  ;;  %v1971_v58 = vadd.f32 %v1970_v40, %v1944_v18  ;;  %v1782_v19 = vrot.slane %v1781_v6, 1 }
 0x197   :  { %v1441_v32 = vadd.f32 %v1440_v52, %v1439_v33  ;;  %v1399_v33 = vadd.f32 %v1398_v9, %v1397_v8 }
 0x198   :  { %v1587_v45 = vadd.f32 %v1586_v29, %v1560_v7  ;;  %v1972_v62 = vrot.slane %v1971_v58, 2  ;;  %v1783_v2 = vadd.f32 %v1782_v19, %v1781_v6  ;;  %v1828_v7 = vrot.slane %v1827_v43, 2 }
 0x199   :  { %v1679_v22 = vadd.f32 %v1633_v55, %v1441_v32 }
 0x19a   :  { %v1588_v24 = vrot.slane %v1587_v45, 2  ;;  %v1973_v56 = vadd.f32 %v1972_v62, %v1971_v58  ;;  %v1339_v13 = vpop.permute.xlu1 %1338  ;;  %v1126_v62 = vpop.f32.mrf.mxu2 }
 0x19b   :  { %v1871_v53 = vadd.f32 %v1825_v44, %v1679_v22  ;;  %v1536_v11 = vpop.permute.xlu0 %1535  ;;  %v1376_v17 = vmul.f32 %v1339_v13, %v1124_v42  ;;  %2504 = vset.pattern.permute.xlu1 %v3918_v60  ;;  %v1271_v60 = vpop.f32.mrf.mxu1 }
 0x19c   :  { %v1589_v21 = vadd.f32 %v1588_v24, %v1587_v45  ;;  %v1568_v36 = vmul.f32 %v1536_v11, %v1173_v27  ;;  %v1974_v25 = vrot.slane %v1973_v56, 1  ;;  %1747 = vperm.xlu1 %2504, %v3732_v54   ;;  %v1829_v45 = vadd.f32 %v1828_v7, %v1827_v43 }
 0x19d   :  { %v2063_v20 = vadd.f32 %v2017_v59, %v1871_v53  ;;  %2503 = vset.pattern.permute.xlu2 %v3925_v38  ;;  %v1442_v52 = vrot.slane %v1376_v17, 4 }
 0x19e   :  { %v1590_v14 = vrot.slane %v1589_v21, 1  ;;  %v1634_v16 = vrot.slane %v1568_v36, 4  ;;  %v1309_v10 = vpop.permute.xlu2 %1308  ;;  %1555 = vperm.xlu2 %2503, %v3732_v54   ;;  %v1975_v29 = vadd.f32 %v1974_v25, %v1973_v56  ;;  %v1830_v58 = vrot.slane %v1829_v45, 1 }
 0x19f   :  { %v2083_v34 = vadd.f32 %v3745_v35, %v2063_v20  ;;  %v1370_v31 = vmul.f32 %v1309_v10, %v3308_v23  ;;  %v1443_v18 = vadd.f32 %v1442_v52, %v1376_v17 }
 0x1a0   :  { %v1591_v61 = vadd.f32 %v1590_v14, %v1589_v21  ;;  %v1635_v15 = vadd.f32 %v1634_v16, %v1568_v36  ;;  %v1831_v56 = vadd.f32 %v1830_v58, %v1829_v45 }
 0x1a1   :  { %v2127_v0 = vrot.slane %v2083_v34, 7  ;;  %v1406_v8 = vrot.slane %v1370_v31, 4  ;;  %v1444_v22 = vrot.slane %v1443_v18, 2 }
 0x1a2   :  { %v1672_v39 = vadd.f32 %v1591_v61, %v1399_v33  ;;  %v1636_v55 = vrot.slane %v1635_v15, 2  ;;  %v1304_v24 = vpop.permute.xlu1 %1303  ;;  %v1945_v61 = vmul.f32 %v3724_v48, %v3392_v3  ;;  %v1129_v48 = vpop.f32.mrf.mxu2 }
 0x1a3   :  { %v3774_v46 = vsel %vm2107_vm0, %v2127_v0, %v2082_v51  ;;  %v1407_v27 = vadd.f32 %v1406_v8, %v1370_v31  ;;  %v1445_v59 = vadd.f32 %v1444_v22, %v1443_v18  ;;  %v1369_v23 = vmul.f32 %v1304_v24, %v3251_v1 }
 0x1a4   :  { %v1864_v32 = vadd.f32 %v1783_v2, %v1672_v39  ;;  %v1637_v6 = vadd.f32 %v1636_v55, %v1635_v15  ;;  %v1920_v38 = vpop.permute.xlu0 %1919  ;;  %2505 = vset.pattern.permute.xlu1 %v3922_v28  ;;  %v3785_v2 = vpop.f32.mrf.mxu3 }
 0x1a5   :  { %v1952_v50 = vmul.f32 %v1920_v38, %v1271_v60  ;;  %v1446_v11 = vrot.slane %v1445_v59, 1  ;;  %v1408_v21 = vrot.slane %v1407_v27, 2  ;;  %1935 = vperm.xlu1 %2505, %v3675_v12   ;;  %v1400_v19 = vrot.slane %v1369_v23, 4  ;;  %v1224_v38 = vpop.f32.mrf.mxu0 }
 0x1a6   :  { %v2056_v44 = vadd.f32 %v1975_v29, %v1864_v32  ;;  %v1638_v40 = vrot.slane %v1637_v6, 1  ;;  %2506 = vset.pattern.permute.xlu2 %v3922_v28  ;;  %v1976_v29 = vrot.slane %v1945_v61, 4 }
 0x1a7   :  { %v2018_v54 = vrot.slane %v1952_v50, 4  ;;  %v1512_v36 = vpop.permute.xlu2 %1511  ;;  %1907 = vperm.xlu2 %2506, %v3700_v49   ;;  %v1447_v14 = vadd.f32 %v1446_v11, %v1445_v59  ;;  %v1401_v16 = vadd.f32 %v1400_v19, %v1369_v23  ;;  %v1409_v28 = vadd.f32 %v1408_v21, %v1407_v27 }
 0x1a8   :  { %v1639_v9 = vadd.f32 %v1638_v40, %v1637_v6  ;;  %v1562_v20 = vmul.f32 %v1512_v36, %v3390_v41  ;;  %v2076_v1 = vadd.f32 %v3745_v35, %v2056_v44 }
 0x1a9   :  { %v2019_v53 = vadd.f32 %v2018_v54, %v1952_v50  ;;  %v1402_v49 = vrot.slane %v1401_v16, 2  ;;  %v1410_v10 = vrot.slane %v1409_v28, 1  ;;  %v1273_v54 = vpop.f32.mrf.mxu1 }
 0x1aa   :  { %v1598_v42 = vrot.slane %v1562_v20, 4  ;;  %v1680_v13 = vadd.f32 %v1639_v9, %v1447_v14  ;;  %v2109_v17 = vrot.slane %v2076_v1, 6 }
 0x1ab   :  { %v2020_v43 = vrot.slane %v2019_v53, 2  ;;  %v1508_v41 = vpop.permute.xlu1 %1507  ;;  %v1403_v60 = vadd.f32 %v1402_v49, %v1401_v16  ;;  %v1411_v45 = vadd.f32 %v1410_v10, %v1409_v28 }
 0x1ac   :  { %v1599_v12 = vadd.f32 %v1598_v42, %v1562_v20  ;;  %v1872_v15 = vadd.f32 %v1831_v56, %v1680_v13  ;;  %v1561_v25 = vmul.f32 %v1508_v41, %v3342_v37  ;;  %v3791_v32 = vsel %vm2110_vm1, %v2109_v17, %v3756_v4 }
 0x1ad   :  { %v2021_v51 = vadd.f32 %v2020_v43, %v2019_v53  ;;  %v1732_v34 = vpop.permute.xlu0 %1731  ;;  %v1377_v37 = vmul.f32 %v3740_v57, %v1126_v62  ;;  %v1404_v59 = vrot.slane %v1403_v60, 1  ;;  %v1178_v43 = vpop.f32.mrf.mxu3  ;;  %v1953_v20 = vmul.f32 %v3762_v30, %v1273_v54 }
 0x1ae   :  { %v1600_v0 = vrot.slane %v1599_v12, 2  ;;  %v1592_v55 = vrot.slane %v1561_v25, 4  ;;  %v1761_v23 = vmul.f32 %v1732_v34, %v1224_v38 }
 0x1af   :  { %v2022_v33 = vrot.slane %v2021_v51, 1  ;;  %v1448_v21 = vrot.slane %v1377_v37, 4  ;;  %v2024_v17 = vrot.slane %v1953_v20, 4 }
 0x1b0   :  { %v1601_v52 = vadd.f32 %v1600_v0, %v1599_v12  ;;  %v1704_v31 = vpop.permute.xlu2 %1703  ;;  %v1593_v8 = vadd.f32 %v1592_v55, %v1561_v25  ;;  %v1832_v16 = vrot.slane %v1761_v23, 4 }
 0x1b1   :  { %v2023_v7 = vadd.f32 %v2022_v33, %v2021_v51  ;;  %v1754_v3 = vmul.f32 %v1704_v31, %v3460_v47  ;;  %v1977_v47 = vadd.f32 %v1976_v29, %v1945_v61  ;;  %v1449_v33 = vadd.f32 %v1448_v21, %v1377_v37  ;;  %v1276_v54 = vpop.f32.mrf.mxu1 }
 0x1b2   :  { %v1602_v6 = vrot.slane %v1601_v52, 1  ;;  %v1594_v27 = vrot.slane %v1593_v8, 2  ;;  %v1833_v0 = vadd.f32 %v1832_v16, %v1761_v23  ;;  %v2025_v29 = vadd.f32 %v2024_v17, %v1953_v20 }
 0x1b3   :  { %v2064_v39 = vadd.f32 %v2023_v7, %v1872_v15  ;;  %v1790_v50 = vrot.slane %v1754_v3, 4  ;;  %v1978_v14 = vrot.slane %v1977_v47, 2 }
 0x1b4   :  { %v1603_v40 = vadd.f32 %v1602_v6, %v1601_v52  ;;  %v1595_v11 = vadd.f32 %v1594_v27, %v1593_v8  ;;  %v1700_v9 = vpop.permute.xlu1 %1699  ;;  %v1834_v6 = vrot.slane %v1833_v0, 2 }
 0x1b5   :  { %v2084_v18 = vadd.f32 %v3745_v35, %v2064_v39  ;;  %v1791_v4 = vadd.f32 %v1790_v50, %v1754_v3  ;;  %v1753_v19 = vmul.f32 %v1700_v9, %v3413_v26  ;;  %v1979_v41 = vadd.f32 %v1978_v14, %v1977_v47 }
 0x1b6   :  { %v1349_v44 = vpop.permute.xlu0 %1348  ;;  %v1674_v58 = vadd.f32 %v1603_v40, %v1411_v45  ;;  %v1596_v62 = vrot.slane %v1595_v11, 1  ;;  %v1450_v39 = vrot.slane %v1449_v33, 2  ;;  %v1835_v23 = vadd.f32 %v1834_v6, %v1833_v0 }
 0x1b7   :  { %v2129_v22 = vrot.slane %v2084_v18, 6  ;;  %v1378_v24 = vmul.f32 %v1349_v44, %v1129_v48  ;;  %v1792_v36 = vrot.slane %v1791_v4, 2  ;;  %v1784_v42 = vrot.slane %v1753_v19, 4 }
 0x1b8   :  { %v1597_v56 = vadd.f32 %v1596_v62, %v1595_v11  ;;  %v1980_v48 = vrot.slane %v1979_v41, 1  ;;  %v1451_v50 = vadd.f32 %v1450_v39, %v1449_v33 }
 0x1b9   :  { %v3797_v53 = vsel %vm2110_vm1, %v2129_v22, %v3774_v46  ;;  %v1454_v57 = vrot.slane %v1378_v24, 4  ;;  %v1793_v51 = vadd.f32 %v1792_v36, %v1791_v4  ;;  %v1544_v34 = vpop.permute.xlu2 %1543  ;;  %v1405_v46 = vadd.f32 %v1404_v59, %v1403_v60 }
 0x1ba   :  { %v1570_v28 = vmul.f32 %v1544_v34, %v1178_v43  ;;  %v1785_v61 = vadd.f32 %v1784_v42, %v1753_v19  ;;  %v2026_v22 = vrot.slane %v2025_v29, 2  ;;  %v1452_v11 = vrot.slane %v1451_v50, 1 }
 0x1bb   :  { %v1455_v1 = vadd.f32 %v1454_v57, %v1378_v24  ;;  %v1794_v12 = vrot.slane %v1793_v51, 1  ;;  %v1673_v49 = vadd.f32 %v1597_v56, %v1405_v46  ;;  %v1981_v24 = vadd.f32 %v1980_v48, %v1979_v41  ;;  %v1227_v41 = vpop.f32.mrf.mxu0 }
 0x1bc   :  { %v1646_v26 = vrot.slane %v1570_v28, 4  ;;  %v1786_v7 = vrot.slane %v1785_v61, 2  ;;  %v2027_v57 = vadd.f32 %v2026_v22, %v2025_v29 }
 0x1bd   :  { %v1456_v13 = vrot.slane %v1455_v1, 2  ;;  %v1795_v30 = vadd.f32 %v1794_v12, %v1793_v51  ;;  %v1540_v31 = vpop.permute.xlu1 %1539  ;;  %v1453_v51 = vadd.f32 %v1452_v11, %v1451_v50 }
 0x1be   :  { %v1647_v10 = vadd.f32 %v1646_v26, %v1570_v28  ;;  %v1787_v55 = vadd.f32 %v1786_v7, %v1785_v61  ;;  %v1569_v3 = vmul.f32 %v1540_v31, %v3785_v2  ;;  %v2028_v42 = vrot.slane %v2027_v57, 1 }
 0x1bf   :  { %v1928_v15 = vpop.permute.xlu0 %1927  ;;  %v1457_v25 = vadd.f32 %v1456_v13, %v1455_v1  ;;  %v3801_v52 = vadd.f32 %v1795_v30, %v1674_v58  ;;  %v1836_v1 = vrot.slane %v1835_v23, 1 }
 0x1c0   :  { %v1648_v60 = vrot.slane %v1647_v10, 2  ;;  %v1788_v18 = vrot.slane %v1787_v55, 1  ;;  %v1640_v37 = vrot.slane %v1569_v3, 4  ;;  %v1954_v19 = vmul.f32 %v1928_v15, %v1276_v54 }
 0x1c1   :  { %v1458_v8 = vrot.slane %v1457_v25, 1  ;;  %v1837_v33 = vadd.f32 %v1836_v1, %v1835_v23 }
 0x1c2   :  { %v1649_v38 = vadd.f32 %v1648_v60, %v1647_v10  ;;  %v3804_v45 = vpop.permute.xlu2 %1313  ;;  %v1789_v44 = vadd.f32 %v1788_v18, %v1787_v55  ;;  %v1641_v27 = vadd.f32 %v1640_v37, %v1569_v3  ;;  %v2030_v46 = vrot.slane %v1954_v19, 4 }
 0x1c3   :  { %v1459_v2 = vadd.f32 %v1458_v8, %v1457_v25 }
 0x1c4   :  { %v1650_v40 = vrot.slane %v1649_v38, 1  ;;  %v1865_v47 = vadd.f32 %v1789_v44, %v1673_v49  ;;  %v1642_v58 = vrot.slane %v1641_v27, 2  ;;  %v2029_v49 = vadd.f32 %v2028_v42, %v2027_v57 }
 0x1c5   :  { %v2031_v15 = vadd.f32 %v2030_v46, %v1954_v19  ;;  %v3953_v19 = vld [vmem:[#allocation20_spill] sm:$0xff] }
 0x1c6   :  { %v1651_v4 = vadd.f32 %v1650_v40, %v1649_v38  ;;  %v2057_v9 = vadd.f32 %v1981_v24, %v1865_v47  ;;  %v1643_v36 = vadd.f32 %v1642_v58, %v1641_v27  ;;  %v1896_v43 = vpop.permute.xlu1 %1895 }
 0x1c7   :  { %v1946_v62 = vmul.f32 %v1896_v43, %v3446_v5  ;;  %v2032_v55 = vrot.slane %v2031_v15, 2 }
 0x1c8   :  { %v3806_v59 = vpop.permute.xlu0 %1707  ;;  %v1682_v21 = vadd.f32 %v1651_v4, %v1459_v2  ;;  %v2077_v20 = vadd.f32 %v3745_v35, %v2057_v9  ;;  %v1644_v14 = vrot.slane %v1643_v36, 1  ;;  %v1229_v9 = vpop.f32.mrf.mxu0 }
 0x1c9   :  { %v1982_v16 = vrot.slane %v1946_v62, 4  ;;  %v2033_v8 = vadd.f32 %v2032_v55, %v2031_v15  ;;  %v1755_v43 = vmul.f32 %v3806_v59, %v3953_v19 }
 0x1ca   :  { %v1645_v34 = vadd.f32 %v1644_v14, %v1643_v36  ;;  %v2112_v13 = vrot.slane %v2077_v20, 5 }
 0x1cb   :  { %v1740_v56 = vpop.permute.xlu2 %1739  ;;  %v1983_v28 = vadd.f32 %v1982_v16, %v1946_v62  ;;  %v2034_v22 = vrot.slane %v2033_v8, 1  ;;  %v3954_v62 = vld [vmem:[#allocation16_spill] sm:$0xff]  ;;  %v1796_v46 = vrot.slane %v1755_v43, 4 }
 0x1cc   :  { %v1681_v12 = vadd.f32 %v1645_v34, %v1453_v51  ;;  %v2114_v7 = vsel %vm2113_vm2, %v2112_v13, %v3791_v32  ;;  %v1763_v20 = vmul.f32 %v1740_v56, %v1229_v9  ;;  %v3955_v13 = vld [vmem:[#allocation15_spill] sm:$0xff]  ;;  %v3956_v56 = vld [vmem:[#allocation18_spill] sm:$0xff] }
 0x1cd   :  { %v1984_v17 = vrot.slane %v1983_v28, 2  ;;  %v2035_v54 = vadd.f32 %v2034_v22, %v2033_v8 }
 0x1ce   :  { %v1873_v26 = vadd.f32 %v1837_v33, %v1681_v12  ;;  %v1131_v33 = vpop.f32.mrf.mxu2 }
 0x1cf   :  { %v1985_v5 = vadd.f32 %v1984_v17, %v1983_v28  ;;  %v1736_v30 = vpop.permute.xlu1 %1735 }
 0x1d0   :  { %v2065_v0 = vadd.f32 %v2029_v49, %v1873_v26  ;;  %v1762_v25 = vmul.f32 %v1736_v30, %v1227_v41  ;;  %v1797_v26 = vadd.f32 %v1796_v46, %v1755_v43  ;;  %v1278_v41 = vpop.f32.mrf.mxu1  ;;  %v3960_v43 = vld [vmem:[#allocation21_spill] sm:$0xff] }
 0x1d1   :  { %v1548_v61 = vpop.permute.xlu0 %1547  ;;  %v1986_v10 = vrot.slane %v1985_v5, 1 }
 0x1d2   :  { %v2085_v39 = vadd.f32 %v3745_v35, %v2065_v0  ;;  %v1838_v31 = vrot.slane %v1762_v25, 4 }
 0x1d3   :  { %v1987_v29 = vadd.f32 %v1986_v10, %v1985_v5 }
 0x1d4   :  { %v1932_v60 = vpop.permute.xlu2 %1931  ;;  %v1839_v3 = vadd.f32 %v1838_v31, %v1762_v25  ;;  %v2131_v48 = vrot.slane %v2085_v39, 5  ;;  %v1798_v39 = vrot.slane %v1797_v26, 2  ;;  %v3957_v31 = vld [vmem:[#allocation19_spill] sm:$0xff] }
 0x1d5   :  { %v2058_v18 = vadd.f32 %v1987_v29, %v3801_v52 }
 0x1d6   :  { %v1840_v38 = vrot.slane %v1839_v3, 2  ;;  %v2132_v44 = vsel %vm2113_vm2, %v2131_v48, %v3797_v53  ;;  %v1371_v53 = vmul.f32 %v3804_v45, %v3356_v63  ;;  %v1844_v63 = vrot.slane %v1763_v20, 4 }
 0x1d7   :  { %v2078_v37 = vadd.f32 %v3745_v35, %v2058_v18 }
 0x1d8   :  { %v1841_v50 = vadd.f32 %v1840_v38, %v1839_v3  ;;  %v1516_v32 = vpop.permute.xlu1 %1515  ;;  %v1412_v16 = vrot.slane %v1371_v53, 4  ;;  %v1845_v15 = vadd.f32 %v1844_v63, %v1763_v20  ;;  %v3959_v38 = vld [vmem:[#allocation23_spill] sm:$0xff] }
 0x1d9   :  { %v2115_v40 = vrot.slane %v2078_v37, 4  ;;  %v1563_v1 = vmul.f32 %v1516_v32, %v3954_v62 }
 0x1da   :  { %v1319_v6 = vpop.permute.xlu0 %1318  ;;  %v1842_v27 = vrot.slane %v1841_v50, 1  ;;  %v1413_v12 = vadd.f32 %v1412_v16, %v1371_v53  ;;  %v1846_v55 = vrot.slane %v1845_v15, 2 }
 0x1db   :  { %v3818_v52 = vsel %vm2116_vm3, %v2115_v40, %v2114_v7  ;;  %v1604_v45 = vrot.slane %v1563_v1, 4  ;;  %v1372_v28 = vmul.f32 %v1319_v6, %v3955_v13  ;;  %v3958_v6 = vld [vmem:[#allocation22_spill] sm:$0xff]  ;;  %v1134_v40 = vpop.f32.mrf.mxu2  ;;  %v3961_v13 = vld [vmem:[#allocation25_spill] sm:$0xff] }
 0x1dc   :  { %v1843_v24 = vadd.f32 %v1842_v27, %v1841_v50  ;;  %v1414_v7 = vrot.slane %v1413_v12, 2 }
 0x1dd   :  { %v1520_v47 = vpop.permute.xlu2 %1519  ;;  %v1605_v5 = vadd.f32 %v1604_v45, %v1563_v1  ;;  %v1418_v30 = vrot.slane %v1372_v28, 4 }
 0x1de   :  { %v1874_v23 = vadd.f32 %v1843_v24, %v1682_v21  ;;  %v1180_v21 = vpop.f32.mrf.mxu3  ;;  %v1564_v17 = vmul.f32 %v1520_v47, %v3956_v56  ;;  %v1415_v50 = vadd.f32 %v1414_v7, %v1413_v12  ;;  %v1799_v24 = vadd.f32 %v1798_v39, %v1797_v26 }
 0x1df   :  { %v1571_v42 = vmul.f32 %v1548_v61, %v1180_v21  ;;  %v1955_v61 = vmul.f32 %v1932_v60, %v1278_v41  ;;  %v1606_v48 = vrot.slane %v1605_v5, 2  ;;  %v1419_v18 = vadd.f32 %v1418_v30, %v1372_v28 }
 0x1e0   :  { %v2066_v4 = vadd.f32 %v2035_v54, %v1874_v23  ;;  %v1610_v25 = vrot.slane %v1564_v17, 4  ;;  %v1847_v47 = vadd.f32 %v1846_v55, %v1845_v15  ;;  %v1416_v9 = vrot.slane %v1415_v50, 1 }
 0x1e1   :  { %v1900_v58 = vpop.permute.xlu1 %1899  ;;  %v1652_v59 = vrot.slane %v1571_v42, 4  ;;  %v1800_v21 = vrot.slane %v1799_v24, 1 }
 0x1e2   :  { %v2086_v11 = vadd.f32 %v3745_v35, %v2066_v4  ;;  %v1947_v29 = vmul.f32 %v1900_v58, %v3957_v31  ;;  %v1611_v22 = vadd.f32 %v1610_v25, %v1564_v17  ;;  %v1607_v4 = vadd.f32 %v1606_v48, %v1605_v5  ;;  %v3962_v48 = vld [vmem:[#allocation24_spill] sm:$0xff] }
 0x1e3   :  { %v1904_v2 = vpop.permute.xlu0 %1903  ;;  %v1653_v0 = vadd.f32 %v1652_v59, %v1571_v42  ;;  %v1420_v58 = vrot.slane %v1419_v18, 2  ;;  %v1848_v62 = vrot.slane %v1847_v47, 1  ;;  %v3839_v42 = vpop.f32.mrf.mxu1  ;;  %v1417_v56 = vadd.f32 %v1416_v9, %v1415_v50 }
 0x1e4   :  { %v2133_v57 = vrot.slane %v2086_v11, 4  ;;  %v1948_v8 = vmul.f32 %v1904_v2, %v3958_v6  ;;  %v1988_v54 = vrot.slane %v1947_v29, 4  ;;  %v1612_v19 = vrot.slane %v1611_v22, 2  ;;  %v1136_v30 = vpop.f32.mrf.mxu2 }
 0x1e5   :  { %v1654_v32 = vrot.slane %v1653_v0, 2  ;;  %v1608_v46 = vrot.slane %v1607_v4, 1  ;;  %v1421_v63 = vadd.f32 %v1420_v58, %v1419_v18  ;;  %v1801_v7 = vadd.f32 %v1800_v21, %v1799_v24 }
 0x1e6   :  { %v3823_v36 = vpop.permute.xlu2 %1358  ;;  %v3831_v51 = vsel %vm2116_vm3, %v2133_v57, %v2132_v44  ;;  %v2036_v44 = vrot.slane %v1955_v61, 4  ;;  %v1183_v27 = vpop.f32.mrf.mxu3  ;;  %v1994_v11 = vrot.slane %v1948_v8, 4  ;;  %v1989_v1 = vadd.f32 %v1988_v54, %v1947_v29 }
 0x1e7   :  { %v1655_v57 = vadd.f32 %v1654_v32, %v1653_v0  ;;  %v1613_v41 = vadd.f32 %v1612_v19, %v1611_v22  ;;  %v3842_v0 = vadd.f32 %v1848_v62, %v1847_v47  ;;  %v1422_v25 = vrot.slane %v1421_v63, 1  ;;  %v3963_v19 = vld [vmem:[#allocation17_spill] sm:$0xff] }
 0x1e8   :  { %v2037_v2 = vadd.f32 %v2036_v44, %v1955_v61  ;;  %v1995_v45 = vadd.f32 %v1994_v11, %v1948_v8  ;;  %v1609_v61 = vadd.f32 %v1608_v46, %v1607_v4  ;;  %v1380_v31 = vmul.f32 %v3823_v36, %v1134_v40  ;;  %v1232_v44 = vpop.f32.mrf.mxu0 }
 0x1e9   :  { %v1656_v26 = vrot.slane %v1655_v57, 1  ;;  %v1423_v47 = vadd.f32 %v1422_v25, %v1421_v63 }
 0x1ea   :  { %v1354_v34 = vpop.permute.xlu1 %1353  ;;  %v2038_v15 = vrot.slane %v2037_v2, 2  ;;  %v1675_v24 = vadd.f32 %v1609_v61, %v1417_v56  ;;  %v1466_v40 = vrot.slane %v1380_v31, 4 }
 0x1eb   :  { %v1379_v16 = vmul.f32 %v1354_v34, %v1131_v33  ;;  %v1990_v34 = vrot.slane %v1989_v1, 2  ;;  %v3846_v6 = vadd.f32 %v1656_v26, %v1655_v57 }
 0x1ec   :  { %v3828_v14 = vpop.permute.xlu0 %1743  ;;  %v3848_v8 = vadd.f32 %v2038_v15, %v2037_v2  ;;  %v1867_v46 = vadd.f32 %v1801_v7, %v1675_v24  ;;  %v1467_v56 = vadd.f32 %v1466_v40, %v1380_v31 }
 0x1ed   :  { %v1460_v33 = vrot.slane %v1379_v16, 4  ;;  %v1991_v50 = vadd.f32 %v1990_v34, %v1989_v1 }
 0x1ee   :  { %v1185_v55 = vpop.f32.mrf.mxu3 }
 0x1ef   :  { %v1716_v49 = vpop.permute.xlu2 %1715  ;;  %v1461_v32 = vadd.f32 %v1460_v33, %v1379_v16 }
 0x1f0   :  { %v1757_v28 = vmul.f32 %v1716_v49, %v3961_v13  ;;  %v1234_v7 = vpop.f32.mrf.mxu0 }
 0x1f1   :  { %v1462_v1 = vrot.slane %v1461_v32, 2 }
 0x1f2   :  { %v1808_v39 = vrot.slane %v1757_v28, 4 }
 0x1f3   :  { %v1712_v3 = vpop.permute.xlu1 %1711 }
 0x1f4   :  { %v1756_v37 = vmul.f32 %v1712_v3, %v3959_v38  ;;  %v1614_v38 = vrot.slane %v1613_v41, 1  ;;  %v1809_v54 = vadd.f32 %v1808_v39, %v1757_v28 }
 0x1f5   :  { %v1524_v10 = vpop.permute.xlu0 %1523 }
 0x1f6   :  { %v1802_v60 = vrot.slane %v1756_v37, 4  ;;  %v1565_v20 = vmul.f32 %v1524_v10, %v3960_v43  ;;  %v1996_v10 = vrot.slane %v1995_v45, 2  ;;  %v1615_v62 = vadd.f32 %v1614_v38, %v1613_v41 }
 0x1f7   :  { %v1810_v63 = vrot.slane %v1809_v54, 2 }
 0x1f8   :  { %v1556_v23 = vpop.permute.xlu2 %1555  ;;  %v1803_v53 = vadd.f32 %v1802_v60, %v1756_v37  ;;  %v1616_v5 = vrot.slane %v1565_v20, 4  ;;  %v1997_v36 = vadd.f32 %v1996_v10, %v1995_v45  ;;  %v1676_v15 = vadd.f32 %v1615_v62, %v1423_v47 }
 0x1f9   :  { %v1573_v22 = vmul.f32 %v1556_v23, %v1185_v55  ;;  %v1992_v23 = vrot.slane %v1991_v50, 1  ;;  %v1811_v33 = vadd.f32 %v1810_v63, %v1809_v54 }
 0x1fa   :  { %v1804_v17 = vrot.slane %v1803_v53, 2  ;;  %v1617_v37 = vadd.f32 %v1616_v5, %v1565_v20  ;;  %v1283_v20 = vpop.f32.mrf.mxu1  ;;  %v1998_v13 = vrot.slane %v1997_v36, 1 }
 0x1fb   :  { %v1664_v16 = vrot.slane %v1573_v22, 4  ;;  %v1993_v5 = vadd.f32 %v1992_v23, %v1991_v50 }
 0x1fc   :  { %v1552_v12 = vpop.permute.xlu1 %1551  ;;  %v1805_v29 = vadd.f32 %v1804_v17, %v1803_v53  ;;  %v1764_v53 = vmul.f32 %v3828_v14, %v1232_v44  ;;  %v1618_v57 = vrot.slane %v1617_v37, 2  ;;  %v1999_v10 = vadd.f32 %v1998_v13, %v1997_v36 }
 0x1fd   :  { %v1572_v4 = vmul.f32 %v1552_v12, %v1183_v27  ;;  %v1665_v34 = vadd.f32 %v1664_v16, %v1573_v22  ;;  %v2059_v38 = vadd.f32 %v1993_v5, %v1867_v46  ;;  %v1812_v22 = vrot.slane %v1811_v33, 1 }
 0x1fe   :  { %v1364_v59 = vpop.permute.xlu0 %1363  ;;  %v1806_v58 = vrot.slane %v1805_v29, 1  ;;  %v1619_v14 = vadd.f32 %v1618_v57, %v1617_v37  ;;  %v1850_v41 = vrot.slane %v1764_v53, 4 }
 0x1ff   :  { %v1381_v3 = vmul.f32 %v1364_v59, %v1136_v30  ;;  %v1658_v27 = vrot.slane %v1572_v4, 4  ;;  %v1463_v30 = vadd.f32 %v1462_v1, %v1461_v32  ;;  %v1666_v44 = vrot.slane %v1665_v34, 2 }
 0x200   :  { %v1807_v28 = vadd.f32 %v1806_v58, %v1805_v29  ;;  %v1468_v29 = vrot.slane %v1467_v56, 2  ;;  %v1851_v32 = vadd.f32 %v1850_v41, %v1764_v53  ;;  %v2079_v57 = vadd.f32 %v3745_v35, %v2059_v38 }
 0x201   :  { %v1908_v49 = vpop.permute.xlu2 %1907  ;;  %v1472_v11 = vrot.slane %v1381_v3, 4  ;;  %v1659_v61 = vadd.f32 %v1658_v27, %v1572_v4  ;;  %v1464_v37 = vrot.slane %v1463_v30, 1 }
 0x202   :  { %v1949_v18 = vmul.f32 %v1908_v49, %v3962_v48  ;;  %v1868_v39 = vadd.f32 %v1807_v28, %v1676_v15  ;;  %v1469_v40 = vadd.f32 %v1468_v29, %v1467_v56  ;;  %v1852_v27 = vrot.slane %v1851_v32, 2 }
 0x203   :  { %v1473_v12 = vadd.f32 %v1472_v11, %v1381_v3  ;;  %v1620_v3 = vrot.slane %v1619_v14, 1  ;;  %v2118_v28 = vrot.slane %v2079_v57, 3 }
 0x204   :  { %v2000_v60 = vrot.slane %v1949_v18, 4  ;;  %v2060_v47 = vadd.f32 %v1999_v10, %v1868_v39  ;;  %v1470_v63 = vrot.slane %v1469_v40, 1 }
 0x205   :  { %v1324_v9 = vpop.permute.xlu1 %1323  ;;  %v1474_v55 = vrot.slane %v1473_v12, 2  ;;  %v1621_v58 = vadd.f32 %v1620_v3, %v1619_v14 }
 0x206   :  { %v2001_v2 = vadd.f32 %v2000_v60, %v1949_v18  ;;  %v1373_v43 = vmul.f32 %v1324_v9, %v3963_v19  ;;  %v1660_v60 = vrot.slane %v1659_v61, 2  ;;  %v1667_v19 = vadd.f32 %v1666_v44, %v1665_v34 }
 0x207   :  { %v1940_v21 = vpop.permute.xlu0 %1939  ;;  %v1475_v54 = vadd.f32 %v1474_v55, %v1473_v12  ;;  %v2080_v23 = vadd.f32 %v3745_v35, %v2060_v47 }
 0x208   :  { %v1424_v45 = vrot.slane %v1373_v43, 4  ;;  %v1957_v59 = vmul.f32 %v1940_v21, %v1283_v20  ;;  %v2002_v17 = vrot.slane %v2001_v2, 2  ;;  %v2040_v20 = vrot.slane %v3848_v8, 1 }
 0x209   :  { %v1813_v21 = vadd.f32 %v1812_v22, %v1811_v33  ;;  %v1661_v53 = vadd.f32 %v1660_v60, %v1659_v61  ;;  %v1476_v1 = vrot.slane %v1475_v54, 1  ;;  %v2121_v5 = vrot.slane %v2080_v23, 2 }
 0x20a   :  { %v1425_v26 = vadd.f32 %v1424_v45, %v1373_v43  ;;  %v2048_v49 = vrot.slane %v1957_v59, 4  ;;  %v2003_v48 = vadd.f32 %v2002_v17, %v2001_v2  ;;  %v1465_v2 = vadd.f32 %v1464_v37, %v1463_v30 }
 0x20b   :  { %v1662_v17 = vrot.slane %v1661_v53, 1  ;;  %v1477_v30 = vadd.f32 %v1476_v1, %v1475_v54  ;;  %v1853_v33 = vadd.f32 %v1852_v27, %v1851_v32  ;;  %v2041_v29 = vadd.f32 %v2040_v20, %v3848_v8 }
 0x20c   :  { %v1426_v25 = vrot.slane %v1425_v26, 2  ;;  %v2049_v4 = vadd.f32 %v2048_v49, %v1957_v59  ;;  %v2004_v11 = vrot.slane %v2003_v48, 1  ;;  %v1683_v12 = vadd.f32 %v3846_v6, %v1465_v2 }
 0x20d   :  { %v1668_v59 = vrot.slane %v1667_v19, 1  ;;  %v1663_v39 = vadd.f32 %v1662_v17, %v1661_v53  ;;  %v1854_v38 = vrot.slane %v1853_v33, 1 }
 0x20e   :  { %v1427_v31 = vadd.f32 %v1426_v25, %v1425_v26  ;;  %v1748_v18 = vpop.permute.xlu1 %1747  ;;  %v2050_v16 = vrot.slane %v2049_v4, 2  ;;  %v2005_v45 = vadd.f32 %v2004_v11, %v2003_v48 }
 0x20f   :  { %v1765_v50 = vmul.f32 %v1748_v18, %v1234_v7  ;;  %v1875_v7 = vadd.f32 %v3842_v0, %v1683_v12  ;;  %v1669_v6 = vadd.f32 %v1668_v59, %v1667_v19  ;;  %v1471_v18 = vadd.f32 %v1470_v63, %v1469_v40  ;;  %v2637_v40 = vld [vmem:[%s3882_s4] ss:$0 sm:$0xff] }
 0x210   :  { %v1428_v24 = vrot.slane %v1427_v31, 1  ;;  %v2051_v34 = vadd.f32 %v2050_v16, %v2049_v4 }
 0x211   :  { %v1856_v36 = vrot.slane %v1765_v50, 4  ;;  %v1685_v3 = vadd.f32 %v1669_v6, %v1477_v30  ;;  %v2067_v44 = vadd.f32 %v2041_v29, %v1875_v7  ;;  %v1684_v32 = vadd.f32 %v1663_v39, %v1471_v18 }
 0x212   :  { %v1429_v9 = vadd.f32 %v1428_v24, %v1427_v31  ;;  %v2052_v48 = vrot.slane %v2051_v34, 1  ;;  %v1855_v24 = vadd.f32 %v1854_v38, %v1853_v33 }
 0x213   :  { %v1857_v43 = vadd.f32 %v1856_v36, %v1765_v50  ;;  %v2087_v47 = vadd.f32 %v3745_v35, %v2067_v44 }
 0x214   :  { %v1677_v62 = vadd.f32 %v1621_v58, %v1429_v9  ;;  %v2053_v60 = vadd.f32 %v2052_v48, %v2051_v34  ;;  %v1876_v54 = vadd.f32 %v1855_v24, %v1684_v32 }
 0x215   :  { %v1858_v46 = vrot.slane %v1857_v43, 2  ;;  %v2135_v58 = vrot.slane %v2087_v47, 3 }
 0x216   :  { %v1869_v13 = vadd.f32 %v1813_v21, %v1677_v62 }
 0x217   :  { %v1859_v56 = vadd.f32 %v1858_v46, %v1857_v43  ;;  %v1936_v14 = vpop.permute.xlu1 %1935 }
 0x218   :  { %v2061_v26 = vadd.f32 %v2005_v45, %v1869_v13  ;;  %v1956_v15 = vmul.f32 %v1936_v14, %v3839_v42  ;;  %v2120_v42 = vsel %vm2119_vm4, %v2118_v28, %v3818_v52 }
 0x219   :  { %v1860_v41 = vrot.slane %v1859_v56, 1  ;;  %v2123_v31 = vsel %vm2122_vm5, %v2121_v5, %v2120_v42 }
 0x21a   :  { %v2042_v61 = vrot.slane %v1956_v15, 4  ;;  %v2081_v25 = vadd.f32 %v3745_v35, %v2061_v26  ;;  %v2136_v35 = vsel %vm2119_vm4, %v2135_v58, %v3831_v51 }
 0x21b   :  { %v1861_v10 = vadd.f32 %v1860_v41, %v1859_v56 }
 0x21c   :  { %v2043_v55 = vadd.f32 %v2042_v61, %v1956_v15  ;;  %v2124_v49 = vrot.slane %v2081_v25, 1 }
 0x21d   :  { %v1877_v50 = vadd.f32 %v1861_v10, %v1685_v3 }
 0x21e   :  { %v2044_v37 = vrot.slane %v2043_v55, 2  ;;  %v2126_v0 = vsel %vm2125_vm6, %v2124_v49, %v2123_v31 }
 0x21f   :  { %2143 = vst [vmem:[#allocation10] sm:$0xff] %v2126_v0  ;;  %v2069_v8 = vadd.f32 %v2053_v60, %v1877_v50 }
 0x220   :  { %v2045_v22 = vadd.f32 %v2044_v37, %v2043_v55 }
 0x221   :  { %v2089_v11 = vadd.f32 %v2637_v40, %v2069_v8 }
 0x222   :  { %v2046_v52 = vrot.slane %v2045_v22, 1 }
 0x223   :  { %v2139_v2 = vrot.slane %v2089_v11, 1 }
 0x224   :  { %v2047_v4 = vadd.f32 %v2046_v52, %v2045_v22 }
 0x226   :  { %v2068_v36 = vadd.f32 %v2047_v4, %v1876_v54 }
 0x228   :  { %v2088_v9 = vadd.f32 %v2637_v40, %v2068_v36 }
 0x22a   :  { %v2137_v57 = vrot.slane %v2088_v9, 2 }
 0x22c   :  { %v2138_v19 = vsel %vm2122_vm5, %v2137_v57, %v2136_v35 }
 0x22d   :  { %v2140_v43 = vsel %vm2125_vm6, %v2139_v2, %v2138_v19 }
 0x22e   :  { %2144 = vst [vmem:[#allocation10 + $0x8] sm:$0xff] %v2140_v43 }
 0x22f   :  { %2157 = dma.vmem_to_hbm [thread:$0]  %s2150_s18, 256, %s2152_s21, [#allocation4], %s2767_s26, %s2767_s26, %s2768_s27  }
 0x230   :  { %2764 = dma.done.wait [#allocation4], 256  }
 0x231   :  { %2765 = vsyncadd [#allocation4], 4294967040 }
 0x232   :  { %2162 = vsyncpa [#allocation3], 1 }
 0x233   :  { %2163 = vsyncpa [#allocation6], 1 }
 0x234   :  { %2164 = vsyncpa [#allocation9], 1 }
 0x235   :  { %2165 = vsyncpa [#allocation4], 1 }

</bundles_post_ra>
